<compile_context>
chip_gen: v7x
topology: tpu7x:2x2x1
jax: 0.10.0
libtpu: 0.0.40
codegen_flags: <defaults>
</compile_context>

<pallas_src>
import math

import jax
import jax.numpy as jnp
import numpy as np
from jax.experimental import pallas as pl
from jax.experimental.pallas import tpu as pltpu

TIMELEN = 15
BN_EPS = 1e-5
IMG_HW = 45                      # 45 -> 22 -> 11 -> 8 -> 5 -> 3
LAYER_SPECS = [                  # (kernel, stride, use_bn)
    (3, 2, False),
    (2, 2, True),
    (4, 1, True),
    (4, 1, True),
    (3, 1, True),
]
OP_DTYPE = jnp.bfloat16          # HBM storage dtype of the big operator matrices


# ----------------------------------------------------------------------------
# Pallas kernel (whole network, one branch per grid step)
# ----------------------------------------------------------------------------
def make_kernel(geoms, n_batch):
    """Ref order: x, then per layer [S (stride>1 only), B,
    (bias | gamma, beta, P)], then [Wh, G, bh], then the output ref."""

    def kernel(x_ref, *rest):
        refs, out_ref = rest[:-1], rest[-1]
        idx = 0
        x = x_ref[0]                                     # (N*H0, W0*C) f32
        for g in geoms:
            k, s, hh, ho = g["k"], g["s"], g["H"], g["Ho"]

            # Gather the k kernel-row taps and lane-concatenate them so every
            # layer is ONE deeper-K MXU matmul (tap-stacked B).
            if s == 1:
                # Stride-1: row selection is a contiguous per-batch window ->
                # static slices, no S matmul / no S DMA.
                taps = []
                for i in range(k):
                    rows = [x[b * hh + i: b * hh + i + ho, :]
                            for b in range(n_batch)]
                    taps.append(rows[0] if n_batch == 1
                                else jnp.concatenate(rows, axis=0))
            else:
                s_ref = refs[idx]
                idx += 1
                # S is 0/1 -> bf16 storage is exact; upcast keeps x in f32.
                taps = [jnp.dot(s_ref[i].astype(jnp.float32), x,
                                preferred_element_type=jnp.float32)
                        for i in range(k)]
            t = jnp.concatenate(taps, axis=-1)            # (N*Ho, k*W*C) f32

            b_ref = refs[idx]
            idx += 1
            # B is bf16 in HBM (halves operand DMA); upcast in VMEM so the
            # matmul and its accumulation stay f32.
            y = jnp.dot(t, b_ref[0].astype(jnp.float32),
                        preferred_element_type=jnp.float32)   # (N*Ho, Wo*C)

            if g["use_bn"]:
                gam_ref, bet_ref, p_ref = refs[idx], refs[idx + 1], refs[idx + 2]
                idx += 3
                inv_cnt = 1.0 / float(n_batch * ho * ho)
                s1 = jnp.sum(y, axis=0, keepdims=True)            # (1, Wo*C)
                s2 = jnp.sum(y * y, axis=0, keepdims=True)
                # One fused M=2 pooling dot instead of two M=1 dots; P is 0/1.
                pooled = jnp.dot(jnp.concatenate([s1, s2], axis=0),
                                 p_ref[...].astype(jnp.float32),
                                 preferred_element_type=jnp.float32) * inv_cnt
                mean, ex2 = pooled[0:1, :], pooled[1:2, :]
                var = ex2 - mean * mean                  # biased, one-pass
                y = (y - mean) * jax.lax.rsqrt(var + BN_EPS)
                y = y * gam_ref[0] + bet_ref[0]
            else:
                bias_ref = refs[idx]
                idx += 1
                y = y + bias_ref[0]
            x = jax.nn.sigmoid(y)                        # (N*Ho, Wo*C) f32

        # fcs / fcd head, folded into the kernel tail.
        wh_ref, g_ref, bh_ref = refs[idx], refs[idx + 1], refs[idx + 2]
        zrow = jnp.sum(x * wh_ref[0], axis=1, keepdims=True)      # (N*3, 1)
        head = jnp.dot(g_ref[...], zrow,
                       preferred_element_type=jnp.float32) + bh_ref[0]
        out_ref[0] = head                                # (N, 1) per branch

    return kernel


# ----------------------------------------------------------------------------
# BlockSpec helpers
# ----------------------------------------------------------------------------
def _shared_spec(shape):
    r = len(shape)
    return pl.BlockSpec(tuple(shape), lambda b, _r=r: (0,) * _r)


def _branch_spec(shape):
    r = len(shape)
    return pl.BlockSpec((1,) + tuple(shape[1:]),
                        lambda b, _r=r: (b,) + (0,) * (_r - 1))


# ----------------------------------------------------------------------------
# Parameter preprocessing (pure numpy, done once outside jit)
# ----------------------------------------------------------------------------
def build_s_mats(n, h, ho, k, s):
    """(k, N*Ho, N*H) 0/1 row-selection matrices: row n*Ho+r picks n*H+s*r+i."""
    mat = np.zeros((k, n * ho, n * h), np.float32)
    for i in range(k):
        for b in range(n):
            for r in range(ho):
                mat[i, b * ho + r, b * h + s * r + i] = 1.0
    return mat


def build_b_mats(w, w_in, w_out, s):
    """(kh, W_in*Cin, Wo*Cout) block-Toeplitz tap matrices for one layer."""
    cout, cin, kh, kw = w.shape
    mat = np.zeros((kh, w_in * cin, w_out * cout), np.float32)
    for i in range(kh):
        for j in range(kw):
            blk = w[:, :, i, j].T                        # (Cin, Cout)
            for wo in range(w_out):
                r0 = (s * wo + j) * cin
                c0 = wo * cout
                mat[i, r0:r0 + cin, c0:c0 + cout] = blk
    return mat


def build_p_mat(w_out, c):
    """(Wo*C, Wo*C) channel-pooling matrix: 1 where both columns share a channel."""
    chan = np.arange(w_out * c) % c
    return (chan[:, None] == chan[None, :]).astype(np.float32)


def build_head_w(fc_w, c, ho, n):
    """fcs/fcd weight (1, C*ho*ho) reordered to the (row=n*ho+h, col=w*C+c) layout."""
    m = np.asarray(fc_w, np.float32).reshape(c, ho, ho)   # (c, ho, wo)
    m = np.transpose(m, (1, 2, 0)).reshape(ho, ho * c)    # col = wo*C + c
    return np.tile(m, (n, 1))                             # (N*ho, ho*C)


def prepare(params, n_batch):
    c = TIMELEN
    geoms, h = [], IMG_HW
    for (k, s, use_bn) in LAYER_SPECS:
        ho = (h - k) // s + 1
        geoms.append(dict(k=k, s=s, use_bn=use_bn, H=h, Ho=ho))
        h = ho

    operands, specs = [], []

    def add_shared(arr, dtype=jnp.float32):
        a = np.asarray(arr, np.float32)
        operands.append(jnp.asarray(a, dtype=dtype))
        specs.append(_shared_spec(a.shape))

    def add_branch(pair, dtype=jnp.float32):
        a = np.stack([np.asarray(p, np.float32) for p in pair], axis=0)
        operands.append(jnp.asarray(a, dtype=dtype))
        specs.append(_branch_spec(a.shape))

    branches = (params["convs"], params["convd"])
    for li, g in enumerate(geoms):
        k, s, hh, ho = g["k"], g["s"], g["H"], g["Ho"]
        if s != 1:
            # 0/1 selection matrices: bf16 storage is exact.
            add_shared(build_s_mats(n_batch, hh, ho, k, s), OP_DTYPE)
        # Block-Toeplitz conv-tap matrices, taps stacked along rows so each
        # layer is a single (N*Ho, k*W*C) @ (k*W*C, Wo*C) matmul.
        add_branch(
            [build_b_mats(np.asarray(br[li]["w"], np.float32), hh, ho, s)
                 .reshape(k * hh * c, ho * c)
             for br in branches], OP_DTYPE)
        if g["use_bn"]:
            # Conv bias is skipped here: it cancels exactly under BN's
            # (training-mode) mean subtraction.
            add_branch([np.tile(np.asarray(br[li]["gamma"], np.float32), ho)[None]
                        for br in branches])
            add_branch([np.tile(np.asarray(br[li]["beta"], np.float32), ho)[None]
                        for br in branches])
            add_shared(build_p_mat(ho, c), OP_DTYPE)     # 0/1, exact in bf16
        else:
            add_branch([np.tile(np.asarray(br[li]["b"], np.float32), ho)[None]
                        for br in branches])

    ho_last = geoms[-1]["Ho"]                             # 3
    add_branch([build_head_w(params[name], c, ho_last, n_batch)
                for name in ("fcs_w", "fcd_w")])
    add_shared(np.kron(np.eye(n_batch, dtype=np.float32),
                       np.ones((1, ho_last), np.float32)))   # (N, N*3) row-fold
    add_branch([np.asarray(params[name], np.float32).reshape(1, 1)
                for name in ("fcs_b", "fcd_b")])

    return dict(operands=operands, specs=specs, geoms=geoms, n=n_batch,
                fc_w=jnp.asarray(params["fc_w"], jnp.float32),
                fc_b=jnp.asarray(params["fc_b"], jnp.float32))


# ----------------------------------------------------------------------------
# Forward pass
# ----------------------------------------------------------------------------
def mynet_forward(imgs, imgd, prep):
    n, c, hw = imgs.shape[0], imgs.shape[1], imgs.shape[2]

    def to2d(x):                                          # NCHW -> (N*H, W*C)
        return jnp.transpose(x, (0, 2, 3, 1)).reshape(n * hw, hw * c)

    x_all = jnp.stack([to2d(imgs), to2d(imgd)], axis=0)   # (2, N*H, W*C)
    kernel = make_kernel(prep["geoms"], n)
    in_specs = [_branch_spec(x_all.shape)] + list(prep["specs"])

    out2 = pl.pallas_call(
        kernel,
        out_shape=jax.ShapeDtypeStruct((2, n, 1), jnp.float32),
        grid=(2,),                                        # one step per branch
        in_specs=in_specs,
        out_specs=pl.BlockSpec((1, n, 1), lambda b: (b, 0, 0)),
        compiler_params=pltpu.CompilerParams(
            dimension_semantics=("parallel",),
            vmem_limit_bytes=32 * 1024 * 1024),
    )(x_all, *prep["operands"])

    # Final Linear(2, 1): mixes the two branch head outputs (tiny XLA epilogue).
    fc_w, fc_b = prep["fc_w"], prep["fc_b"]
    return out2[0] * fc_w[0, 0] + out2[1] * fc_w[0, 1] + fc_b[0]


# ----------------------------------------------------------------------------
# Pure-JAX reference (for a correctness check against the fused kernel)
# ----------------------------------------------------------------------------
def reference_forward(imgs, imgd, params):
    hi = jax.lax.Precision.HIGHEST

    def branch(x, layers):
        for lp, (k, s, use_bn) in zip(layers, LAYER_SPECS):
            z = jax.lax.conv_general_dilated(
                x, lp["w"], window_strides=(s, s), padding="VALID",
                dimension_numbers=("NCHW", "OIHW", "NCHW"), precision=hi)
            z = z + lp["b"].reshape(1, -1, 1, 1)
            if use_bn:
                mean = jnp.mean(z, axis=(0, 2, 3), keepdims=True)
                var = jnp.mean(jnp.square(z - mean), axis=(0, 2, 3),
                               keepdims=True)
                z = (z - mean) * jax.lax.rsqrt(var + BN_EPS)
                z = (z * lp["gamma"].reshape(1, -1, 1, 1)
                     + lp["beta"].reshape(1, -1, 1, 1))
            x = jax.nn.sigmoid(z)
        return x

    n = imgs.shape[0]
    fs = branch(imgs, params["convs"]).reshape(n, -1)
    fd = branch(imgd, params["convd"]).reshape(n, -1)
    outs = jnp.matmul(fs, params["fcs_w"].T, precision=hi) + params["fcs_b"]
    outd = jnp.matmul(fd, params["fcd_w"].T, precision=hi) + params["fcd_b"]
    cat = jnp.concatenate([outs, outd], axis=1)
    return jnp.matmul(cat, params["fc_w"].T, precision=hi) + params["fc_b"]


# ----------------------------------------------------------------------------
# Deterministic parameter initialization (PyTorch default-style uniform bounds)
# ----------------------------------------------------------------------------
def make_conv_params(key, cin, cout, k):
    k1, k2 = jax.random.split(key)
    bound = 1.0 / math.sqrt(cin * k * k)
    w = jax.random.uniform(k1, (cout, cin, k, k), jnp.float32, -bound, bound)
    b = jax.random.uniform(k2, (cout,), jnp.float32, -bound, bound)
    return {"w": w, "b": b,
            "gamma": jnp.ones((cout,), jnp.float32),
            "beta": jnp.zeros((cout,), jnp.float32)}


def make_branch_params(key):
    keys = jax.random.split(key, len(LAYER_SPECS))
    return [make_conv_params(kk, TIMELEN, TIMELEN, spec[0])
            for kk, spec in zip(keys, LAYER_SPECS)]


def make_linear(key, fin, fout):
    k1, k2 = jax.random.split(key)
    bound = 1.0 / math.sqrt(fin)
    w = jax.random.uniform(k1, (fout, fin), jnp.float32, -bound, bound)
    b = jax.random.uniform(k2, (fout,), jnp.float32, -bound, bound)
    return w, b


def make_params(key):
    ks = jax.random.split(key, 5)
    fcs_w, fcs_b = make_linear(ks[2], 3 * 3 * TIMELEN, 1)
    fcd_w, fcd_b = make_linear(ks[3], 3 * 3 * TIMELEN, 1)
    fc_w, fc_b = make_linear(ks[4], 2, 1)
    return {"convs": make_branch_params(ks[0]),
            "convd": make_branch_params(ks[1]),
            "fcs_w": fcs_w, "fcs_b": fcs_b,
            "fcd_w": fcd_w, "fcd_b": fcd_b,
            "fc_w": fc_w, "fc_b": fc_b}


if __name__ == "__main__":
    key = jax.random.PRNGKey(0)
    kp, ks, kd = jax.random.split(key, 3)
    params = make_params(kp)

    # Input spatial size 45 is implied by the module: 45->22->11->8->5->3 and
    # fcs/fcd expect 3*3*15 = 135 features.
    batch = 2
    imgs = jax.random.normal(ks, (batch, TIMELEN, IMG_HW, IMG_HW), jnp.float32)
    imgd = jax.random.normal(kd, (batch, TIMELEN, IMG_HW, IMG_HW), jnp.float32)

    prep = prepare(params, batch)
    fwd = jax.jit(lambda a, b: mynet_forward(a, b, prep))
    out = fwd(imgs, imgd)
    jax.block_until_ready(out)
    assert out.shape == (batch, 1), out.shape

    ref = reference_forward(imgs, imgd, params)
    # bf16 HBM storage of the conv-tap operator matrices (per perf review)
    # perturbs the effective conv weights by <= 2^-8 relative; activations and
    # accumulation stay f32, so the check against the pure-f32 reference is
    # run at a slightly relaxed 5e-3 tolerance.
    np.testing.assert_allclose(np.asarray(out), np.asarray(ref),
                               rtol=5e-3, atol=5e-3)
    print("KERNEL_OK")
</pallas_src>

<mosaic_0001>
module attributes {stable_mosaic.version = 11 : i64} {
  func.func @kernel(%arg0: i32, %arg1: memref<1x90x675xf32, #tpu.memory_space<vmem>>, %arg2: memref<3x44x90xbf16, #tpu.memory_space<vmem>>, %arg3: memref<1x2025x330xbf16, #tpu.memory_space<vmem>>, %arg4: memref<1x1x330xf32, #tpu.memory_space<vmem>>, %arg5: memref<2x22x44xbf16, #tpu.memory_space<vmem>>, %arg6: memref<1x660x165xbf16, #tpu.memory_space<vmem>>, %arg7: memref<1x1x165xf32, #tpu.memory_space<vmem>>, %arg8: memref<1x1x165xf32, #tpu.memory_space<vmem>>, %arg9: memref<165x165xbf16, #tpu.memory_space<vmem>>, %arg10: memref<1x660x120xbf16, #tpu.memory_space<vmem>>, %arg11: memref<1x1x120xf32, #tpu.memory_space<vmem>>, %arg12: memref<1x1x120xf32, #tpu.memory_space<vmem>>, %arg13: memref<120x120xbf16, #tpu.memory_space<vmem>>, %arg14: memref<1x480x75xbf16, #tpu.memory_space<vmem>>, %arg15: memref<1x1x75xf32, #tpu.memory_space<vmem>>, %arg16: memref<1x1x75xf32, #tpu.memory_space<vmem>>, %arg17: memref<75x75xbf16, #tpu.memory_space<vmem>>, %arg18: memref<1x225x45xbf16, #tpu.memory_space<vmem>>, %arg19: memref<1x1x45xf32, #tpu.memory_space<vmem>>, %arg20: memref<1x1x45xf32, #tpu.memory_space<vmem>>, %arg21: memref<45x45xbf16, #tpu.memory_space<vmem>>, %arg22: memref<1x6x45xf32, #tpu.memory_space<vmem>>, %arg23: memref<2x6xf32, #tpu.memory_space<vmem>>, %arg24: memref<1x1x1xf32, #tpu.memory_space<vmem>>, %arg25: memref<1x2x1xf32, #tpu.memory_space<vmem>>) attributes {dimension_semantics = [#tpu.dimension_semantics<parallel>], iteration_bounds = array<i64: 2>, scalar_prefetch = 0 : i64, scratch_operands = 0 : i64, tpu.core_type = #tpu.core_type<tc>, window_params = [{transform_indices = @transform_0, window_bounds = array<i64: 1, 90, 675>}, {pipeline_mode = #tpu.pipeline_mode<synchronous>, transform_indices = @transform_1, window_bounds = array<i64: 3, 44, 90>}, {transform_indices = @transform_2, window_bounds = array<i64: 1, 2025, 330>}, {transform_indices = @transform_3, window_bounds = array<i64: 1, 1, 330>}, {pipeline_mode = #tpu.pipeline_mode<synchronous>, transform_indices = @transform_4, window_bounds = array<i64: 2, 22, 44>}, {transform_indices = @transform_5, window_bounds = array<i64: 1, 660, 165>}, {transform_indices = @transform_6, window_bounds = array<i64: 1, 1, 165>}, {transform_indices = @transform_7, window_bounds = array<i64: 1, 1, 165>}, {pipeline_mode = #tpu.pipeline_mode<synchronous>, transform_indices = @transform_8, window_bounds = array<i64: 165, 165>}, {transform_indices = @transform_9, window_bounds = array<i64: 1, 660, 120>}, {transform_indices = @transform_10, window_bounds = array<i64: 1, 1, 120>}, {transform_indices = @transform_11, window_bounds = array<i64: 1, 1, 120>}, {pipeline_mode = #tpu.pipeline_mode<synchronous>, transform_indices = @transform_12, window_bounds = array<i64: 120, 120>}, {transform_indices = @transform_13, window_bounds = array<i64: 1, 480, 75>}, {transform_indices = @transform_14, window_bounds = array<i64: 1, 1, 75>}, {transform_indices = @transform_15, window_bounds = array<i64: 1, 1, 75>}, {pipeline_mode = #tpu.pipeline_mode<synchronous>, transform_indices = @transform_16, window_bounds = array<i64: 75, 75>}, {transform_indices = @transform_17, window_bounds = array<i64: 1, 225, 45>}, {transform_indices = @transform_18, window_bounds = array<i64: 1, 1, 45>}, {transform_indices = @transform_19, window_bounds = array<i64: 1, 1, 45>}, {pipeline_mode = #tpu.pipeline_mode<synchronous>, transform_indices = @transform_20, window_bounds = array<i64: 45, 45>}, {transform_indices = @transform_21, window_bounds = array<i64: 1, 6, 45>}, {pipeline_mode = #tpu.pipeline_mode<synchronous>, transform_indices = @transform_22, window_bounds = array<i64: 2, 6>}, {transform_indices = @transform_23, window_bounds = array<i64: 1, 1, 1>}, {transform_indices = @transform_24, window_bounds = array<i64: 1, 2, 1>}]} {
    %c0 = arith.constant 0 : index
    %c0_0 = arith.constant 0 : index
    %c0_1 = arith.constant 0 : index
    %0 = vector.load %arg1[%c0, %c0_0, %c0_1] : memref<1x90x675xf32, #tpu.memory_space<vmem>>, vector<1x90x675xf32>
    %1 = vector.shape_cast %0 : vector<1x90x675xf32> to vector<90x675xf32>
    %c0_2 = arith.constant 0 : index
    %c0_3 = arith.constant 0 : index
    %c0_4 = arith.constant 0 : index
    %2 = vector.load %arg2[%c0_2, %c0_3, %c0_4] : memref<3x44x90xbf16, #tpu.memory_space<vmem>>, vector<1x44x90xbf16>
    %3 = vector.shape_cast %2 : vector<1x44x90xbf16> to vector<44x90xbf16>
    %4 = arith.extf %3 : vector<44x90xbf16> to vector<44x90xf32>
    %cst = arith.constant dense<0.000000e+00> : vector<44x675xf32>
    %5 = tpu.matmul %4, %1, %cst {dimension_numbers = #tpu.dot_dimension_numbers<[1], [0], [0], [1], [0, 0, 1, 1], [], []>} : vector<44x90xf32>, vector<90x675xf32>, vector<44x675xf32> -> vector<44x675xf32>
    %c1 = arith.constant 1 : index
    %c0_5 = arith.constant 0 : index
    %c0_6 = arith.constant 0 : index
    %6 = vector.load %arg2[%c1, %c0_5, %c0_6] : memref<3x44x90xbf16, #tpu.memory_space<vmem>>, vector<1x44x90xbf16>
    %7 = vector.shape_cast %6 : vector<1x44x90xbf16> to vector<44x90xbf16>
    %8 = arith.extf %7 : vector<44x90xbf16> to vector<44x90xf32>
    %cst_7 = arith.constant dense<0.000000e+00> : vector<44x675xf32>
    %9 = tpu.matmul %8, %1, %cst_7 {dimension_numbers = #tpu.dot_dimension_numbers<[1], [0], [0], [1], [0, 0, 1, 1], [], []>} : vector<44x90xf32>, vector<90x675xf32>, vector<44x675xf32> -> vector<44x675xf32>
    %c2 = arith.constant 2 : index
    %c0_8 = arith.constant 0 : index
    %c0_9 = arith.constant 0 : index
    %10 = vector.load %arg2[%c2, %c0_8, %c0_9] : memref<3x44x90xbf16, #tpu.memory_space<vmem>>, vector<1x44x90xbf16>
    %11 = vector.shape_cast %10 : vector<1x44x90xbf16> to vector<44x90xbf16>
    %12 = arith.extf %11 : vector<44x90xbf16> to vector<44x90xf32>
    %cst_10 = arith.constant dense<0.000000e+00> : vector<44x675xf32>
    %13 = tpu.matmul %12, %1, %cst_10 {dimension_numbers = #tpu.dot_dimension_numbers<[1], [0], [0], [1], [0, 0, 1, 1], [], []>} : vector<44x90xf32>, vector<90x675xf32>, vector<44x675xf32> -> vector<44x675xf32>
    %14 = tpu.concatenate %5, %9, %13 in 1 : vector<44x675xf32>, vector<44x675xf32>, vector<44x675xf32> -> vector<44x2025xf32>
    %c0_11 = arith.constant 0 : index
    %c0_12 = arith.constant 0 : index
    %c0_13 = arith.constant 0 : index
    %15 = vector.load %arg3[%c0_11, %c0_12, %c0_13] : memref<1x2025x330xbf16, #tpu.memory_space<vmem>>, vector<1x2025x330xbf16>
    %16 = vector.shape_cast %15 : vector<1x2025x330xbf16> to vector<2025x330xbf16>
    %17 = arith.extf %16 : vector<2025x330xbf16> to vector<2025x330xf32>
    %cst_14 = arith.constant dense<0.000000e+00> : vector<44x330xf32>
    %18 = tpu.matmul %14, %17, %cst_14 {dimension_numbers = #tpu.dot_dimension_numbers<[1], [0], [0], [1], [0, 0, 1, 1], [], []>} : vector<44x2025xf32>, vector<2025x330xf32>, vector<44x330xf32> -> vector<44x330xf32>
    %c0_15 = arith.constant 0 : index
    %c0_16 = arith.constant 0 : index
    %c0_17 = arith.constant 0 : index
    %19 = vector.load %arg4[%c0_15, %c0_16, %c0_17] : memref<1x1x330xf32, #tpu.memory_space<vmem>>, vector<1x1x330xf32>
    %20 = vector.shape_cast %19 : vector<1x1x330xf32> to vector<1x330xf32>
    %21 = vector.broadcast %20 : vector<1x330xf32> to vector<44x330xf32>
    %22 = arith.addf %18, %21 : vector<44x330xf32>
    %23 = arith.negf %22 : vector<44x330xf32>
    %24 = math.exp %23 : vector<44x330xf32>
    %cst_18 = arith.constant 1.000000e+00 : f32
    %25 = vector.broadcast %cst_18 : f32 to vector<44x330xf32>
    %26 = arith.addf %25, %24 : vector<44x330xf32>
    %27 = arith.divf %25, %26 : vector<44x330xf32>
    %c0_19 = arith.constant 0 : index
    %c0_20 = arith.constant 0 : index
    %c0_21 = arith.constant 0 : index
    %28 = vector.load %arg5[%c0_19, %c0_20, %c0_21] : memref<2x22x44xbf16, #tpu.memory_space<vmem>>, vector<1x22x44xbf16>
    %29 = vector.shape_cast %28 : vector<1x22x44xbf16> to vector<22x44xbf16>
    %30 = arith.extf %29 : vector<22x44xbf16> to vector<22x44xf32>
    %cst_22 = arith.constant dense<0.000000e+00> : vector<22x330xf32>
    %31 = tpu.matmul %30, %27, %cst_22 {dimension_numbers = #tpu.dot_dimension_numbers<[1], [0], [0], [1], [0, 0, 1, 1], [], []>} : vector<22x44xf32>, vector<44x330xf32>, vector<22x330xf32> -> vector<22x330xf32>
    %c1_23 = arith.constant 1 : index
    %c0_24 = arith.constant 0 : index
    %c0_25 = arith.constant 0 : index
    %32 = vector.load %arg5[%c1_23, %c0_24, %c0_25] : memref<2x22x44xbf16, #tpu.memory_space<vmem>>, vector<1x22x44xbf16>
    %33 = vector.shape_cast %32 : vector<1x22x44xbf16> to vector<22x44xbf16>
    %34 = arith.extf %33 : vector<22x44xbf16> to vector<22x44xf32>
    %cst_26 = arith.constant dense<0.000000e+00> : vector<22x330xf32>
    %35 = tpu.matmul %34, %27, %cst_26 {dimension_numbers = #tpu.dot_dimension_numbers<[1], [0], [0], [1], [0, 0, 1, 1], [], []>} : vector<22x44xf32>, vector<44x330xf32>, vector<22x330xf32> -> vector<22x330xf32>
    %36 = tpu.concatenate %31, %35 in 1 : vector<22x330xf32>, vector<22x330xf32> -> vector<22x660xf32>
    %c0_27 = arith.constant 0 : index
    %c0_28 = arith.constant 0 : index
    %c0_29 = arith.constant 0 : index
    %37 = vector.load %arg6[%c0_27, %c0_28, %c0_29] : memref<1x660x165xbf16, #tpu.memory_space<vmem>>, vector<1x660x165xbf16>
    %38 = vector.shape_cast %37 : vector<1x660x165xbf16> to vector<660x165xbf16>
    %39 = arith.extf %38 : vector<660x165xbf16> to vector<660x165xf32>
    %cst_30 = arith.constant dense<0.000000e+00> : vector<22x165xf32>
    %40 = tpu.matmul %36, %39, %cst_30 {dimension_numbers = #tpu.dot_dimension_numbers<[1], [0], [0], [1], [0, 0, 1, 1], [], []>} : vector<22x660xf32>, vector<660x165xf32>, vector<22x165xf32> -> vector<22x165xf32>
    %cst_31 = arith.constant dense<0.000000e+00> : vector<165xf32>
    %41 = vector.multi_reduction <add>, %40, %cst_31 [0] : vector<22x165xf32> to vector<165xf32>
    %42 = vector.shape_cast %41 : vector<165xf32> to vector<1x165xf32>
    %43 = arith.mulf %40, %40 : vector<22x165xf32>
    %cst_32 = arith.constant dense<0.000000e+00> : vector<165xf32>
    %44 = vector.multi_reduction <add>, %43, %cst_32 [0] : vector<22x165xf32> to vector<165xf32>
    %45 = vector.shape_cast %44 : vector<165xf32> to vector<1x165xf32>
    %46 = tpu.concatenate %42, %45 in 0 : vector<1x165xf32>, vector<1x165xf32> -> vector<2x165xf32>
    %c0_33 = arith.constant 0 : index
    %c0_34 = arith.constant 0 : index
    %47 = vector.load %arg9[%c0_33, %c0_34] : memref<165x165xbf16, #tpu.memory_space<vmem>>, vector<165x165xbf16>
    %48 = arith.extf %47 : vector<165x165xbf16> to vector<165x165xf32>
    %cst_35 = arith.constant dense<0.000000e+00> : vector<2x165xf32>
    %49 = tpu.matmul %46, %48, %cst_35 {dimension_numbers = #tpu.dot_dimension_numbers<[1], [0], [0], [1], [0, 0, 1, 1], [], []>} : vector<2x165xf32>, vector<165x165xf32>, vector<2x165xf32> -> vector<2x165xf32>
    %cst_36 = arith.constant 0.00413223123 : f32
    %50 = vector.broadcast %cst_36 : f32 to vector<2x165xf32>
    %51 = arith.mulf %49, %50 : vector<2x165xf32>
    %52 = vector.extract_strided_slice %51 {offsets = [0, 0], sizes = [1, 165], strides = [1, 1]} : vector<2x165xf32> to vector<1x165xf32>
    %53 = vector.extract_strided_slice %51 {offsets = [1, 0], sizes = [1, 165], strides = [1, 1]} : vector<2x165xf32> to vector<1x165xf32>
    %54 = arith.mulf %52, %52 : vector<1x165xf32>
    %55 = arith.subf %53, %54 : vector<1x165xf32>
    %56 = vector.broadcast %52 : vector<1x165xf32> to vector<22x165xf32>
    %57 = arith.subf %40, %56 : vector<22x165xf32>
    %cst_37 = arith.constant 9.99999974E-6 : f32
    %58 = vector.broadcast %cst_37 : f32 to vector<1x165xf32>
    %59 = arith.addf %55, %58 : vector<1x165xf32>
    %60 = math.rsqrt %59 : vector<1x165xf32>
    %61 = vector.broadcast %60 : vector<1x165xf32> to vector<22x165xf32>
    %62 = arith.mulf %57, %61 : vector<22x165xf32>
    %c0_38 = arith.constant 0 : index
    %c0_39 = arith.constant 0 : index
    %c0_40 = arith.constant 0 : index
    %63 = vector.load %arg7[%c0_38, %c0_39, %c0_40] : memref<1x1x165xf32, #tpu.memory_space<vmem>>, vector<1x1x165xf32>
    %64 = vector.shape_cast %63 : vector<1x1x165xf32> to vector<1x165xf32>
    %65 = vector.broadcast %64 : vector<1x165xf32> to vector<22x165xf32>
    %66 = arith.mulf %62, %65 : vector<22x165xf32>
    %c0_41 = arith.constant 0 : index
    %c0_42 = arith.constant 0 : index
    %c0_43 = arith.constant 0 : index
    %67 = vector.load %arg8[%c0_41, %c0_42, %c0_43] : memref<1x1x165xf32, #tpu.memory_space<vmem>>, vector<1x1x165xf32>
    %68 = vector.shape_cast %67 : vector<1x1x165xf32> to vector<1x165xf32>
    %69 = vector.broadcast %68 : vector<1x165xf32> to vector<22x165xf32>
    %70 = arith.addf %66, %69 : vector<22x165xf32>
    %71 = arith.negf %70 : vector<22x165xf32>
    %72 = math.exp %71 : vector<22x165xf32>
    %cst_44 = arith.constant 1.000000e+00 : f32
    %73 = vector.broadcast %cst_44 : f32 to vector<22x165xf32>
    %74 = arith.addf %73, %72 : vector<22x165xf32>
    %75 = arith.divf %73, %74 : vector<22x165xf32>
    %76 = vector.extract_strided_slice %75 {offsets = [0, 0], sizes = [8, 165], strides = [1, 1]} : vector<22x165xf32> to vector<8x165xf32>
    %77 = vector.extract_strided_slice %75 {offsets = [11, 0], sizes = [8, 165], strides = [1, 1]} : vector<22x165xf32> to vector<8x165xf32>
    %78 = tpu.concatenate %76, %77 in 0 : vector<8x165xf32>, vector<8x165xf32> -> vector<16x165xf32>
    %79 = vector.extract_strided_slice %75 {offsets = [1, 0], sizes = [8, 165], strides = [1, 1]} : vector<22x165xf32> to vector<8x165xf32>
    %80 = vector.extract_strided_slice %75 {offsets = [12, 0], sizes = [8, 165], strides = [1, 1]} : vector<22x165xf32> to vector<8x165xf32>
    %81 = tpu.concatenate %79, %80 in 0 : vector<8x165xf32>, vector<8x165xf32> -> vector<16x165xf32>
    %82 = vector.extract_strided_slice %75 {offsets = [2, 0], sizes = [8, 165], strides = [1, 1]} : vector<22x165xf32> to vector<8x165xf32>
    %83 = vector.extract_strided_slice %75 {offsets = [13, 0], sizes = [8, 165], strides = [1, 1]} : vector<22x165xf32> to vector<8x165xf32>
    %84 = tpu.concatenate %82, %83 in 0 : vector<8x165xf32>, vector<8x165xf32> -> vector<16x165xf32>
    %85 = vector.extract_strided_slice %75 {offsets = [3, 0], sizes = [8, 165], strides = [1, 1]} : vector<22x165xf32> to vector<8x165xf32>
    %86 = vector.extract_strided_slice %75 {offsets = [14, 0], sizes = [8, 165], strides = [1, 1]} : vector<22x165xf32> to vector<8x165xf32>
    %87 = tpu.concatenate %85, %86 in 0 : vector<8x165xf32>, vector<8x165xf32> -> vector<16x165xf32>
    %88 = tpu.concatenate %78, %81, %84, %87 in 1 : vector<16x165xf32>, vector<16x165xf32>, vector<16x165xf32>, vector<16x165xf32> -> vector<16x660xf32>
    %c0_45 = arith.constant 0 : index
    %c0_46 = arith.constant 0 : index
    %c0_47 = arith.constant 0 : index
    %89 = vector.load %arg10[%c0_45, %c0_46, %c0_47] : memref<1x660x120xbf16, #tpu.memory_space<vmem>>, vector<1x660x120xbf16>
    %90 = vector.shape_cast %89 : vector<1x660x120xbf16> to vector<660x120xbf16>
    %91 = arith.extf %90 : vector<660x120xbf16> to vector<660x120xf32>
    %cst_48 = arith.constant dense<0.000000e+00> : vector<16x120xf32>
    %92 = tpu.matmul %88, %91, %cst_48 {dimension_numbers = #tpu.dot_dimension_numbers<[1], [0], [0], [1], [0, 0, 1, 1], [], []>} : vector<16x660xf32>, vector<660x120xf32>, vector<16x120xf32> -> vector<16x120xf32>
    %cst_49 = arith.constant dense<0.000000e+00> : vector<120xf32>
    %93 = vector.multi_reduction <add>, %92, %cst_49 [0] : vector<16x120xf32> to vector<120xf32>
    %94 = vector.shape_cast %93 : vector<120xf32> to vector<1x120xf32>
    %95 = arith.mulf %92, %92 : vector<16x120xf32>
    %cst_50 = arith.constant dense<0.000000e+00> : vector<120xf32>
    %96 = vector.multi_reduction <add>, %95, %cst_50 [0] : vector<16x120xf32> to vector<120xf32>
    %97 = vector.shape_cast %96 : vector<120xf32> to vector<1x120xf32>
    %98 = tpu.concatenate %94, %97 in 0 : vector<1x120xf32>, vector<1x120xf32> -> vector<2x120xf32>
    %c0_51 = arith.constant 0 : index
    %c0_52 = arith.constant 0 : index
    %99 = vector.load %arg13[%c0_51, %c0_52] : memref<120x120xbf16, #tpu.memory_space<vmem>>, vector<120x120xbf16>
    %100 = arith.extf %99 : vector<120x120xbf16> to vector<120x120xf32>
    %cst_53 = arith.constant dense<0.000000e+00> : vector<2x120xf32>
    %101 = tpu.matmul %98, %100, %cst_53 {dimension_numbers = #tpu.dot_dimension_numbers<[1], [0], [0], [1], [0, 0, 1, 1], [], []>} : vector<2x120xf32>, vector<120x120xf32>, vector<2x120xf32> -> vector<2x120xf32>
    %cst_54 = arith.constant 7.812500e-03 : f32
    %102 = vector.broadcast %cst_54 : f32 to vector<2x120xf32>
    %103 = arith.mulf %101, %102 : vector<2x120xf32>
    %104 = vector.extract_strided_slice %103 {offsets = [0, 0], sizes = [1, 120], strides = [1, 1]} : vector<2x120xf32> to vector<1x120xf32>
    %105 = vector.extract_strided_slice %103 {offsets = [1, 0], sizes = [1, 120], strides = [1, 1]} : vector<2x120xf32> to vector<1x120xf32>
    %106 = arith.mulf %104, %104 : vector<1x120xf32>
    %107 = arith.subf %105, %106 : vector<1x120xf32>
    %108 = vector.broadcast %104 : vector<1x120xf32> to vector<16x120xf32>
    %109 = arith.subf %92, %108 : vector<16x120xf32>
    %cst_55 = arith.constant 9.99999974E-6 : f32
    %110 = vector.broadcast %cst_55 : f32 to vector<1x120xf32>
    %111 = arith.addf %107, %110 : vector<1x120xf32>
    %112 = math.rsqrt %111 : vector<1x120xf32>
    %113 = vector.broadcast %112 : vector<1x120xf32> to vector<16x120xf32>
    %114 = arith.mulf %109, %113 : vector<16x120xf32>
    %c0_56 = arith.constant 0 : index
    %c0_57 = arith.constant 0 : index
    %c0_58 = arith.constant 0 : index
    %115 = vector.load %arg11[%c0_56, %c0_57, %c0_58] : memref<1x1x120xf32, #tpu.memory_space<vmem>>, vector<1x1x120xf32>
    %116 = vector.shape_cast %115 : vector<1x1x120xf32> to vector<1x120xf32>
    %117 = vector.broadcast %116 : vector<1x120xf32> to vector<16x120xf32>
    %118 = arith.mulf %114, %117 : vector<16x120xf32>
    %c0_59 = arith.constant 0 : index
    %c0_60 = arith.constant 0 : index
    %c0_61 = arith.constant 0 : index
    %119 = vector.load %arg12[%c0_59, %c0_60, %c0_61] : memref<1x1x120xf32, #tpu.memory_space<vmem>>, vector<1x1x120xf32>
    %120 = vector.shape_cast %119 : vector<1x1x120xf32> to vector<1x120xf32>
    %121 = vector.broadcast %120 : vector<1x120xf32> to vector<16x120xf32>
    %122 = arith.addf %118, %121 : vector<16x120xf32>
    %123 = arith.negf %122 : vector<16x120xf32>
    %124 = math.exp %123 : vector<16x120xf32>
    %cst_62 = arith.constant 1.000000e+00 : f32
    %125 = vector.broadcast %cst_62 : f32 to vector<16x120xf32>
    %126 = arith.addf %125, %124 : vector<16x120xf32>
    %127 = arith.divf %125, %126 : vector<16x120xf32>
    %128 = vector.extract_strided_slice %127 {offsets = [0, 0], sizes = [5, 120], strides = [1, 1]} : vector<16x120xf32> to vector<5x120xf32>
    %129 = vector.extract_strided_slice %127 {offsets = [8, 0], sizes = [5, 120], strides = [1, 1]} : vector<16x120xf32> to vector<5x120xf32>
    %130 = tpu.concatenate %128, %129 in 0 : vector<5x120xf32>, vector<5x120xf32> -> vector<10x120xf32>
    %131 = vector.extract_strided_slice %127 {offsets = [1, 0], sizes = [5, 120], strides = [1, 1]} : vector<16x120xf32> to vector<5x120xf32>
    %132 = vector.extract_strided_slice %127 {offsets = [9, 0], sizes = [5, 120], strides = [1, 1]} : vector<16x120xf32> to vector<5x120xf32>
    %133 = tpu.concatenate %131, %132 in 0 : vector<5x120xf32>, vector<5x120xf32> -> vector<10x120xf32>
    %134 = vector.extract_strided_slice %127 {offsets = [2, 0], sizes = [5, 120], strides = [1, 1]} : vector<16x120xf32> to vector<5x120xf32>
    %135 = vector.extract_strided_slice %127 {offsets = [10, 0], sizes = [5, 120], strides = [1, 1]} : vector<16x120xf32> to vector<5x120xf32>
    %136 = tpu.concatenate %134, %135 in 0 : vector<5x120xf32>, vector<5x120xf32> -> vector<10x120xf32>
    %137 = vector.extract_strided_slice %127 {offsets = [3, 0], sizes = [5, 120], strides = [1, 1]} : vector<16x120xf32> to vector<5x120xf32>
    %138 = vector.extract_strided_slice %127 {offsets = [11, 0], sizes = [5, 120], strides = [1, 1]} : vector<16x120xf32> to vector<5x120xf32>
    %139 = tpu.concatenate %137, %138 in 0 : vector<5x120xf32>, vector<5x120xf32> -> vector<10x120xf32>
    %140 = tpu.concatenate %130, %133, %136, %139 in 1 : vector<10x120xf32>, vector<10x120xf32>, vector<10x120xf32>, vector<10x120xf32> -> vector<10x480xf32>
    %c0_63 = arith.constant 0 : index
    %c0_64 = arith.constant 0 : index
    %c0_65 = arith.constant 0 : index
    %141 = vector.load %arg14[%c0_63, %c0_64, %c0_65] : memref<1x480x75xbf16, #tpu.memory_space<vmem>>, vector<1x480x75xbf16>
    %142 = vector.shape_cast %141 : vector<1x480x75xbf16> to vector<480x75xbf16>
    %143 = arith.extf %142 : vector<480x75xbf16> to vector<480x75xf32>
    %cst_66 = arith.constant dense<0.000000e+00> : vector<10x75xf32>
    %144 = tpu.matmul %140, %143, %cst_66 {dimension_numbers = #tpu.dot_dimension_numbers<[1], [0], [0], [1], [0, 0, 1, 1], [], []>} : vector<10x480xf32>, vector<480x75xf32>, vector<10x75xf32> -> vector<10x75xf32>
    %cst_67 = arith.constant dense<0.000000e+00> : vector<75xf32>
    %145 = vector.multi_reduction <add>, %144, %cst_67 [0] : vector<10x75xf32> to vector<75xf32>
    %146 = vector.shape_cast %145 : vector<75xf32> to vector<1x75xf32>
    %147 = arith.mulf %144, %144 : vector<10x75xf32>
    %cst_68 = arith.constant dense<0.000000e+00> : vector<75xf32>
    %148 = vector.multi_reduction <add>, %147, %cst_68 [0] : vector<10x75xf32> to vector<75xf32>
    %149 = vector.shape_cast %148 : vector<75xf32> to vector<1x75xf32>
    %150 = tpu.concatenate %146, %149 in 0 : vector<1x75xf32>, vector<1x75xf32> -> vector<2x75xf32>
    %c0_69 = arith.constant 0 : index
    %c0_70 = arith.constant 0 : index
    %151 = vector.load %arg17[%c0_69, %c0_70] : memref<75x75xbf16, #tpu.memory_space<vmem>>, vector<75x75xbf16>
    %152 = arith.extf %151 : vector<75x75xbf16> to vector<75x75xf32>
    %cst_71 = arith.constant dense<0.000000e+00> : vector<2x75xf32>
    %153 = tpu.matmul %150, %152, %cst_71 {dimension_numbers = #tpu.dot_dimension_numbers<[1], [0], [0], [1], [0, 0, 1, 1], [], []>} : vector<2x75xf32>, vector<75x75xf32>, vector<2x75xf32> -> vector<2x75xf32>
    %cst_72 = arith.constant 2.000000e-02 : f32
    %154 = vector.broadcast %cst_72 : f32 to vector<2x75xf32>
    %155 = arith.mulf %153, %154 : vector<2x75xf32>
    %156 = vector.extract_strided_slice %155 {offsets = [0, 0], sizes = [1, 75], strides = [1, 1]} : vector<2x75xf32> to vector<1x75xf32>
    %157 = vector.extract_strided_slice %155 {offsets = [1, 0], sizes = [1, 75], strides = [1, 1]} : vector<2x75xf32> to vector<1x75xf32>
    %158 = arith.mulf %156, %156 : vector<1x75xf32>
    %159 = arith.subf %157, %158 : vector<1x75xf32>
    %160 = vector.broadcast %156 : vector<1x75xf32> to vector<10x75xf32>
    %161 = arith.subf %144, %160 : vector<10x75xf32>
    %cst_73 = arith.constant 9.99999974E-6 : f32
    %162 = vector.broadcast %cst_73 : f32 to vector<1x75xf32>
    %163 = arith.addf %159, %162 : vector<1x75xf32>
    %164 = math.rsqrt %163 : vector<1x75xf32>
    %165 = vector.broadcast %164 : vector<1x75xf32> to vector<10x75xf32>
    %166 = arith.mulf %161, %165 : vector<10x75xf32>
    %c0_74 = arith.constant 0 : index
    %c0_75 = arith.constant 0 : index
    %c0_76 = arith.constant 0 : index
    %167 = vector.load %arg15[%c0_74, %c0_75, %c0_76] : memref<1x1x75xf32, #tpu.memory_space<vmem>>, vector<1x1x75xf32>
    %168 = vector.shape_cast %167 : vector<1x1x75xf32> to vector<1x75xf32>
    %169 = vector.broadcast %168 : vector<1x75xf32> to vector<10x75xf32>
    %170 = arith.mulf %166, %169 : vector<10x75xf32>
    %c0_77 = arith.constant 0 : index
    %c0_78 = arith.constant 0 : index
    %c0_79 = arith.constant 0 : index
    %171 = vector.load %arg16[%c0_77, %c0_78, %c0_79] : memref<1x1x75xf32, #tpu.memory_space<vmem>>, vector<1x1x75xf32>
    %172 = vector.shape_cast %171 : vector<1x1x75xf32> to vector<1x75xf32>
    %173 = vector.broadcast %172 : vector<1x75xf32> to vector<10x75xf32>
    %174 = arith.addf %170, %173 : vector<10x75xf32>
    %175 = arith.negf %174 : vector<10x75xf32>
    %176 = math.exp %175 : vector<10x75xf32>
    %cst_80 = arith.constant 1.000000e+00 : f32
    %177 = vector.broadcast %cst_80 : f32 to vector<10x75xf32>
    %178 = arith.addf %177, %176 : vector<10x75xf32>
    %179 = arith.divf %177, %178 : vector<10x75xf32>
    %180 = vector.extract_strided_slice %179 {offsets = [0, 0], sizes = [3, 75], strides = [1, 1]} : vector<10x75xf32> to vector<3x75xf32>
    %181 = vector.extract_strided_slice %179 {offsets = [5, 0], sizes = [3, 75], strides = [1, 1]} : vector<10x75xf32> to vector<3x75xf32>
    %182 = tpu.concatenate %180, %181 in 0 : vector<3x75xf32>, vector<3x75xf32> -> vector<6x75xf32>
    %183 = vector.extract_strided_slice %179 {offsets = [1, 0], sizes = [3, 75], strides = [1, 1]} : vector<10x75xf32> to vector<3x75xf32>
    %184 = vector.extract_strided_slice %179 {offsets = [6, 0], sizes = [3, 75], strides = [1, 1]} : vector<10x75xf32> to vector<3x75xf32>
    %185 = tpu.concatenate %183, %184 in 0 : vector<3x75xf32>, vector<3x75xf32> -> vector<6x75xf32>
    %186 = vector.extract_strided_slice %179 {offsets = [2, 0], sizes = [3, 75], strides = [1, 1]} : vector<10x75xf32> to vector<3x75xf32>
    %187 = vector.extract_strided_slice %179 {offsets = [7, 0], sizes = [3, 75], strides = [1, 1]} : vector<10x75xf32> to vector<3x75xf32>
    %188 = tpu.concatenate %186, %187 in 0 : vector<3x75xf32>, vector<3x75xf32> -> vector<6x75xf32>
    %189 = tpu.concatenate %182, %185, %188 in 1 : vector<6x75xf32>, vector<6x75xf32>, vector<6x75xf32> -> vector<6x225xf32>
    %c0_81 = arith.constant 0 : index
    %c0_82 = arith.constant 0 : index
    %c0_83 = arith.constant 0 : index
    %190 = vector.load %arg18[%c0_81, %c0_82, %c0_83] : memref<1x225x45xbf16, #tpu.memory_space<vmem>>, vector<1x225x45xbf16>
    %191 = vector.shape_cast %190 : vector<1x225x45xbf16> to vector<225x45xbf16>
    %192 = arith.extf %191 : vector<225x45xbf16> to vector<225x45xf32>
    %cst_84 = arith.constant dense<0.000000e+00> : vector<6x45xf32>
    %193 = tpu.matmul %189, %192, %cst_84 {dimension_numbers = #tpu.dot_dimension_numbers<[1], [0], [0], [1], [0, 0, 1, 1], [], []>} : vector<6x225xf32>, vector<225x45xf32>, vector<6x45xf32> -> vector<6x45xf32>
    %cst_85 = arith.constant dense<0.000000e+00> : vector<45xf32>
    %194 = vector.multi_reduction <add>, %193, %cst_85 [0] : vector<6x45xf32> to vector<45xf32>
    %195 = vector.shape_cast %194 : vector<45xf32> to vector<1x45xf32>
    %196 = arith.mulf %193, %193 : vector<6x45xf32>
    %cst_86 = arith.constant dense<0.000000e+00> : vector<45xf32>
    %197 = vector.multi_reduction <add>, %196, %cst_86 [0] : vector<6x45xf32> to vector<45xf32>
    %198 = vector.shape_cast %197 : vector<45xf32> to vector<1x45xf32>
    %199 = tpu.concatenate %195, %198 in 0 : vector<1x45xf32>, vector<1x45xf32> -> vector<2x45xf32>
    %c0_87 = arith.constant 0 : index
    %c0_88 = arith.constant 0 : index
    %200 = vector.load %arg21[%c0_87, %c0_88] : memref<45x45xbf16, #tpu.memory_space<vmem>>, vector<45x45xbf16>
    %201 = arith.extf %200 : vector<45x45xbf16> to vector<45x45xf32>
    %cst_89 = arith.constant dense<0.000000e+00> : vector<2x45xf32>
    %202 = tpu.matmul %199, %201, %cst_89 {dimension_numbers = #tpu.dot_dimension_numbers<[1], [0], [0], [1], [0, 0, 1, 1], [], []>} : vector<2x45xf32>, vector<45x45xf32>, vector<2x45xf32> -> vector<2x45xf32>
    %cst_90 = arith.constant 0.055555556 : f32
    %203 = vector.broadcast %cst_90 : f32 to vector<2x45xf32>
    %204 = arith.mulf %202, %203 : vector<2x45xf32>
    %205 = vector.extract_strided_slice %204 {offsets = [0, 0], sizes = [1, 45], strides = [1, 1]} : vector<2x45xf32> to vector<1x45xf32>
    %206 = vector.extract_strided_slice %204 {offsets = [1, 0], sizes = [1, 45], strides = [1, 1]} : vector<2x45xf32> to vector<1x45xf32>
    %207 = arith.mulf %205, %205 : vector<1x45xf32>
    %208 = arith.subf %206, %207 : vector<1x45xf32>
    %209 = vector.broadcast %205 : vector<1x45xf32> to vector<6x45xf32>
    %210 = arith.subf %193, %209 : vector<6x45xf32>
    %cst_91 = arith.constant 9.99999974E-6 : f32
    %211 = vector.broadcast %cst_91 : f32 to vector<1x45xf32>
    %212 = arith.addf %208, %211 : vector<1x45xf32>
    %213 = math.rsqrt %212 : vector<1x45xf32>
    %214 = vector.broadcast %213 : vector<1x45xf32> to vector<6x45xf32>
    %215 = arith.mulf %210, %214 : vector<6x45xf32>
    %c0_92 = arith.constant 0 : index
    %c0_93 = arith.constant 0 : index
    %c0_94 = arith.constant 0 : index
    %216 = vector.load %arg19[%c0_92, %c0_93, %c0_94] : memref<1x1x45xf32, #tpu.memory_space<vmem>>, vector<1x1x45xf32>
    %217 = vector.shape_cast %216 : vector<1x1x45xf32> to vector<1x45xf32>
    %218 = vector.broadcast %217 : vector<1x45xf32> to vector<6x45xf32>
    %219 = arith.mulf %215, %218 : vector<6x45xf32>
    %c0_95 = arith.constant 0 : index
    %c0_96 = arith.constant 0 : index
    %c0_97 = arith.constant 0 : index
    %220 = vector.load %arg20[%c0_95, %c0_96, %c0_97] : memref<1x1x45xf32, #tpu.memory_space<vmem>>, vector<1x1x45xf32>
    %221 = vector.shape_cast %220 : vector<1x1x45xf32> to vector<1x45xf32>
    %222 = vector.broadcast %221 : vector<1x45xf32> to vector<6x45xf32>
    %223 = arith.addf %219, %222 : vector<6x45xf32>
    %224 = arith.negf %223 : vector<6x45xf32>
    %225 = math.exp %224 : vector<6x45xf32>
    %cst_98 = arith.constant 1.000000e+00 : f32
    %226 = vector.broadcast %cst_98 : f32 to vector<6x45xf32>
    %227 = arith.addf %226, %225 : vector<6x45xf32>
    %228 = arith.divf %226, %227 : vector<6x45xf32>
    %c0_99 = arith.constant 0 : index
    %c0_100 = arith.constant 0 : index
    %c0_101 = arith.constant 0 : index
    %229 = vector.load %arg22[%c0_99, %c0_100, %c0_101] : memref<1x6x45xf32, #tpu.memory_space<vmem>>, vector<1x6x45xf32>
    %230 = vector.shape_cast %229 : vector<1x6x45xf32> to vector<6x45xf32>
    %231 = arith.mulf %228, %230 : vector<6x45xf32>
    %cst_102 = arith.constant dense<0.000000e+00> : vector<6xf32>
    %232 = vector.multi_reduction <add>, %231, %cst_102 [1] : vector<6x45xf32> to vector<6xf32>
    %233 = vector.shape_cast %232 : vector<6xf32> to vector<6x1xf32>
    %c0_103 = arith.constant 0 : index
    %c0_104 = arith.constant 0 : index
    %234 = vector.load %arg23[%c0_103, %c0_104] : memref<2x6xf32, #tpu.memory_space<vmem>>, vector<2x6xf32>
    %cst_105 = arith.constant dense<0.000000e+00> : vector<2x1xf32>
    %235 = tpu.matmul %234, %233, %cst_105 {dimension_numbers = #tpu.dot_dimension_numbers<[1], [0], [0], [1], [0, 0, 1, 1], [], []>} : vector<2x6xf32>, vector<6x1xf32>, vector<2x1xf32> -> vector<2x1xf32>
    %c0_106 = arith.constant 0 : index
    %c0_107 = arith.constant 0 : index
    %c0_108 = arith.constant 0 : index
    %236 = vector.load %arg24[%c0_106, %c0_107, %c0_108] : memref<1x1x1xf32, #tpu.memory_space<vmem>>, vector<1x1x1xf32>
    %237 = vector.shape_cast %236 : vector<1x1x1xf32> to vector<1x1xf32>
    %238 = vector.broadcast %237 : vector<1x1xf32> to vector<2x1xf32>
    %239 = arith.addf %235, %238 : vector<2x1xf32>
    %c0_109 = arith.constant 0 : index
    %c0_110 = arith.constant 0 : index
    %c0_111 = arith.constant 0 : index
    %240 = vector.load %arg25[%c0_109, %c0_110, %c0_111] : memref<1x2x1xf32, #tpu.memory_space<vmem>>, vector<1x2x1xf32>
    %241 = vector.shape_cast %240 : vector<1x2x1xf32> to vector<2x1xf32>
    %242 = vector.shape_cast %239 : vector<2x1xf32> to vector<1x2x1xf32>
    tpu.vector_store %arg25[%c0_109, %c0_110, %c0_111], %242 {strides = array<i32>} : memref<1x2x1xf32, #tpu.memory_space<vmem>>, vector<1x2x1xf32>,
    return
  }
  func.func @transform_0(%arg0: i32) -> (i32, i32, i32) {
    %c0_i32 = arith.constant 0 : i32
    %c0_i32_0 = arith.constant 0 : i32
    %c0_i32_1 = arith.constant 0 : i32
    return %arg0, %c0_i32, %c0_i32_0 : i32, i32, i32
  }
  func.func @transform_1(%arg0: i32) -> (i32, i32, i32) {
    %c0_i32 = arith.constant 0 : i32
    %c0_i32_0 = arith.constant 0 : i32
    %c0_i32_1 = arith.constant 0 : i32
    %c0_i32_2 = arith.constant 0 : i32
    return %c0_i32, %c0_i32_0, %c0_i32_1 : i32, i32, i32
  }
  func.func @transform_2(%arg0: i32) -> (i32, i32, i32) {
    %c0_i32 = arith.constant 0 : i32
    %c0_i32_0 = arith.constant 0 : i32
    %c0_i32_1 = arith.constant 0 : i32
    return %arg0, %c0_i32, %c0_i32_0 : i32, i32, i32
  }
  func.func @transform_3(%arg0: i32) -> (i32, i32, i32) {
    %c0_i32 = arith.constant 0 : i32
    %c0_i32_0 = arith.constant 0 : i32
    %c0_i32_1 = arith.constant 0 : i32
    return %arg0, %c0_i32, %c0_i32_0 : i32, i32, i32
  }
  func.func @transform_4(%arg0: i32) -> (i32, i32, i32) {
    %c0_i32 = arith.constant 0 : i32
    %c0_i32_0 = arith.constant 0 : i32
    %c0_i32_1 = arith.constant 0 : i32
    %c0_i32_2 = arith.constant 0 : i32
    return %c0_i32, %c0_i32_0, %c0_i32_1 : i32, i32, i32
  }
  func.func @transform_5(%arg0: i32) -> (i32, i32, i32) {
    %c0_i32 = arith.constant 0 : i32
    %c0_i32_0 = arith.constant 0 : i32
    %c0_i32_1 = arith.constant 0 : i32
    return %arg0, %c0_i32, %c0_i32_0 : i32, i32, i32
  }
  func.func @transform_6(%arg0: i32) -> (i32, i32, i32) {
    %c0_i32 = arith.constant 0 : i32
    %c0_i32_0 = arith.constant 0 : i32
    %c0_i32_1 = arith.constant 0 : i32
    return %arg0, %c0_i32, %c0_i32_0 : i32, i32, i32
  }
  func.func @transform_7(%arg0: i32) -> (i32, i32, i32) {
    %c0_i32 = arith.constant 0 : i32
    %c0_i32_0 = arith.constant 0 : i32
    %c0_i32_1 = arith.constant 0 : i32
    return %arg0, %c0_i32, %c0_i32_0 : i32, i32, i32
  }
  func.func @transform_8(%arg0: i32) -> (i32, i32) {
    %c0_i32 = arith.constant 0 : i32
    %c0_i32_0 = arith.constant 0 : i32
    %c0_i32_1 = arith.constant 0 : i32
    return %c0_i32, %c0_i32_0 : i32, i32
  }
  func.func @transform_9(%arg0: i32) -> (i32, i32, i32) {
    %c0_i32 = arith.constant 0 : i32
    %c0_i32_0 = arith.constant 0 : i32
    %c0_i32_1 = arith.constant 0 : i32
    return %arg0, %c0_i32, %c0_i32_0 : i32, i32, i32
  }
  func.func @transform_10(%arg0: i32) -> (i32, i32, i32) {
    %c0_i32 = arith.constant 0 : i32
    %c0_i32_0 = arith.constant 0 : i32
    %c0_i32_1 = arith.constant 0 : i32
    return %arg0, %c0_i32, %c0_i32_0 : i32, i32, i32
  }
  func.func @transform_11(%arg0: i32) -> (i32, i32, i32) {
    %c0_i32 = arith.constant 0 : i32
    %c0_i32_0 = arith.constant 0 : i32
    %c0_i32_1 = arith.constant 0 : i32
    return %arg0, %c0_i32, %c0_i32_0 : i32, i32, i32
  }
  func.func @transform_12(%arg0: i32) -> (i32, i32) {
    %c0_i32 = arith.constant 0 : i32
    %c0_i32_0 = arith.constant 0 : i32
    %c0_i32_1 = arith.constant 0 : i32
    return %c0_i32, %c0_i32_0 : i32, i32
  }
  func.func @transform_13(%arg0: i32) -> (i32, i32, i32) {
    %c0_i32 = arith.constant 0 : i32
    %c0_i32_0 = arith.constant 0 : i32
    %c0_i32_1 = arith.constant 0 : i32
    return %arg0, %c0_i32, %c0_i32_0 : i32, i32, i32
  }
  func.func @transform_14(%arg0: i32) -> (i32, i32, i32) {
    %c0_i32 = arith.constant 0 : i32
    %c0_i32_0 = arith.constant 0 : i32
    %c0_i32_1 = arith.constant 0 : i32
    return %arg0, %c0_i32, %c0_i32_0 : i32, i32, i32
  }
  func.func @transform_15(%arg0: i32) -> (i32, i32, i32) {
    %c0_i32 = arith.constant 0 : i32
    %c0_i32_0 = arith.constant 0 : i32
    %c0_i32_1 = arith.constant 0 : i32
    return %arg0, %c0_i32, %c0_i32_0 : i32, i32, i32
  }
  func.func @transform_16(%arg0: i32) -> (i32, i32) {
    %c0_i32 = arith.constant 0 : i32
    %c0_i32_0 = arith.constant 0 : i32
    %c0_i32_1 = arith.constant 0 : i32
    return %c0_i32, %c0_i32_0 : i32, i32
  }
  func.func @transform_17(%arg0: i32) -> (i32, i32, i32) {
    %c0_i32 = arith.constant 0 : i32
    %c0_i32_0 = arith.constant 0 : i32
    %c0_i32_1 = arith.constant 0 : i32
    return %arg0, %c0_i32, %c0_i32_0 : i32, i32, i32
  }
  func.func @transform_18(%arg0: i32) -> (i32, i32, i32) {
    %c0_i32 = arith.constant 0 : i32
    %c0_i32_0 = arith.constant 0 : i32
    %c0_i32_1 = arith.constant 0 : i32
    return %arg0, %c0_i32, %c0_i32_0 : i32, i32, i32
  }
  func.func @transform_19(%arg0: i32) -> (i32, i32, i32) {
    %c0_i32 = arith.constant 0 : i32
    %c0_i32_0 = arith.constant 0 : i32
    %c0_i32_1 = arith.constant 0 : i32
    return %arg0, %c0_i32, %c0_i32_0 : i32, i32, i32
  }
  func.func @transform_20(%arg0: i32) -> (i32, i32) {
    %c0_i32 = arith.constant 0 : i32
    %c0_i32_0 = arith.constant 0 : i32
    %c0_i32_1 = arith.constant 0 : i32
    return %c0_i32, %c0_i32_0 : i32, i32
  }
  func.func @transform_21(%arg0: i32) -> (i32, i32, i32) {
    %c0_i32 = arith.constant 0 : i32
    %c0_i32_0 = arith.constant 0 : i32
    %c0_i32_1 = arith.constant 0 : i32
    return %arg0, %c0_i32, %c0_i32_0 : i32, i32, i32
  }
  func.func @transform_22(%arg0: i32) -> (i32, i32) {
    %c0_i32 = arith.constant 0 : i32
    %c0_i32_0 = arith.constant 0 : i32
    %c0_i32_1 = arith.constant 0 : i32
    return %c0_i32, %c0_i32_0 : i32, i32
  }
  func.func @transform_23(%arg0: i32) -> (i32, i32, i32) {
    %c0_i32 = arith.constant 0 : i32
    %c0_i32_0 = arith.constant 0 : i32
    %c0_i32_1 = arith.constant 0 : i32
    return %arg0, %c0_i32, %c0_i32_0 : i32, i32, i32
  }
  func.func @transform_24(%arg0: i32) -> (i32, i32, i32) {
    %c0_i32 = arith.constant 0 : i32
    %c0_i32_0 = arith.constant 0 : i32
    %c0_i32_1 = arith.constant 0 : i32
    return %arg0, %c0_i32, %c0_i32_0 : i32, i32, i32
  }
}

</mosaic_0001>

<bundles_post_ra>
// kernel: _lambda_.1
= control target key start
LH: loop header
LB: loop body
LE: loop exit
PB: predicated region body
PF: predicated region fallthrough
CT: control target
= control target key end

     0   :  { %s15558_s0 = inlined_call_operand.vmem [shape: f32[2,90,675], index: 0, kind: input, shape index: {}]   ;;  %s15559_s1 = inlined_call_operand.vmem [shape: bf16[3,44,90], index: 1, kind: input, shape index: {}]   ;;  %s15560_s2 = inlined_call_operand.vmem [shape: bf16[2,2025,330], index: 2, kind: input, shape index: {}]   ;;  %s15561_s3 = inlined_call_operand.vmem [shape: f32[2,1,330], index: 3, kind: input, shape index: {}]   ;;  %s15562_s4 = inlined_call_operand.vmem [shape: bf16[2,22,44], index: 4, kind: input, shape index: {}]   ;;  %s15563_s5 = inlined_call_operand.vmem [shape: bf16[2,660,165], index: 5, kind: input, shape index: {}]   ;;  %s15564_s6 = inlined_call_operand.vmem [shape: f32[2,1,165], index: 6, kind: input, shape index: {}]   ;;  %s15565_s7 = inlined_call_operand.vmem [shape: f32[2,1,165], index: 7, kind: input, shape index: {}]   ;;  %s15566_s8 = inlined_call_operand.vmem [shape: bf16[165,165], index: 8, kind: input, shape index: {}]   ;;  %s15567_s9 = inlined_call_operand.vmem [shape: bf16[2,660,120], index: 9, kind: input, shape index: {}]   ;;  %s15568_s10 = inlined_call_operand.vmem [shape: f32[2,1,120], index: 10, kind: input, shape index: {}]   ;;  %s15569_s11 = inlined_call_operand.vmem [shape: f32[2,1,120], index: 11, kind: input, shape index: {}]   ;;  %s15570_s12 = inlined_call_operand.vmem [shape: bf16[120,120], index: 12, kind: input, shape index: {}]   ;;  %s15571_s13 = inlined_call_operand.vmem [shape: bf16[2,480,75], index: 13, kind: input, shape index: {}]   ;;  %s15572_s14 = inlined_call_operand.vmem [shape: f32[2,1,75], index: 14, kind: input, shape index: {}]   ;;  %s15573_s15 = inlined_call_operand.vmem [shape: f32[2,1,75], index: 15, kind: input, shape index: {}]   ;;  %s15574_s16 = inlined_call_operand.vmem [shape: bf16[75,75], index: 16, kind: input, shape index: {}]   ;;  %s15575_s17 = inlined_call_operand.vmem [shape: bf16[2,225,45], index: 17, kind: input, shape index: {}]   ;;  %s15576_s18 = inlined_call_operand.vmem [shape: f32[2,1,45], index: 18, kind: input, shape index: {}]   ;;  %s15577_s19 = inlined_call_operand.vmem [shape: f32[2,1,45], index: 19, kind: input, shape index: {}]   ;;  %s15578_s20 = inlined_call_operand.vmem [shape: bf16[45,45], index: 20, kind: input, shape index: {}]   ;;  %s15579_s21 = inlined_call_operand.vmem [shape: f32[2,6,45], index: 21, kind: input, shape index: {}]   ;;  %s15580_s22 = inlined_call_operand.vmem [shape: f32[2,6], index: 22, kind: input, shape index: {}]   ;;  %s15581_s23 = inlined_call_operand.vmem [shape: f32[2,1,1], index: 23, kind: input, shape index: {}]   ;;  %s15582_s24 = inlined_call_operand.vmem [shape: f32[2,2,1], index: 24, kind: output, shape index: {}]  }
   0x1   :  { %15593 = sst [smem:[#allocation2_spill]] %s15558_s0 }
   0x2   :  { %15594 = sst [smem:[#allocation3_spill]] %s15559_s1 }
   0x3   :  { %15595 = sst [smem:[#allocation4_spill]] %s15560_s2 }
   0x4   :  { %15596 = sst [smem:[#allocation5_spill]] %s15561_s3 }
   0x5   :  { %15597 = sst [smem:[#allocation6_spill]] %s15562_s4 }
   0x6   :  { %15598 = sst [smem:[#allocation7_spill]] %s15563_s5  ;;  %s13055_s5 = smov 0  }
   0x7   :  { %15599 = sst [smem:[#allocation8_spill]] %s15564_s6 }
   0x8   :  { %15600 = sst [smem:[#allocation9_spill]] %s15565_s7 }
   0x9   :  { %15601 = sst [smem:[#allocation10_spill]] %s15566_s8 }
   0xa LB: > { %s8463_s26 = sadd.s32 4294967295, %s12914_s5   ;;  %p8467_p0 = scmp.ge.s32.totalorder %s12914_s5, 1  ;;  %s12914_s5 = sphi %s13055_s5, %s34_s5  }
   0xb   : > { %p804_p1 = scmp.lt.s32.totalorder %s12914_s5, 3 }
   0xd   : > { %p805_p2 = pnand %p8467_p0, %p804_p1 }
   0xe   : > { %p931_p3 = scmp.lt.s32.totalorder (!%p805_p2), %s8463_s26, 1  ;;  %v15586_v0 = vmov (!%p805_p2), 0.0   ;;  %s15602_s2 = sld [smem:[#allocation2_spill]] (!%p805_p2)  ;;  %vm1105_vm0 = vcmask (!%p805_p2), 1041408   ;;  %vm12917_vm1 = vmmov (!%p805_p2), 1   ;;  %vm1086_vm3 = vcmask (!%p805_p2), 736256  }
   0xf   : > { %808 = sbr.rel (%p805_p2) target bundleno = 4166 (0x1046), region = 116  ;;  %1188 = vmatprep.mubr.f32.mxu0 (!%p805_p2), %v15586_v0  ;;  %1289 = vmatprep.mubr.f32.mxu1 (!%p805_p2), %v15586_v0  ;;  %vm13172_vm2 = vmpackc.low (!%p805_p2), %vm1105_vm0, %vm12917_vm1  ;;  %s15605_s3 = sld [smem:[#allocation3_spill]] (!%p805_p2)  ;;  %vm2203_vm4 = vcmask (!%p805_p2), 285696   ;;  %vm2378_vm5 = vcmask (!%p805_p2), 572416   ;;  %vm3738_vm6 = vcmask (!%p805_p2), 859136   ;;  %vm3751_vm7 = vcmask (!%p805_p2), 1040384  }
  0x10   : > { %s15606_s4 = sld [smem:[#allocation4_spill]] (!%p805_p2)  ;;  %s12918_s8 = smov (!%p805_p2), 35   ;;  %vm14655_vm8 = vmpackc.low (!%p805_p2), %vm3751_vm7, %vm12917_vm1  ;;  %vm5453_vm9 = vcmask (!%p805_p2), 1043456   ;;  %vm5443_vm11 = vcmask (!%p805_p2), 359424   ;;  %vm12921_vm12 = vmmov (!%p805_p2), 0   ;;  %vm5832_vm13 = vcmask (!%p805_p2), 605184  }
  0x11   : > { %s15613_s30 = sld [smem:[#allocation7_spill]] (!%p805_p2)  ;;  %vm14871_vm10 = vmpackc.low (!%p805_p2), %vm5453_vm9, %vm12917_vm1  ;;  %vm6100_vm14 = vcmask (!%p805_p2), 162816   ;;  %vm6479_vm15 = vcmask (!%p805_p2), 1044480  }
  0x16   : > { %s15622_s26 = smov (!%p931_p3, %s8463_s26), 1 }
  0x17   : > { %s11924_s27 = smul.u32 576, %s15622_s26  ;;  %s15204_s6 = sshll.u32 %s15622_s26, 1 }
  0x18   : > { %s11925_s0 = smul.u32 3048, %s15622_s26 }
  0x19   : > { %s13071_s29 = scalar_lea.vmem %s15602_s2, %s11924_s27  ;;  %s11926_s27 = smul.u32 3, %s15622_s26 }
  0x1a   : > { %v1003_v1 = vld [vmem:[%s13071_s29 + $0x8] sm:$0xff]  ;;  %v1009_v2 = vld [vmem:[%s13071_s29 + $0x38] sm:$0xff]  ;;  %v1002_v6 = vld [vmem:[%s13071_s29] sm:$0xff]  ;;  %s13218_s1 = scalar_lea.vmem %s15606_s4, %s11925_s0  ;;  %s12919_s4 = smov 70  }
  0x1b   : > { %v1005_v3 = vld [vmem:[%s13071_s29 + $0x18] sm:$0xff]  ;;  %v13076_v4 = vpack.c.bf16 %v1009_v2, %v1003_v1  ;;  %v1011_v5 = vld [vmem:[%s13071_s29 + $0x48] sm:$0xff]  ;;  %v1008_v7 = vld [vmem:[%s13071_s29 + $0x30] sm:$0xff]  ;;  %s15607_s2 = sld [smem:[#allocation5_spill]]  ;;  %s11928_s7 = smul.u32 332, %s15622_s26 }
  0x1c   : > { %v13081_v8 = vpack.c.bf16 %v1011_v5, %v1005_v3  ;;  %v13083_v9 = vpack.c.bf16 %v1008_v7, %v1002_v6  ;;  %v1004_v10 = vld [vmem:[%s13071_s29 + $0x10] sm:$0xff]  ;;  %v1010_v11 = vld [vmem:[%s13071_s29 + $0x40] sm:$0xff]  ;;  %v1015_v12 = vld [vmem:[%s13071_s29 + $0x68] sm:$0xff] }
  0x1d   : > { %9812 = vmatprep.subr.bf16.mxu0 %v13076_v4  ;;  %v13089_v13 = vpack.c.bf16 %v1010_v11, %v1004_v10  ;;  %v1021_v14 = vld [vmem:[%s13071_s29 + $0x98] sm:$0xff]  ;;  %v1023_v16 = vld [vmem:[%s13071_s29 + $0xa8] sm:$0xff]  ;;  %v1014_v19 = vld [vmem:[%s13071_s29 + $0x60] sm:$0xff]  ;;  %s15164_s28 = scalar_lea.vmem %s15567_s9, %s11928_s7  ;;  %s15619_s7 = sld [smem:[#allocation9_spill]] }
  0x1e   : > { %v1017_v15 = vld [vmem:[%s13071_s29 + $0x78] sm:$0xff]  ;;  %9838 = vmatprep.subr.bf16.mxu1 %v13081_v8  ;;  %9814 = vmatpush1.bf16.msra.mxu0 %v13083_v9  ;;  %v13096_v17 = vpack.c.bf16 %v1021_v14, %v1015_v12  ;;  %v1020_v20 = vld [vmem:[%s13071_s29 + $0x90] sm:$0xff]  ;;  %v1022_v23 = vld [vmem:[%s13071_s29 + $0xa0] sm:$0xff] }
  0x1f   : > { %v13098_v18 = vpack.c.bf16 %v1023_v16, %v1017_v15  ;;  %v1016_v21 = vld [vmem:[%s13071_s29 + $0x70] sm:$0xff]  ;;  %9840 = vmatpush1.bf16.msra.mxu1 %v13089_v13  ;;  %v13104_v22 = vpack.c.bf16 %v1020_v20, %v1014_v19  ;;  %v1027_v24 = vld [vmem:[%s13071_s29 + $0xc8] sm:$0xff]  ;;  %v1033_v25 = vld [vmem:[%s13071_s29 + $0xf8] sm:$0xff] }
  0x20   : > { %9816 = vmatprep.subr.bf16.mxu0 %v13096_v17  ;;  %v13111_v26 = vpack.c.bf16 %v1022_v23, %v1016_v21  ;;  %v13113_v27 = vpack.c.bf16 %v1033_v25, %v1027_v24  ;;  %v1029_v28 = vld [vmem:[%s13071_s29 + $0xd8] sm:$0xff]  ;;  %v1035_v29 = vld [vmem:[%s13071_s29 + $0x108] sm:$0xff]  ;;  %v1026_v30 = vld [vmem:[%s13071_s29 + $0xc0] sm:$0xff] }
  0x21   : > { %9842 = vmatprep.subr.bf16.mxu1 %v13098_v18  ;;  %v13118_v31 = vpack.c.bf16 %v1035_v29, %v1029_v28  ;;  %v1032_v32 = vld [vmem:[%s13071_s29 + $0xf0] sm:$0xff]  ;;  %v1034_v34 = vld [vmem:[%s13071_s29 + $0x100] sm:$0xff]  ;;  %v1039_v36 = vld [vmem:[%s13071_s29 + $0x128] sm:$0xff]  ;;  %s14342_s0 = scalar_lea.vmem %s15607_s2, %s11926_s27  ;;  %s15616_s27 = sld [smem:[#allocation6_spill]] }
  0x22   : > { %v1028_v33 = vld [vmem:[%s13071_s29 + $0xd0] sm:$0xff]  ;;  %9818 = vmatpush1.bf16.msra.mxu0 %v13104_v22  ;;  %v13124_v35 = vpack.c.bf16 %v1032_v32, %v1026_v30  ;;  %v1045_v37 = vld [vmem:[%s13071_s29 + $0x158] sm:$0xff]  ;;  %v1047_v41 = vld [vmem:[%s13071_s29 + $0x168] sm:$0xff]  ;;  %s12924_s2 = smov 37  }
  0x23   : > { %v1041_v38 = vld [vmem:[%s13071_s29 + $0x138] sm:$0xff]  ;;  %9844 = vmatpush1.bf16.msra.mxu1 %v13111_v26  ;;  %9820 = vmatprep.subr.bf16.mxu0 %v13113_v27  ;;  %v13131_v39 = vpack.c.bf16 %v1034_v34, %v1028_v33  ;;  %v13133_v40 = vpack.c.bf16 %v1045_v37, %v1039_v36  ;;  %v1038_v42 = vld [vmem:[%s13071_s29 + $0x120] sm:$0xff]  ;;  %v1044_v43 = vld [vmem:[%s13071_s29 + $0x150] sm:$0xff] }
  0x24   : > { %9846 = vmatprep.subr.bf16.mxu1 %v13118_v31  ;;  %v13139_v44 = vpack.c.bf16 %v1047_v41, %v1041_v38  ;;  %v1040_v45 = vld [vmem:[%s13071_s29 + $0x130] sm:$0xff]  ;;  %v1046_v46 = vld [vmem:[%s13071_s29 + $0x160] sm:$0xff]  ;;  %v1051_v47 = vld [vmem:[%s13071_s29 + $0x188] sm:$0xff]  ;;  %v13148_v51 = vpack.c.bf16 %v1044_v43, %v1038_v42 }
  0x25   : > { %v1057_v48 = vld [vmem:[%s13071_s29 + $0x1b8] sm:$0xff]  ;;  %v1059_v50 = vld [vmem:[%s13071_s29 + $0x1c8] sm:$0xff]  ;;  %v13152_v52 = vpack.c.bf16 %v1046_v46, %v1040_v45  ;;  %v1050_v54 = vld [vmem:[%s13071_s29 + $0x180] sm:$0xff] }
  0x26   : > { %v1053_v49 = vld [vmem:[%s13071_s29 + $0x198] sm:$0xff]  ;;  %9822 = vmatpush1.bf16.msra.mxu0 %v13124_v35  ;;  %v13154_v53 = vpack.c.bf16 %v1057_v48, %v1051_v47  ;;  %v1056_v55 = vld [vmem:[%s13071_s29 + $0x1b0] sm:$0xff]  ;;  %v1058_v58 = vld [vmem:[%s13071_s29 + $0x1c0] sm:$0xff] }
  0x27   : > { %9848 = vmatpush1.bf16.msra.mxu1 %v13131_v39  ;;  %9824 = vmatprep.subr.bf16.mxu0 %v13133_v40  ;;  %v1052_v56 = vld [vmem:[%s13071_s29 + $0x190] sm:$0xff]  ;;  %v13160_v57 = vpack.c.bf16 %v1059_v50, %v1053_v49  ;;  %v1063_v59 = vld [vmem:[%s13071_s29 + $0x1e8] sm:$0xff]  ;;  %v1069_v60 = vld [vmem:[%s13071_s29 + $0x218] sm:$0x3]  ;;  %v13168_v63 = vpack.c.bf16 %v1056_v55, %v1050_v54 }
  0x28   : > { %9850 = vmatprep.subr.bf16.mxu1 %v13139_v44  ;;  %v1065_v61 = vld [vmem:[%s13071_s29 + $0x1f8] sm:$0xff]  ;;  %v1071_v62 = vld [vmem:[%s13071_s29 + $0x228] sm:$0x3]  ;;  %v13178_v2 = vpack.c.bf16 %v1058_v58, %v1052_v56  ;;  %v13180_v3 = vpack.c.bf16 %v1069_v60, %v1063_v59  ;;  %v1062_v5 = vld [vmem:[%s13071_s29 + $0x1e0] sm:$0xff] }
  0x29   : > { %v1068_v6 = vld [vmem:[%s13071_s29 + $0x210] sm:$0x3]  ;;  %v13186_v10 = vpack.c.bf16 %v1071_v62, %v1065_v61  ;;  %v1070_v11 = vld [vmem:[%s13071_s29 + $0x220] sm:$0x3]  ;;  %v1007_v12 = vld [vmem:[%s13071_s29 + $0x28] sm:$0xff] }
  0x2a   : > { %9826 = vmatpush1.bf16.msra.mxu0 %v13148_v51  ;;  %v1064_v7 = vld [vmem:[%s13071_s29 + $0x1f0] sm:$0xff]  ;;  %v1013_v14 = vld [vmem:[%s13071_s29 + $0x58] sm:$0xff]  ;;  %v13193_v15 = vpack.c.bf16 %v1068_v6, %v1062_v5  ;;  %v8659_v16 = vld [vmem:[%s15605_s3] sm:$0xff]  }
  0x2b   : > { %9852 = vmatpush1.bf16.msra.mxu1 %v13152_v52  ;;  %9828 = vmatprep.subr.bf16.mxu0 %v13154_v53  ;;  %v13202_v19 = vpack.c.bf16 %v1070_v11, %v1064_v7  ;;  %v13204_v20 = vpack.c.bf16 %v1013_v14, %v1007_v12  ;;  %v1006_v21 = vld [vmem:[%s13071_s29 + $0x20] sm:$0xff]  ;;  %v1012_v23 = vld [vmem:[%s13071_s29 + $0x50] sm:$0xff]  ;;  %v13211_v24 = vunpack.c.l.bf16 %v8659_v16  ;;  %v1019_v25 = vld [vmem:[%s13071_s29 + $0x88] sm:$0xff]  ;;  %v13239_v36 = vunpack.c.h.bf16 %v8659_v16 }
  0x2c   : > { %9854 = vmatprep.subr.bf16.mxu1 %v13160_v57  ;;  %v1025_v28 = vld [vmem:[%s13071_s29 + $0xb8] sm:$0xff]  ;;  %v13223_v29 = vpack.c.bf16 %v1012_v23, %v1006_v21  ;;  %v1018_v30 = vld [vmem:[%s13071_s29 + $0x80] sm:$0xff]  ;;  %v1024_v32 = vld [vmem:[%s13071_s29 + $0xb0] sm:$0xff] }
  0x2d   : > { %v13232_v33 = vpack.c.bf16 %v1025_v28, %v1019_v25  ;;  %v9078_v34 = vld [vmem:[%s15605_s3 + $0x8] sm:$0xff]   ;;  %v1037_v38 = vld [vmem:[%s13071_s29 + $0x118] sm:$0xff]  ;;  %v13246_v41 = vpack.c.bf16 %v1024_v32, %v1018_v30  ;;  %v1030_v42 = vld [vmem:[%s13071_s29 + $0xe0] sm:$0xff] }
  0x2e   : > { %9830 = vmatpush1.bf16.msra.mxu0 %v13168_v63  ;;  %v1031_v37 = vld [vmem:[%s13071_s29 + $0xe8] sm:$0xff]  ;;  %v1036_v43 = vld [vmem:[%s13071_s29 + $0x110] sm:$0xff]  ;;  %v13259_v46 = vunpack.c.l.bf16 %v9078_v34  ;;  %v1049_v48 = vld [vmem:[%s13071_s29 + $0x178] sm:$0xff]  ;;  %v13284_v58 = vunpack.c.h.bf16 %v9078_v34 }
  0x2f   : > { %9856 = vmatpush1.bf16.msra.mxu1 %v13178_v2  ;;  %9833 = vmatprep.subr.msk.bf16.mxu0 %vm13172_vm2, %v13180_v3  ;;  %v13254_v45 = vpack.c.bf16 %v1037_v38, %v1031_v37  ;;  %v1043_v47 = vld [vmem:[%s13071_s29 + $0x148] sm:$0xff]  ;;  %v13266_v49 = vpack.c.bf16 %v1036_v43, %v1030_v42  ;;  %v1042_v50 = vld [vmem:[%s13071_s29 + $0x140] sm:$0xff]  ;;  %v1048_v54 = vld [vmem:[%s13071_s29 + $0x170] sm:$0xff] }
  0x30   : > { %9859 = vmatprep.subr.msk.bf16.mxu1 %vm13172_vm2, %v13186_v10  ;;  %v13274_v55 = vpack.c.bf16 %v1049_v48, %v1043_v47  ;;  %v13279_v56 = vld [vmem:[%s15605_s3 + $0x10] ss:$24 sps:$4 sm:$0xff]   ;;  %v1061_v60 = vld [vmem:[%s13071_s29 + $0x1d8] sm:$0xff]  ;;  %v13291_v61 = vpack.c.bf16 %v1048_v54, %v1042_v50  ;;  %v1054_v62 = vld [vmem:[%s13071_s29 + $0x1a0] sm:$0xff] }
  0x31   : > { %v1055_v59 = vld [vmem:[%s13071_s29 + $0x1a8] sm:$0xff]  ;;  %v1060_v5 = vld [vmem:[%s13071_s29 + $0x1d0] sm:$0xff]  ;;  %v13309_v12 = vunpack.c.l.bf16 %v13279_v56  ;;  %v1073_v14 = vld [vmem:[%s13071_s29 + $0x238] sm:$0x3]  ;;  %v1438_v43 = vunpack.c.h.bf16 %v13279_v56 }
  0x32   : > { %9836 = vmatpush1.bf16.msk.msra.mxu0 %vm13172_vm2, %v13193_v15  ;;  %v13299_v6 = vpack.c.bf16 %v1061_v60, %v1055_v59  ;;  %v1079_v7 = vld [vmem:[%s15605_s3 + $0x14] sm:$0x3]  ;;  %v1067_v11 = vld [vmem:[%s13071_s29 + $0x208] sm:$0xff]  ;;  %v13315_v16 = vpack.c.bf16 %v1060_v5, %v1054_v62  ;;  %v1066_v21 = vld [vmem:[%s13071_s29 + $0x200] sm:$0xff] }
  0x33   : > { %9862 = vmatpush1.bf16.msk.msra.mxu1 %vm13172_vm2, %v13202_v19  ;;  %9864 = vmatprep.subr.bf16.mxu0 %v13204_v20  ;;  %v1072_v23 = vld [vmem:[%s13071_s29 + $0x230] sm:$0x3]  ;;  %v13323_v25 = vpack.c.bf16 %v1073_v14, %v1067_v11  ;;  %v13328_v28 = vunpack.c.l.bf16 %v1079_v7  ;;  %v9079_v32 = vld [vmem:[%s15605_s3 + $0x18] sm:$0xff]   ;;  %v9080_v38 = vld [vmem:[%s15605_s3 + $0x20] sm:$0xff]   ;;  %s15590_s29 = smov 74  }
  0x34   : > { %9890 = vmatprep.subr.bf16.mxu1 %v13076_v4  ;;  %v13333_v30 = vpack.c.bf16 %v1072_v23, %v1066_v21  ;;  %v13354_v34 = vunpack.c.l.bf16 %v9079_v32  ;;  %v13368_v37 = vunpack.c.h.bf16 %v9079_v32  ;;  %v8507_v42 = vld [vmem:[%s15605_s3 + $0x2c] sm:$0x3]  ;;  %v12155_v47 = vld [vmem:[%s13218_s1 + $0xf8] ss:$12 sps:$4 sm:$0xff]   ;;  %v12160_v54 = vld [vmem:[%s13218_s1 + $0x110] ss:$12 sps:$4 sm:$0xff]  }
  0x35   : > { %8480 = vmatmul.mubr.msk.f32.vlgmr.msra.gmra.mrb[0].mxu0 %vm1086_vm3, %v13211_v24  ;;  %v12139_v1 = vld [vmem:[%s13218_s1 + $0xac] ss:$12 sps:$4 sm:$0xff]   ;;  %v12142_v48 = vld [vmem:[%s13218_s1 + $0xc4] ss:$12 sps:$4 sm:$0xff]   ;;  %v12165_v59 = vld [vmem:[%s13218_s1 + $0x128] ss:$12 sps:$4 sm:$0xff]  }
  0x36   : > { %8488 = vmatmul.mubr.msk.f32.vlgmr.msra.gmra.mrb[0].mxu1 %vm1086_vm3, %v13211_v24  ;;  %9866 = vmatpush1.bf16.msra.mxu0 %v13223_v29  ;;  %v12156_v50 = vld [vmem:[%s13218_s1 + $0x38] ss:$12 sps:$4 sm:$0xff]   ;;  %v12152_v60 = vld [vmem:[%s13218_s1 + $0xf4] ss:$12 sps:$4 sm:$0xff]   ;;  %v12180_v23 = vld [vmem:[%s13218_s1 + $0x170] ss:$12 sps:$4 sm:$0xff]  }
  0x37   : > { %9892 = vmatpush1.bf16.msra.mxu1 %v13083_v9  ;;  %1194 = vmatprep.mubr.f32.mxu0 %v15586_v0  ;;  %v12149_v56 = vld [vmem:[%s13218_s1 + $0xd8] ss:$12 sps:$4 sm:$0xff]   ;;  %v12166_v62 = vld [vmem:[%s13218_s1 + $0x68] ss:$12 sps:$4 sm:$0xff]   ;;  %v12170_v5 = vld [vmem:[%s13218_s1 + $0x140] ss:$12 sps:$4 sm:$0xff]  }
  0x38   : > { %1295 = vmatprep.mubr.f32.mxu1 %v15586_v0  ;;  %9868 = vmatprep.subr.bf16.mxu0 %v13232_v33  ;;  %v12159_v7 = vld [vmem:[%s13218_s1 + $0x108] ss:$12 sps:$4 sm:$0xff]   ;;  %v12171_v11 = vld [vmem:[%s13218_s1 + $0x80] ss:$12 sps:$4 sm:$0xff]   ;;  %v12162_v14 = vld [vmem:[%s13218_s1 + $0x124] ss:$12 sps:$4 sm:$0xff]  }
  0x39   : > { %8481 = vmatmul.mubr.msk.f32.gmra.mrb[2].mxu0 %vm1086_vm3, %v13239_v36  ;;  %9894 = vmatprep.subr.bf16.mxu1 %v13096_v17  ;;  %v12164_v21 = vld [vmem:[%s13218_s1 + $0x120] ss:$12 sps:$4 sm:$0xff]   ;;  %v12185_v32 = vld [vmem:[%s13218_s1 + $0x248] ss:$12 sps:$4 sm:$0xff]  }
  0x3a   : > { %8489 = vmatmul.mubr.msk.f32.gmra.mrb[2].mxu1 %vm1086_vm3, %v13239_v36  ;;  %9870 = vmatpush1.bf16.msra.mxu0 %v13246_v41 }
  0x3b   : > { %9896 = vmatpush1.bf16.msra.mxu1 %v13104_v22  ;;  %1200 = vmatprep.mubr.f32.mxu0 %v15586_v0 }
  0x3c   : > { %1301 = vmatprep.mubr.f32.mxu1 %v15586_v0  ;;  %9872 = vmatprep.subr.bf16.mxu0 %v13254_v45 }
  0x3d   : > { %8482 = vmatmul.mubr.msk.f32.gmra.mrb[4].mxu0 %vm1086_vm3, %v13259_v46  ;;  %9898 = vmatprep.subr.bf16.mxu1 %v13113_v27 }
  0x3e   : > { %8490 = vmatmul.mubr.msk.f32.gmra.mrb[4].mxu1 %vm1086_vm3, %v13259_v46  ;;  %9874 = vmatpush1.bf16.msra.mxu0 %v13266_v49 }
  0x3f   : > { %9900 = vmatpush1.bf16.msra.mxu1 %v13124_v35  ;;  %1206 = vmatprep.mubr.f32.mxu0 %v15586_v0 }
  0x40   : > { %1307 = vmatprep.mubr.f32.mxu1 %v15586_v0  ;;  %9876 = vmatprep.subr.bf16.mxu0 %v13274_v55 }
  0x41   : > { %8483 = vmatmul.mubr.msk.f32.gmra.mrb[6].mxu0 %vm1086_vm3, %v13284_v58  ;;  %9902 = vmatprep.subr.bf16.mxu1 %v13133_v40 }
  0x42   : > { %8491 = vmatmul.mubr.msk.f32.gmra.mrb[6].mxu1 %vm1086_vm3, %v13284_v58  ;;  %9878 = vmatpush1.bf16.msra.mxu0 %v13291_v61 }
  0x43   : > { %9904 = vmatpush1.bf16.msra.mxu1 %v13148_v51  ;;  %1212 = vmatprep.mubr.f32.mxu0 %v15586_v0 }
  0x44   : > { %1313 = vmatprep.mubr.f32.mxu1 %v15586_v0  ;;  %9880 = vmatprep.subr.bf16.mxu0 %v13299_v6 }
  0x45   : > { %8484 = vmatmul.mubr.msk.f32.gmra.mrb[8].mxu0 %vm1086_vm3, %v13309_v12  ;;  %9906 = vmatprep.subr.bf16.mxu1 %v13154_v53 }
  0x46   : > { %8492 = vmatmul.mubr.msk.f32.gmra.mrb[8].mxu1 %vm1086_vm3, %v13309_v12  ;;  %9882 = vmatpush1.bf16.msra.mxu0 %v13315_v16 }
  0x47   : > { %9908 = vmatpush1.bf16.msra.mxu1 %v13168_v63  ;;  %1218 = vmatprep.mubr.f32.mxu0 %v15586_v0 }
  0x48   : > { %1319 = vmatprep.mubr.f32.mxu1 %v15586_v0  ;;  %9885 = vmatprep.subr.msk.bf16.mxu0 %vm13172_vm2, %v13323_v25 }
  0x49   : > { %8485 = vmatmul.mubr.msk.f32.gmra.mrb[10].mxu0 %vm1086_vm3, %v13328_v28  ;;  %9911 = vmatprep.subr.msk.bf16.mxu1 %vm13172_vm2, %v13180_v3 }
  0x4a   : > { %8493 = vmatmul.mubr.msk.f32.gmra.mrb[10].mxu1 %vm1086_vm3, %v13328_v28  ;;  %9888 = vmatpush1.bf16.msk.msra.mxu0 %vm13172_vm2, %v13333_v30 }
  0x4b   : > { %9914 = vmatpush1.bf16.msk.msra.mxu1 %vm13172_vm2, %v13193_v15  ;;  %1390 = vmatprep.mubr.f32.mxu0 %v15586_v0 }
  0x4c   : > { %1522 = vmatprep.mubr.f32.mxu1 %v15586_v0  ;;  %9916 = vmatprep.subr.bf16.mxu0 %v13081_v8 }
  0x4d   : > { %8496 = vmatmul.mubr.msk.f32.vlgmr.msra.gmra.mrb[12].mxu0 %vm1086_vm3, %v13211_v24  ;;  %9942 = vmatprep.subr.bf16.mxu1 %v13204_v20  ;;  %v8672_v24 = vunpack.c.l.bf16 %v9080_v38 }
  0x4e   : > { %8510 = vmatmul.mubr.msk.f32.vlgmr.msra.gmra.mrb[12].mxu1 %vm1086_vm3, %v13354_v34  ;;  %9918 = vmatpush1.bf16.msra.mxu0 %v13089_v13 }
  0x4f   : > { %1396 = vmatprep.mubr.f32.mxu0 %v15586_v0  ;;  %1528 = vmatprep.mubr.f32.mxu1 %v15586_v0 }
  0x50   : > { %9920 = vmatprep.subr.bf16.mxu0 %v13098_v18  ;;  %9944 = vmatpush1.bf16.msra.mxu1 %v13223_v29 }
  0x51   : > { %8497 = vmatmul.mubr.msk.f32.gmra.mrb[14].mxu0 %vm1086_vm3, %v13239_v36  ;;  %9946 = vmatprep.subr.bf16.mxu1 %v13232_v33  ;;  %v8673_v36 = vunpack.c.h.bf16 %v9080_v38  ;;  %v12177_v38 = vld [vmem:[%s13218_s1 + $0x16c] ss:$12 sps:$4 sm:$0xff]  }
  0x52   : > { %8511 = vmatmul.mubr.msk.f32.gmra.mrb[14].mxu1 %vm1086_vm3, %v13368_v37  ;;  %9922 = vmatpush1.bf16.msra.mxu0 %v13111_v26 }
  0x53   : > { %1402 = vmatprep.mubr.f32.mxu0 %v15586_v0  ;;  %1534 = vmatprep.mubr.f32.mxu1 %v15586_v0 }
  0x54   : > { %9924 = vmatprep.subr.bf16.mxu0 %v13118_v31  ;;  %9948 = vmatpush1.bf16.msra.mxu1 %v13246_v41 }
  0x55   : > { %8498 = vmatmul.mubr.msk.f32.gmra.mrb[16].mxu0 %vm1086_vm3, %v13259_v46  ;;  %9950 = vmatprep.subr.bf16.mxu1 %v13254_v45  ;;  %v1439_v46 = vunpack.c.l.bf16 %v8507_v42  ;;  %v12184_v42 = vld [vmem:[%s13218_s1 + $0x180] ss:$12 sps:$4 sm:$0xff]  }
  0x56   : > { %8512 = vmatmul.mubr.msk.f32.gmra.mrb[16].mxu1 %vm1086_vm3, %v8672_v24  ;;  %9926 = vmatpush1.bf16.msra.mxu0 %v13131_v39 }
  0x57   : > { %1408 = vmatprep.mubr.f32.mxu0 %v15586_v0  ;;  %1540 = vmatprep.mubr.f32.mxu1 %v15586_v0 }
  0x58   : > { %9928 = vmatprep.subr.bf16.mxu0 %v13139_v44  ;;  %9952 = vmatpush1.bf16.msra.mxu1 %v13266_v49 }
  0x59   : > { %8499 = vmatmul.mubr.msk.f32.gmra.mrb[18].mxu0 %vm1086_vm3, %v13284_v58  ;;  %9954 = vmatprep.subr.bf16.mxu1 %v13274_v55  ;;  %v12161_v58 = vld [vmem:[%s13218_s1 + $0x50] ss:$12 sps:$4 sm:$0xff]  }
  0x5a   : > { %8513 = vmatmul.mubr.msk.f32.gmra.mrb[18].mxu1 %vm1086_vm3, %v8673_v36  ;;  %9930 = vmatpush1.bf16.msra.mxu0 %v13152_v52 }
  0x5b   : > { %1414 = vmatprep.mubr.f32.mxu0 %v15586_v0  ;;  %1546 = vmatprep.mubr.f32.mxu1 %v15586_v0 }
  0x5c   : > { %9932 = vmatprep.subr.bf16.mxu0 %v13160_v57  ;;  %9956 = vmatpush1.bf16.msra.mxu1 %v13291_v61 }
  0x5d   : > { %8500 = vmatmul.mubr.msk.f32.gmra.mrb[20].mxu0 %vm1086_vm3, %v13309_v12  ;;  %9958 = vmatprep.subr.bf16.mxu1 %v13299_v6  ;;  %v12175_v12 = vld [vmem:[%s13218_s1 + $0x158] ss:$12 sps:$4 sm:$0xff]  }
  0x5e   : > { %8514 = vmatmul.mubr.msk.f32.gmra.mrb[20].mxu1 %vm1086_vm3, %v1438_v43  ;;  %9934 = vmatpush1.bf16.msra.mxu0 %v13178_v2 }
  0x5f   : > { %1420 = vmatprep.mubr.f32.mxu0 %v15586_v0  ;;  %1552 = vmatprep.mubr.f32.mxu1 %v15586_v0 }
  0x60   : > { %9937 = vmatprep.subr.msk.bf16.mxu0 %vm13172_vm2, %v13186_v10  ;;  %9960 = vmatpush1.bf16.msra.mxu1 %v13315_v16 }
  0x61   : > { %8501 = vmatmul.mubr.msk.f32.gmra.mrb[22].mxu0 %vm1086_vm3, %v13328_v28  ;;  %9963 = vmatprep.subr.msk.bf16.mxu1 %vm13172_vm2, %v13323_v25  ;;  %v12181_v28 = vld [vmem:[%s13218_s1 + $0xb0] ss:$12 sps:$4 sm:$0xff]  }
  0x62   : > { %8515 = vmatmul.mubr.msk.f32.gmra.mrb[22].mxu1 %vm1086_vm3, %v1439_v46  ;;  %9940 = vmatpush1.bf16.msk.msra.mxu0 %vm13172_vm2, %v13202_v19 }
  0x63   : > { %1623 = vmatprep.mubr.f32.mxu0 %v15586_v0  ;;  %1724 = vmatprep.mubr.f32.mxu1 %v15586_v0 }
  0x64   : > { %9966 = vmatpush1.bf16.msk.msra.mxu1 %vm13172_vm2, %v13333_v30  ;;  %9968 = vmatprep.subr.bf16.mxu0 %v13076_v4  ;;  %v9081_v4 = vld [vmem:[%s15605_s3 + $0x30] sm:$0xff]  }
  0x65   : > { %8518 = vmatmul.mubr.msk.f32.vlgmr.msra.gmra.mrb[24].mxu0 %vm1086_vm3, %v13354_v34  ;;  %9994 = vmatprep.subr.bf16.mxu1 %v13081_v8  ;;  %v12118_v8 = vld [vmem:[%s13218_s1 + $0x4] ss:$12 sps:$4 sm:$0xff]  }
  0x66   : > { %1629 = vmatprep.mubr.f32.mxu0 %v15586_v0  ;;  %9970 = vmatpush1.bf16.msra.mxu0 %v13083_v9  ;;  %v13486_v9 = vunpack.c.l.bf16 %v9081_v4 }
  0x67   : > { %8526 = vmatmul.mubr.msk.f32.vlgmr.msra.gmra.mrb[24].mxu1 %vm1086_vm3, %v13354_v34  ;;  %9972 = vmatprep.subr.bf16.mxu0 %v13096_v17  ;;  %v12121_v17 = vld [vmem:[%s13218_s1 + $0x1c] ss:$12 sps:$4 sm:$0xff]   ;;  %v12172_v34 = vld [vmem:[%s13218_s1 + $0x154] ss:$12 sps:$4 sm:$0xff]  }
  0x68   : > { %1730 = vmatprep.mubr.f32.mxu1 %v15586_v0  ;;  %9996 = vmatpush1.bf16.msra.mxu1 %v13089_v13  ;;  %v12120_v13 = vld [vmem:[%s13218_s1] ss:$12 sps:$4 sm:$0xff]  }
  0x69   : > { %8519 = vmatmul.mubr.msk.f32.gmra.mrb[26].mxu0 %vm1086_vm3, %v13368_v37  ;;  %9998 = vmatprep.subr.bf16.mxu1 %v13098_v18  ;;  %v9082_v18 = vld [vmem:[%s15605_s3 + $0x38] sm:$0xff]  }
  0x6a   : > { %1635 = vmatprep.mubr.f32.mxu0 %v15586_v0  ;;  %9974 = vmatpush1.bf16.msra.mxu0 %v13104_v22  ;;  %v13508_v22 = vunpack.c.h.bf16 %v9081_v4 }
  0x6b   : > { %8527 = vmatmul.mubr.msk.f32.gmra.mrb[26].mxu1 %vm1086_vm3, %v13368_v37  ;;  %9976 = vmatprep.subr.bf16.mxu0 %v13113_v27  ;;  %v12124_v27 = vld [vmem:[%s13218_s1 + $0x34] ss:$12 sps:$4 sm:$0xff]   ;;  %v12174_v37 = vld [vmem:[%s13218_s1 + $0x150] ss:$12 sps:$4 sm:$0xff]  }
  0x6c   : > { %1736 = vmatprep.mubr.f32.mxu1 %v15586_v0  ;;  %10000 = vmatpush1.bf16.msra.mxu1 %v13111_v26  ;;  %v12123_v26 = vld [vmem:[%s13218_s1 + $0x18] ss:$12 sps:$4 sm:$0xff]  }
  0x6d   : > { %8520 = vmatmul.mubr.msk.f32.gmra.mrb[28].mxu0 %vm1086_vm3, %v8672_v24  ;;  %10002 = vmatprep.subr.bf16.mxu1 %v13118_v31  ;;  %v13520_v31 = vunpack.c.l.bf16 %v9082_v18 }
  0x6e   : > { %1641 = vmatprep.mubr.f32.mxu0 %v15586_v0  ;;  %9978 = vmatpush1.bf16.msra.mxu0 %v13124_v35  ;;  %v12126_v35 = vld [vmem:[%s13218_s1 + $0x30] ss:$12 sps:$4 sm:$0xff]  }
  0x6f   : > { %8528 = vmatmul.mubr.msk.f32.gmra.mrb[28].mxu1 %vm1086_vm3, %v8672_v24  ;;  %9980 = vmatprep.subr.bf16.mxu0 %v13133_v40  ;;  %v8536_v40 = vld [vmem:[%s15605_s3 + $0x40] sm:$0xf]  ;;  %v12179_v24 = vld [vmem:[%s13218_s1 + $0x168] ss:$12 sps:$4 sm:$0xff]  }
  0x70   : > { %1742 = vmatprep.mubr.f32.mxu1 %v15586_v0  ;;  %10004 = vmatpush1.bf16.msra.mxu1 %v13131_v39  ;;  %v12127_v39 = vld [vmem:[%s13218_s1 + $0x4c] ss:$12 sps:$4 sm:$0xff]  }
  0x71   : > { %8521 = vmatmul.mubr.msk.f32.gmra.mrb[30].mxu0 %vm1086_vm3, %v8673_v36  ;;  %10006 = vmatprep.subr.bf16.mxu1 %v13139_v44  ;;  %v13535_v44 = vunpack.c.h.bf16 %v9082_v18  ;;  %v12189_v18 = vld [vmem:[%s13218_s1 + $0x198] ss:$12 sps:$4 sm:$0xff]  }
  0x72   : > { %1647 = vmatprep.mubr.f32.mxu0 %v15586_v0  ;;  %9982 = vmatpush1.bf16.msra.mxu0 %v13148_v51  ;;  %v12129_v51 = vld [vmem:[%s13218_s1 + $0x48] ss:$12 sps:$4 sm:$0xff]  }
  0x73   : > { %8529 = vmatmul.mubr.msk.f32.gmra.mrb[30].mxu1 %vm1086_vm3, %v8673_v36  ;;  %9984 = vmatprep.subr.bf16.mxu0 %v13154_v53  ;;  %v12130_v53 = vld [vmem:[%s13218_s1 + $0x64] ss:$12 sps:$4 sm:$0xff]  }
  0x74   : > { %1748 = vmatprep.mubr.f32.mxu1 %v15586_v0  ;;  %10008 = vmatpush1.bf16.msra.mxu1 %v13152_v52  ;;  %v13546_v52 = vunpack.c.l.bf16 %v8536_v40  ;;  %v12182_v36 = vld [vmem:[%s13218_s1 + $0x184] ss:$12 sps:$4 sm:$0xff]  }
  0x75   : > { %8522 = vmatmul.mubr.msk.f32.gmra.mrb[32].mxu0 %vm1086_vm3, %v1438_v43  ;;  %10010 = vmatprep.subr.bf16.mxu1 %v13160_v57  ;;  %v8537_v57 = vld [vmem:[%s15605_s3 + $0x44] sm:$0x3]  ;;  %s15618_s3 = sld [smem:[#allocation8_spill]] }
  0x76   : > { %1653 = vmatprep.mubr.f32.mxu0 %v15586_v0  ;;  %9986 = vmatpush1.bf16.msra.mxu0 %v13168_v63  ;;  %v12132_v63 = vld [vmem:[%s13218_s1 + $0x60] ss:$12 sps:$4 sm:$0xff]  }
  0x77   : > { %8530 = vmatmul.mubr.msk.f32.gmra.mrb[32].mxu1 %vm1086_vm3, %v1438_v43  ;;  %9989 = vmatprep.subr.msk.bf16.mxu0 %vm13172_vm2, %v13180_v3  ;;  %v12133_v3 = vld [vmem:[%s13218_s1 + $0x7c] ss:$12 sps:$4 sm:$0xff]  }
  0x78   : > { %1754 = vmatprep.mubr.f32.mxu1 %v15586_v0  ;;  %10012 = vmatpush1.bf16.msra.mxu1 %v13178_v2  ;;  %v13561_v2 = vunpack.c.l.bf16 %v8537_v57  ;;  %v12186_v43 = vld [vmem:[%s13218_s1 + $0x188] ss:$12 sps:$4 sm:$0xff]  }
  0x79   : > { %8523 = vmatmul.mubr.msk.f32.gmra.mrb[34].mxu0 %vm1086_vm3, %v1439_v46  ;;  %10015 = vmatprep.subr.msk.bf16.mxu1 %vm13172_vm2, %v13186_v10  ;;  %v12135_v10 = vld [vmem:[%s13218_s1 + $0x78] ss:$12 sps:$4 sm:$0xff]  }
  0x7a   : > { %9992 = vmatpush1.bf16.msk.msra.mxu0 %vm13172_vm2, %v13193_v15  ;;  %1856 = vmatprep.mubr.f32.mxu0 %v15586_v0  ;;  %v12145_v15 = vld [vmem:[%s13218_s1 + $0xc8] ss:$12 sps:$4 sm:$0xff]  }
  0x7b   : > { %8531 = vmatmul.mubr.msk.f32.gmra.mrb[34].mxu1 %vm1086_vm3, %v1439_v46  ;;  %10020 = vmatprep.subr.bf16.mxu0 %v13204_v20  ;;  %v12138_v20 = vld [vmem:[%s13218_s1 + $0x90] ss:$12 sps:$4 sm:$0xff]  }
  0x7c   : > { %10018 = vmatpush1.bf16.msk.msra.mxu1 %vm13172_vm2, %v13202_v19  ;;  %1957 = vmatprep.mubr.f32.mxu1 %v15586_v0  ;;  %v12136_v19 = vld [vmem:[%s13218_s1 + $0x94] ss:$12 sps:$4 sm:$0xff]   ;;  %v12187_v46 = vld [vmem:[%s13218_s1 + $0x19c] ss:$12 sps:$4 sm:$0xff]  }
  0x7d   : > { %8540 = vmatmul.mubr.msk.f32.vlgmr.msra.gmra.mrb[36].mxu0 %vm1086_vm3, %v13486_v9  ;;  %10046 = vmatprep.subr.bf16.mxu1 %v12118_v8 }
  0x7e   : > { %1862 = vmatprep.mubr.f32.mxu0 %v15586_v0  ;;  %10022 = vmatpush1.bf16.msra.mxu0 %v13223_v29  ;;  %v12146_v29 = vld [vmem:[%s13218_s1 + $0x8] ss:$12 sps:$4 sm:$0xff]  }
  0x7f   : > { %8548 = vmatmul.mubr.msk.f32.vlgmr.msra.gmra.mrb[36].mxu1 %vm1086_vm3, %v13486_v9  ;;  %10024 = vmatprep.subr.bf16.mxu0 %v13232_v33  ;;  %v12150_v33 = vld [vmem:[%s13218_s1 + $0xe0] ss:$12 sps:$4 sm:$0xff]  }
  0x80   : > { %1963 = vmatprep.mubr.f32.mxu1 %v15586_v0  ;;  %10048 = vmatpush1.bf16.msra.mxu1 %v12120_v13  ;;  %v12190_v13 = vld [vmem:[%s13218_s1 + $0x260] ss:$12 sps:$4 sm:$0xff]  }
  0x81   : > { %8541 = vmatmul.mubr.msk.f32.gmra.mrb[38].mxu0 %vm1086_vm3, %v13508_v22  ;;  %10050 = vmatprep.subr.bf16.mxu1 %v12121_v17 }
  0x82   : > { %1868 = vmatprep.mubr.f32.mxu0 %v15586_v0  ;;  %10026 = vmatpush1.bf16.msra.mxu0 %v13246_v41  ;;  %v12141_v41 = vld [vmem:[%s13218_s1 + $0xa8] ss:$12 sps:$4 sm:$0xff]  }
  0x83   : > { %8549 = vmatmul.mubr.msk.f32.gmra.mrb[38].mxu1 %vm1086_vm3, %v13508_v22  ;;  %10028 = vmatprep.subr.bf16.mxu0 %v13254_v45  ;;  %v12151_v45 = vld [vmem:[%s13218_s1 + $0x20] ss:$12 sps:$4 sm:$0xff]  }
  0x84   : > { %1969 = vmatprep.mubr.f32.mxu1 %v15586_v0  ;;  %10052 = vmatpush1.bf16.msra.mxu1 %v12123_v26  ;;  %v12192_v26 = vld [vmem:[%s13218_s1 + $0x1b4] ss:$12 sps:$4 sm:$0xff]  }
  0x85   : > { %8542 = vmatmul.mubr.msk.f32.gmra.mrb[40].mxu0 %vm1086_vm3, %v13520_v31  ;;  %10054 = vmatprep.subr.bf16.mxu1 %v12124_v27  ;;  %v12195_v27 = vld [vmem:[%s13218_s1 + $0x278] ss:$12 sps:$4 sm:$0xff]  }
  0x86   : > { %1874 = vmatprep.mubr.f32.mxu0 %v15586_v0  ;;  %10030 = vmatpush1.bf16.msra.mxu0 %v13266_v49  ;;  %v12144_v49 = vld [vmem:[%s13218_s1 + $0xc0] ss:$12 sps:$4 sm:$0xff]  }
  0x87   : > { %8550 = vmatmul.mubr.msk.f32.gmra.mrb[40].mxu1 %vm1086_vm3, %v13520_v31  ;;  %10032 = vmatprep.subr.bf16.mxu0 %v13274_v55  ;;  %v12147_v55 = vld [vmem:[%s13218_s1 + $0xdc] ss:$12 sps:$4 sm:$0xff]  }
  0x88   : > { %1975 = vmatprep.mubr.f32.mxu1 %v15586_v0  ;;  %10056 = vmatpush1.bf16.msra.mxu1 %v12126_v35 }
  0x89   : > { %8543 = vmatmul.mubr.msk.f32.gmra.mrb[42].mxu0 %vm1086_vm3, %v13535_v44  ;;  %10058 = vmatprep.subr.bf16.mxu1 %v12127_v39 }
  0x8a   : > { %1880 = vmatprep.mubr.f32.mxu0 %v15586_v0  ;;  %10034 = vmatpush1.bf16.msra.mxu0 %v13291_v61  ;;  %v12154_v61 = vld [vmem:[%s13218_s1 + $0xf0] ss:$12 sps:$4 sm:$0xff]  }
  0x8b   : > { %8551 = vmatmul.mubr.msk.f32.gmra.mrb[42].mxu1 %vm1086_vm3, %v13535_v44  ;;  %10036 = vmatprep.subr.bf16.mxu0 %v13299_v6  ;;  %v12157_v6 = vld [vmem:[%s13218_s1 + $0x10c] ss:$12 sps:$4 sm:$0xff]  }
  0x8c   : > { %1981 = vmatprep.mubr.f32.mxu1 %v15586_v0  ;;  %10060 = vmatpush1.bf16.msra.mxu1 %v12129_v51  ;;  %v12196_v51 = vld [vmem:[%s13218_s1 + $0x1b8] ss:$12 sps:$4 sm:$0xff]  }
  0x8d   : > { %8544 = vmatmul.mubr.msk.f32.gmra.mrb[44].mxu0 %vm1086_vm3, %v13546_v52  ;;  %10062 = vmatprep.subr.bf16.mxu1 %v12130_v53 }
  0x8e   : > { %1886 = vmatprep.mubr.f32.mxu0 %v15586_v0  ;;  %10038 = vmatpush1.bf16.msra.mxu0 %v13315_v16  ;;  %v12176_v16 = vld [vmem:[%s13218_s1 + $0x98] ss:$12 sps:$4 sm:$0xff]  }
  0x8f   : > { %8552 = vmatmul.mubr.msk.f32.gmra.mrb[44].mxu1 %vm1086_vm3, %v13546_v52  ;;  %10041 = vmatprep.subr.msk.bf16.mxu0 %vm13172_vm2, %v13323_v25  ;;  %v12167_v25 = vld [vmem:[%s13218_s1 + $0x13c] ss:$12 sps:$4 sm:$0xff]  }
  0x90   : > { %1987 = vmatprep.mubr.f32.mxu1 %v15586_v0  ;;  %10064 = vmatpush1.bf16.msra.mxu1 %v12132_v63 }
  0x91   : > { %8545 = vmatmul.mubr.msk.f32.gmra.mrb[46].mxu0 %vm1086_vm3, %v13561_v2  ;;  %10066 = vmatprep.subr.bf16.mxu1 %v12133_v3 }
  0x92   : > { %10044 = vmatpush1.bf16.msk.msra.mxu0 %vm13172_vm2, %v13333_v30  ;;  %2058 = vmatprep.mubr.f32.mxu0 %v15586_v0  ;;  %v12169_v30 = vld [vmem:[%s13218_s1 + $0x138] ss:$12 sps:$4 sm:$0xff]   ;;  %vm6372_vm2 = vcmask 302080  }
  0x93   : > { %8553 = vmatmul.mubr.msk.f32.gmra.mrb[46].mxu1 %vm1086_vm3, %v13561_v2  ;;  %10556 = vmatprep.subr.bf16.mxu0 %v12145_v15  ;;  %v12199_v15 = vld [vmem:[%s13218_s1 + $0x1c8] ss:$12 sps:$4 sm:$0xff]  }
  0x94   : > { %10068 = vmatpush1.bf16.msra.mxu1 %v12135_v10 }
  0x95   : > { %8556 = vmatmul.mubr.msk.f32.vlgmr.msra.gmra.mrb[48].mxu0 %vm1086_vm3, %v13486_v9  ;;  %10070 = vmatprep.subr.bf16.mxu1 %v12136_v19  ;;  %v12201_v19 = vld [vmem:[%s13218_s1 + $0x1d0] ss:$12 sps:$4 sm:$0xff]  }
  0x96   : > { %10558 = vmatpush3.bf16.msra.mxu0 %v12146_v29  ;;  %2064 = vmatprep.mubr.f32.mxu0 %v15586_v0 }
  0x97   : > { %10560 = vmatprep.subr.bf16.mxu0 %v12150_v33  ;;  %v12202_v33 = vld [vmem:[%s13218_s1 + $0x1e4] ss:$12 sps:$4 sm:$0xff]  }
  0x98   : > { %10072 = vmatpush1.bf16.msra.mxu1 %v12138_v20 }
  0x99   : > { %10074 = vmatprep.subr.bf16.mxu1 %v12139_v1  ;;  %8557 = vmatmul.mubr.msk.f32.gmra.mrb[50].mxu0 %vm1086_vm3, %v13508_v22  ;;  %v12191_v22 = vld [vmem:[%s13218_s1 + $0x1a0] ss:$12 sps:$4 sm:$0xff]   ;;  %v12205_v1 = vld [vmem:[%s13218_s1 + $0x2a8] ss:$12 sps:$4 sm:$0xff]  }
  0x9a   : > { %10562 = vmatpush3.bf16.msra.mxu0 %v12151_v45  ;;  %2070 = vmatprep.mubr.f32.mxu0 %v15586_v0 }
  0x9b   : > { %10564 = vmatprep.subr.bf16.mxu0 %v12155_v47  ;;  %v12204_v47 = vld [vmem:[%s13218_s1 + $0x1e0] ss:$12 sps:$4 sm:$0xff]  }
  0x9c   : > { %10076 = vmatpush1.bf16.msra.mxu1 %v12141_v41 }
  0x9d   : > { %10078 = vmatprep.subr.bf16.mxu1 %v12142_v48  ;;  %8558 = vmatmul.mubr.msk.f32.gmra.mrb[52].mxu0 %vm1086_vm3, %v13520_v31  ;;  %v12206_v48 = vld [vmem:[%s13218_s1 + $0x1e8] ss:$12 sps:$4 sm:$0xff]  }
  0x9e   : > { %10566 = vmatpush3.bf16.msra.mxu0 %v12156_v50  ;;  %2076 = vmatprep.mubr.f32.mxu0 %v15586_v0 }
  0x9f   : > { %10568 = vmatprep.subr.bf16.mxu0 %v12160_v54  ;;  %v12207_v54 = vld [vmem:[%s13218_s1 + $0x1fc] ss:$12 sps:$4 sm:$0xff]  }
  0xa0   : > { %10080 = vmatpush1.bf16.msra.mxu1 %v12144_v49 }
  0xa1   : > { %10082 = vmatprep.subr.bf16.mxu1 %v12147_v55  ;;  %8559 = vmatmul.mubr.msk.f32.gmra.mrb[54].mxu0 %vm1086_vm3, %v13535_v44  ;;  %v12194_v44 = vld [vmem:[%s13218_s1 + $0x1b0] ss:$12 sps:$4 sm:$0xff]   ;;  %v12210_v55 = vld [vmem:[%s13218_s1 + $0x2c0] ss:$12 sps:$4 sm:$0xff]  }
  0xa2   : > { %10570 = vmatpush3.bf16.msra.mxu0 %v12161_v58  ;;  %2082 = vmatprep.mubr.f32.mxu0 %v15586_v0 }
  0xa3   : > { %10572 = vmatprep.subr.bf16.mxu0 %v12165_v59  ;;  %v12209_v59 = vld [vmem:[%s13218_s1 + $0x1f8] ss:$12 sps:$4 sm:$0xff]  }
  0xa4   : > { %10084 = vmatpush1.bf16.msra.mxu1 %v12149_v56 }
  0xa5   : > { %10086 = vmatprep.subr.bf16.mxu1 %v12152_v60  ;;  %8560 = vmatmul.mubr.msk.f32.gmra.mrb[56].mxu0 %vm1086_vm3, %v13546_v52  ;;  %v12197_v52 = vld [vmem:[%s13218_s1 + $0x1cc] ss:$12 sps:$4 sm:$0xff]  }
  0xa6   : > { %10574 = vmatpush3.bf16.msra.mxu0 %v12166_v62  ;;  %2088 = vmatprep.mubr.f32.mxu0 %v15586_v0  ;;  %v12211_v60 = vld [vmem:[%s13218_s1 + $0x200] ss:$12 sps:$4 sm:$0xff]   ;;  %v12447_v0 = vld [vmem:[%s13218_s1 + $0x708] ss:$12 sps:$4 sm:$0xff]  }
  0xa7   : > { %10576 = vmatprep.subr.bf16.mxu0 %v12170_v5 }
  0xa8   : > { %10088 = vmatpush1.bf16.msra.mxu1 %v12154_v61 }
  0xa9   : > { %10090 = vmatprep.subr.bf16.mxu1 %v12157_v6  ;;  %8561 = vmatmul.mubr.msk.f32.gmra.mrb[58].mxu0 %vm1086_vm3, %v13561_v2  ;;  %v12200_v2 = vld [vmem:[%s13218_s1 + $0x290] ss:$12 sps:$4 sm:$0xff]   ;;  %v12212_v6 = vld [vmem:[%s13218_s1 + $0x214] ss:$12 sps:$4 sm:$0xff]   ;;  %vm6363_vm3 = vcmask 1045504  }
  0xaa   : > { %10578 = vmatpush3.bf16.msra.mxu0 %v12171_v11  ;;  %v12214_v11 = vld [vmem:[%s13218_s1 + $0x210] ss:$12 sps:$4 sm:$0xff]  }
  0xab   : > { %10580 = vmatprep.subr.bf16.mxu0 %v12175_v12  ;;  %v12216_v12 = vld [vmem:[%s13218_s1 + $0x218] ss:$12 sps:$4 sm:$0xff]  }
  0xac   : > { %10092 = vmatpush1.bf16.msra.mxu1 %v12159_v7  ;;  %v12215_v7 = vld [vmem:[%s13218_s1 + $0x2d8] ss:$12 sps:$4 sm:$0xff]  }
  0xad   : > { %10094 = vmatprep.subr.bf16.mxu1 %v12162_v14 }
  0xae   : > { %10582 = vmatpush3.bf16.msra.mxu0 %v12176_v16 }
  0xaf   : > { %10584 = vmatprep.subr.bf16.mxu0 %v12180_v23  ;;  %v12220_v23 = vld [vmem:[%s13218_s1 + $0x2f0] ss:$12 sps:$4 sm:$0xff]  }
  0xb0   : > { %10096 = vmatpush1.bf16.msra.mxu1 %v12164_v21  ;;  %v12217_v21 = vld [vmem:[%s13218_s1 + $0x22c] ss:$12 sps:$4 sm:$0xff]  }
  0xb1   : > { %10098 = vmatprep.subr.bf16.mxu1 %v12167_v25 }
  0xb2   : > { %10586 = vmatpush3.bf16.msra.mxu0 %v12181_v28 }
  0xb3   : > { %10588 = vmatprep.subr.bf16.mxu0 %v12185_v32  ;;  %v12221_v32 = vld [vmem:[%s13218_s1 + $0x230] ss:$12 sps:$4 sm:$0xff]  }
  0xb4   : > { %10100 = vmatpush1.bf16.msra.mxu1 %v12169_v30  ;;  %v12219_v30 = vld [vmem:[%s13218_s1 + $0x228] ss:$12 sps:$4 sm:$0xff]  }
  0xb5   : > { %10102 = vmatprep.subr.bf16.mxu1 %v12172_v34 }
  0xb8   : > { %10104 = vmatpush1.bf16.msra.mxu1 %v12174_v37 }
  0xb9   : > { %10106 = vmatprep.subr.bf16.mxu1 %v12177_v38  ;;  %v12222_v38 = vld [vmem:[%s13218_s1 + $0x244] ss:$12 sps:$4 sm:$0xff]  }
  0xbc   : > { %10108 = vmatpush1.bf16.msra.mxu1 %v12179_v24 }
  0xbd   : > { %10110 = vmatprep.subr.bf16.mxu1 %v12182_v36  ;;  %v12273_v36 = vld [vmem:[%s13218_s1 + $0x3c8] ss:$12 sps:$4 sm:$0xff]  }
 0x108   : > { %v1190_v4 = vpop.f32.mrb[0].mxu0 }
 0x109   : > { %v13639_v8 = vpop.f32.mrb[0].mxu1  ;;  %v1192_v9 = vpop.f32.mrb[1].mxu0 }
 0x10a   : > { %v13642_v17 = vpop.f32.mrb[1].mxu1  ;;  %3825 = vmatprep.mubr.f32.mxu1 %v1192_v9  ;;  %4633 = vmatprep.mubr.f32.mxu0 %v1192_v9  ;;  %v12225_v9 = vld [vmem:[%s13218_s1 + $0x25c] ss:$12 sps:$4 sm:$0xff]  }
 0x10b   : > { %3826 = vmatmul.mubr.f32.vlgmr.msra.gmra.mrb[48].mxu1 %v1190_v4  ;;  %4634 = vmatmul.mubr.f32.vlgmr.msra.gmra.mrb[60].mxu0 %v1190_v4 }
 0x10c   : > { %10112 = vmatpush1.bf16.msra.mxu1 %v12184_v42  ;;  %10590 = vmatpush3.bf16.msra.mxu0 %v12186_v43  ;;  %v1196_v31 = vpop.f32.mrb[2].mxu0  ;;  %v12224_v43 = vld [vmem:[%s13218_s1 + $0x240] ss:$12 sps:$4 sm:$0xff]  }
 0x10d   : > { %v13648_v35 = vpop.f32.mrb[2].mxu1  ;;  %v1198_v39 = vpop.f32.mrb[3].mxu0  ;;  %10114 = vmatprep.subr.bf16.mxu1 %v12187_v46  ;;  %10592 = vmatprep.subr.bf16.mxu0 %v12190_v13 }
 0x10e   : > { %v13650_v40 = vpop.f32.mrb[3].mxu1  ;;  %3831 = vmatprep.mubr.f32.mxu1 %v1198_v39  ;;  %4638 = vmatprep.mubr.f32.mxu0 %v1198_v39  ;;  %v12228_v39 = vld [vmem:[%s13218_s1 + $0x274] ss:$12 sps:$4 sm:$0xff]  }
 0x10f   : > { %3832 = vmatmul.mubr.f32.gmra.mrb[50].mxu1 %v1196_v31  ;;  %4639 = vmatmul.mubr.f32.gmra.mrb[62].mxu0 %v1196_v31 }
 0x110   : > { %10116 = vmatpush1.bf16.msra.mxu1 %v12189_v18  ;;  %10594 = vmatpush3.bf16.msra.mxu0 %v12191_v22  ;;  %v1202_v53 = vpop.f32.mrb[4].mxu0  ;;  %v12278_v22 = vld [vmem:[%s13218_s1 + $0x3e0] ss:$12 sps:$4 sm:$0xff]  }
 0x111   : > { %v13655_v57 = vpop.f32.mrb[4].mxu1  ;;  %v1204_v63 = vpop.f32.mrb[5].mxu0  ;;  %10118 = vmatprep.subr.bf16.mxu1 %v12192_v26  ;;  %10596 = vmatprep.subr.bf16.mxu0 %v12195_v27  ;;  %v12227_v26 = vld [vmem:[%s13218_s1 + $0x258] ss:$12 sps:$4 sm:$0xff]  }
 0x112   : > { %v13658_v3 = vpop.f32.mrb[5].mxu1  ;;  %3837 = vmatprep.mubr.f32.mxu1 %v1204_v63  ;;  %4643 = vmatprep.mubr.f32.mxu0 %v1204_v63  ;;  %v12230_v63 = vld [vmem:[%s13218_s1 + $0x270] ss:$12 sps:$4 sm:$0xff]  }
 0x113   : > { %3838 = vmatmul.mubr.f32.gmra.mrb[52].mxu1 %v1202_v53  ;;  %4644 = vmatmul.mubr.f32.gmra.mrb[64].mxu0 %v1202_v53  ;;  %v12283_v53 = vld [vmem:[%s13218_s1 + $0x3f8] ss:$12 sps:$4 sm:$0xff]  }
 0x114   : > { %10120 = vmatpush1.bf16.msra.mxu1 %v12194_v44  ;;  %10598 = vmatpush3.bf16.msra.mxu0 %v12196_v51  ;;  %v1208_v10 = vpop.f32.mrb[6].mxu0  ;;  %v12279_v51 = vld [vmem:[%s13218_s1 + $0x320] ss:$12 sps:$4 sm:$0xff]  }
 0x115   : > { %v13662_v20 = vpop.f32.mrb[6].mxu1  ;;  %v1210_v29 = vpop.f32.mrb[7].mxu0  ;;  %10122 = vmatprep.subr.bf16.mxu1 %v12197_v52  ;;  %10600 = vmatprep.subr.bf16.mxu0 %v12200_v2 }
 0x116   : > { %v13666_v41 = vpop.f32.mrb[7].mxu1  ;;  %3843 = vmatprep.mubr.f32.mxu1 %v1210_v29  ;;  %4648 = vmatprep.mubr.f32.mxu0 %v1210_v29  ;;  %v12284_v29 = vld [vmem:[%s13218_s1 + $0x338] ss:$12 sps:$4 sm:$0xff]  }
 0x117   : > { %3844 = vmatmul.mubr.f32.gmra.mrb[54].mxu1 %v1208_v10  ;;  %4649 = vmatmul.mubr.f32.gmra.mrb[66].mxu0 %v1208_v10 }
 0x118   : > { %10124 = vmatpush1.bf16.msra.mxu1 %v12199_v15  ;;  %10602 = vmatpush3.bf16.msra.mxu0 %v12201_v19  ;;  %v1214_v45 = vpop.f32.mrb[8].mxu0  ;;  %v12231_v19 = vld [vmem:[%s13218_s1 + $0x28c] ss:$12 sps:$4 sm:$0xff]  }
 0x119   : > { %v13670_v49 = vpop.f32.mrb[8].mxu1  ;;  %v1216_v50 = vpop.f32.mrb[9].mxu0  ;;  %10126 = vmatprep.subr.bf16.mxu1 %v12202_v33  ;;  %10604 = vmatprep.subr.bf16.mxu0 %v12205_v1  ;;  %v12288_v1 = vld [vmem:[%s13218_s1 + $0x410] ss:$12 sps:$4 sm:$0xff]  }
 0x11a   : > { %v13674_v56 = vpop.f32.mrb[9].mxu1  ;;  %3849 = vmatprep.mubr.f32.mxu1 %v1216_v50  ;;  %4653 = vmatprep.mubr.f32.mxu0 %v1216_v50 }
 0x11b   : > { %3850 = vmatmul.mubr.f32.gmra.mrb[56].mxu1 %v1214_v45  ;;  %4654 = vmatmul.mubr.f32.gmra.mrb[68].mxu0 %v1214_v45 }
 0x11c   : > { %10128 = vmatpush1.bf16.msra.mxu1 %v12204_v47  ;;  %10606 = vmatpush3.bf16.msra.mxu0 %v12206_v48  ;;  %v1220_v58 = vpop.f32.mrb[10].mxu0  ;;  %v12233_v47 = vld [vmem:[%s13218_s1 + $0x288] ss:$12 sps:$4 sm:$0xff]  }
 0x11d   : > { %v13678_v61 = vpop.f32.mrb[10].mxu1  ;;  %v1222_v62 = vpop.f32.mrb[11].mxu0  ;;  %10130 = vmatprep.subr.bf16.mxu1 %v12207_v54  ;;  %10608 = vmatprep.subr.bf16.mxu0 %v12210_v55  ;;  %v12234_v54 = vld [vmem:[%s13218_s1 + $0x2a4] ss:$12 sps:$4 sm:$0xff]  }
 0x11e   : > { %v13680_v5 = vpop.f32.mrb[11].mxu1  ;;  %3855 = vmatprep.mubr.f32.mxu1 %v1222_v62  ;;  %4658 = vmatprep.mubr.f32.mxu0 %v1222_v62  ;;  %v12289_v55 = vld [vmem:[%s13218_s1 + $0x350] ss:$12 sps:$4 sm:$0xff]   ;;  %v12236_v62 = vld [vmem:[%s13218_s1 + $0x2a0] ss:$12 sps:$4 sm:$0xff]  }
 0x11f   : > { %3856 = vmatmul.mubr.f32.gmra.mrb[58].mxu1 %v1220_v58  ;;  %4659 = vmatmul.mubr.f32.gmra.mrb[70].mxu0 %v1220_v58 }
 0x120   : > { %10132 = vmatpush1.bf16.msra.mxu1 %v12209_v59  ;;  %10610 = vmatpush3.bf16.msra.mxu0 %v12211_v60  ;;  %v13686_v14 = vpop.f32.mrb[12].mxu0  ;;  %v12293_v59 = vld [vmem:[%s13218_s1 + $0x428] ss:$12 sps:$4 sm:$0xff]  }
 0x121   : > { %v1524_v16 = vpop.f32.mrb[12].mxu1  ;;  %3926 = vmatprep.mubr.f32.mxu1 %v13642_v17  ;;  %4728 = vmatprep.mubr.f32.mxu0 %v13642_v17  ;;  %v13692_v25 = vpop.f32.mrb[13].mxu0  ;;  %v12274_v17 = vld [vmem:[%s13218_s1 + $0x308] ss:$12 sps:$4 sm:$0xff]  }
 0x122   : > { %2131 = vrot.lane.b32.xlu0 %v1524_v16, %s12918_s8  ;;  %v13695_v28 = vpop.f32.mrb[13].mxu1  ;;  %10134 = vmatprep.subr.bf16.mxu1 %v12212_v6 }
 0x123   : > { %10612 = vmatprep.subr.bf16.mxu0 %v12215_v7 }
 0x124   : > { %10136 = vmatpush1.bf16.msra.mxu1 %v12214_v11  ;;  %10614 = vmatpush3.bf16.msra.mxu0 %v12216_v12  ;;  %v13699_v34 = vpop.f32.mrb[14].mxu0  ;;  %v12237_v11 = vld [vmem:[%s13218_s1 + $0x2bc] ss:$12 sps:$4 sm:$0xff]  }
 0x125   : > { %v1530_v37 = vpop.f32.mrb[14].mxu1  ;;  %10138 = vmatprep.subr.bf16.mxu1 %v12217_v21  ;;  %10616 = vmatprep.subr.bf16.mxu0 %v12220_v23  ;;  %v13702_v24 = vpop.f32.mrb[15].mxu0  ;;  %v12294_v12 = vld [vmem:[%s13218_s1 + $0x368] ss:$12 sps:$4 sm:$0xff]   ;;  %v12298_v21 = vld [vmem:[%s13218_s1 + $0x440] ss:$12 sps:$4 sm:$0xff]  }
 0x126   : > { %2143 = vrot.lane.b32.xlu0 %v1530_v37, %s12918_s8  ;;  %v13706_v42 = vpop.f32.mrb[15].mxu1 }
 0x128   : > { %10140 = vmatpush1.bf16.msra.mxu1 %v12219_v30  ;;  %10618 = vmatpush3.bf16.msra.mxu0 %v12221_v32  ;;  %v13709_v46 = vpop.f32.mrb[16].mxu0  ;;  %v12239_v30 = vld [vmem:[%s13218_s1 + $0x2b8] ss:$12 sps:$4 sm:$0xff]  }
 0x129   : > { %v1536_v4 = vpop.f32.mrb[16].mxu1  ;;  %10142 = vmatprep.subr.bf16.mxu1 %v12222_v38  ;;  %v13712_v13 = vpop.f32.mrb[17].mxu0  ;;  %10620 = vmatprep.subr.bf16.mxu0 %v12273_v36  ;;  %v12240_v38 = vld [vmem:[%s13218_s1 + $0x2d4] ss:$12 sps:$4 sm:$0xff]  }
 0x12a   : > { %2155 = vrot.lane.b32.xlu1 %v1536_v4, %s12918_s8  ;;  %v13716_v18 = vpop.f32.mrb[17].mxu1 }
 0x12b   : > { %4729 = vmatmul.mubr.f32.vlgmr.msra.gmra.mrb[72].mxu0 %v13639_v8 }
 0x12c   : > { %10144 = vmatpush1.bf16.msra.mxu1 %v12224_v43  ;;  %4733 = vmatprep.mubr.f32.mxu0 %v13650_v40  ;;  %v13722_v27 = vpop.f32.mrb[18].mxu0  ;;  %v12299_v43 = vld [vmem:[%s13218_s1 + $0x380] ss:$12 sps:$4 sm:$0xff]  }
 0x12d   : > { %v1542_v31 = vpop.f32.mrb[18].mxu1  ;;  %10146 = vmatprep.subr.bf16.mxu1 %v12225_v9  ;;  %v13725_v44 = vpop.f32.mrb[19].mxu0  ;;  %10622 = vmatpush3.bf16.msra.mxu0 %v12274_v17  ;;  %v12303_v9 = vld [vmem:[%s13218_s1 + $0x458] ss:$12 sps:$4 sm:$0xff]  }
 0x12e   : > { %2167 = vrot.lane.b32.xlu1 %v1542_v31, %s12918_s8  ;;  %v13729_v52 = vpop.f32.mrb[19].mxu1  ;;  %10624 = vmatprep.subr.bf16.mxu0 %v12278_v22  ;;  %v12242_v22 = vld [vmem:[%s13218_s1 + $0x2d0] ss:$12 sps:$4 sm:$0xff]  }
 0x12f   : > { %4734 = vmatmul.mubr.f32.gmra.mrb[74].mxu0 %v13648_v35 }
 0x130   : > { %10148 = vmatpush1.bf16.msra.mxu1 %v12227_v26  ;;  %4738 = vmatprep.mubr.f32.mxu0 %v13658_v3  ;;  %v13735_v2 = vpop.f32.mrb[20].mxu0 }
 0x131   : > { %v1548_v10 = vpop.f32.mrb[20].mxu1  ;;  %10150 = vmatprep.subr.bf16.mxu1 %v12228_v39  ;;  %v13737_v15 = vpop.f32.mrb[21].mxu0  ;;  %10626 = vmatpush3.bf16.msra.mxu0 %v12279_v51  ;;  %v12243_v51 = vld [vmem:[%s13218_s1 + $0x2ec] ss:$12 sps:$4 sm:$0xff]  }
 0x132   : > { %2179 = vrot.lane.b32.xlu0 %v1548_v10, %s12918_s8  ;;  %v13742_v33 = vpop.f32.mrb[21].mxu1  ;;  %10628 = vmatprep.subr.bf16.mxu0 %v12283_v53  ;;  %v12304_v53 = vld [vmem:[%s13218_s1 + $0x398] ss:$12 sps:$4 sm:$0xff]   ;;  %v12308_v10 = vld [vmem:[%s13218_s1 + $0x470] ss:$12 sps:$4 sm:$0xff]  }
 0x133   : > { %4739 = vmatmul.mubr.f32.gmra.mrb[76].mxu0 %v13655_v57 }
 0x134   : > { %10152 = vmatpush1.bf16.msra.mxu1 %v12230_v63  ;;  %4743 = vmatprep.mubr.f32.mxu0 %v13666_v41  ;;  %v13747_v45 = vpop.f32.mrb[22].mxu0 }
 0x135   : > { %v1554_v48 = vpop.f32.mrb[22].mxu1  ;;  %10154 = vmatprep.subr.bf16.mxu1 %v12231_v19  ;;  %v13750_v50 = vpop.f32.mrb[23].mxu0  ;;  %10630 = vmatpush3.bf16.msra.mxu0 %v12284_v29 }
 0x136   : > { %2191 = vrot.lane.b32.xlu1 %v1554_v48, %s12918_s8  ;;  %v13755_v58 = vpop.f32.mrb[23].mxu1  ;;  %10632 = vmatprep.subr.bf16.mxu0 %v12288_v1  ;;  %v12245_v1 = vld [vmem:[%s13218_s1 + $0x2e8] ss:$12 sps:$4 sm:$0xff]  }
 0x137   : > { %4744 = vmatmul.mubr.f32.gmra.mrb[78].mxu0 %v13662_v20 }
 0x138   : > { %10156 = vmatpush1.bf16.msra.mxu1 %v12233_v47  ;;  %4748 = vmatprep.mubr.f32.mxu0 %v13674_v56  ;;  %v1625_v60 = vpop.f32.mrb[24].mxu0 }
 0x139   : > { %v11953_v6 = vpack.i.bf16 %v1625_v60, %v13695_v28  ;;  %10158 = vmatprep.subr.bf16.mxu1 %v12234_v54  ;;  %v13762_v7 = vpop.f32.mrb[25].mxu0  ;;  %10634 = vmatpush3.bf16.msra.mxu0 %v12289_v55  ;;  %v12246_v55 = vld [vmem:[%s13218_s1 + $0x304] ss:$12 sps:$4 sm:$0xff]  }
 0x13a   : > { %v13766_v16 = vpop.f32.mrb[24].mxu1  ;;  %10636 = vmatprep.subr.bf16.mxu0 %v12293_v59  ;;  %v12309_v59 = vld [vmem:[%s13218_s1 + $0x3b0] ss:$12 sps:$4 sm:$0xff]  }
 0x13b   : > { %4749 = vmatmul.mubr.f32.gmra.mrb[80].mxu0 %v13670_v49  ;;  %11954 = vrot.lane.b32.xlu0 %v11953_v6, %s12918_s8  ;;  %v11983_v23 = vpack.i.bf16 %v13766_v16, %v13762_v7  ;;  %v13773_v28 = vpop.f32.mrb[25].mxu1 }
 0x13c   : > { %10160 = vmatpush1.bf16.msra.mxu1 %v12236_v62  ;;  %4753 = vmatprep.mubr.f32.mxu0 %v13680_v5  ;;  %v1631_v32 = vpop.f32.mrb[26].mxu0  ;;  %v12313_v62 = vld [vmem:[%s13218_s1 + $0x548] ss:$12 sps:$4 sm:$0xff]  }
 0x13d   : > { %10162 = vmatprep.subr.bf16.mxu1 %v12237_v11  ;;  %v11958_v37 = vpack.i.bf16 %v1631_v32, %v13706_v42  ;;  %v13779_v36 = vpop.f32.mrb[27].mxu0  ;;  %10638 = vmatpush3.bf16.msra.mxu0 %v12294_v12  ;;  %v12249_v32 = vld [vmem:[%s13218_s1 + $0x31c] ss:$12 sps:$4 sm:$0xff]  }
 0x13e   : > { %v13782_v4 = vpop.f32.mrb[26].mxu1  ;;  %10640 = vmatprep.subr.bf16.mxu0 %v12298_v21  ;;  %v12248_v21 = vld [vmem:[%s13218_s1 + $0x300] ss:$12 sps:$4 sm:$0xff]  }
 0x13f   : > { %4754 = vmatmul.mubr.f32.gmra.mrb[82].mxu0 %v13678_v61  ;;  %11959 = vrot.lane.b32.xlu1 %v11958_v37, %s12918_s8  ;;  %v11988_v17 = vpack.i.bf16 %v13782_v4, %v13779_v36  ;;  %v13789_v42 = vpop.f32.mrb[27].mxu1 }
 0x140   : > { %10164 = vmatpush1.bf16.msra.mxu1 %v12239_v30  ;;  %v1637_v26 = vpop.f32.mrb[28].mxu0 }
 0x141   : > { %10166 = vmatprep.subr.bf16.mxu1 %v12240_v38  ;;  %v11963_v31 = vpack.i.bf16 %v1637_v26, %v13716_v18  ;;  %v13793_v39 = vpop.f32.mrb[29].mxu0  ;;  %10642 = vmatpush3.bf16.msra.mxu0 %v12299_v43 }
 0x142   : > { %v1738_v63 = vpop.f32.mrb[28].mxu1  ;;  %10644 = vmatprep.subr.bf16.mxu0 %v12303_v9 }
 0x143   : > { %11964 = vrot.lane.b32.xlu0 %v11963_v31, %s12918_s8  ;;  %v11993_v19 = vpack.i.bf16 %v1738_v63, %v13793_v39  ;;  %v13800_v29 = vpop.f32.mrb[29].mxu1  ;;  %v12251_v31 = vld [vmem:[%s13218_s1 + $0x318] ss:$12 sps:$4 sm:$0xff]   ;;  %v12252_v39 = vld [vmem:[%s13218_s1 + $0x334] ss:$12 sps:$4 sm:$0xff]  }
 0x144   : > { %10168 = vmatpush1.bf16.msra.mxu1 %v12242_v22  ;;  %v1643_v18 = vpop.f32.mrb[30].mxu0  ;;  %v12018_v47 = vpack.i.bf16 %v13800_v29, %v13789_v42  ;;  %v12254_v63 = vld [vmem:[%s13218_s1 + $0x330] ss:$12 sps:$4 sm:$0xff]  }
 0x145   : > { %10170 = vmatprep.subr.bf16.mxu1 %v12243_v51  ;;  %v11968_v48 = vpack.i.bf16 %v1643_v18, %v13729_v52  ;;  %v13806_v54 = vpop.f32.mrb[31].mxu0  ;;  %10646 = vmatpush3.bf16.msra.mxu0 %v12304_v53 }
 0x146   : > { %v1744_v60 = vpop.f32.mrb[30].mxu1  ;;  %10648 = vmatprep.subr.bf16.mxu0 %v12308_v10 }
 0x147   : > { %11969 = vrot.lane.b32.xlu1 %v11968_v48, %s12918_s8  ;;  %v11998_v6 = vpack.i.bf16 %v1744_v60, %v13806_v54  ;;  %v13813_v11 = vpop.f32.mrb[31].mxu1 }
 0x148   : > { %10172 = vmatpush1.bf16.msra.mxu1 %v12245_v1  ;;  %v1649_v12 = vpop.f32.mrb[32].mxu0 }
 0x149   : > { %v11973_v52 = vpack.i.bf16 %v1649_v12, %v13742_v33  ;;  %v1651_v30 = vpop.f32.mrb[33].mxu0  ;;  %10174 = vmatprep.subr.bf16.mxu1 %v12246_v55  ;;  %10650 = vmatpush3.bf16.msra.mxu0 %v12309_v59  ;;  %v12261_v55 = vld [vmem:[%s13218_s1 + $0x37c] ss:$12 sps:$4 sm:$0xff]  }
 0x14a   : > { %v1750_v37 = vpop.f32.mrb[32].mxu1  ;;  %10652 = vmatprep.subr.bf16.mxu0 %v12313_v62 }
 0x14b   : > { %3927 = vmatmul.mubr.f32.vlgmr.msra.gmra.mrb[48].mxu1 %v13639_v8  ;;  %11974 = vrot.lane.b32.xlu0 %v11973_v52, %s12918_s8  ;;  %v12003_v38 = vpack.i.bf16 %v1750_v37, %v1651_v30  ;;  %v13820_v43 = vpop.f32.mrb[33].mxu1 }
 0x14c   : > { %3932 = vmatprep.mubr.f32.mxu1 %v13650_v40  ;;  %v1655_v9 = vpop.f32.mrb[34].mxu0  ;;  %10176 = vmatpush1.bf16.msra.mxu1 %v12248_v21  ;;  %v12028_v33 = vpack.i.bf16 %v13820_v43, %v13813_v11  ;;  %v12280_v43 = vld [vmem:[%s13218_s1 + $0x3f4] ss:$12 sps:$4 sm:$0xff]  }
 0x14d   : > { %v11978_v22 = vpack.i.bf16 %v1655_v9, %v13755_v58  ;;  %v1657_v26 = vpop.f32.mrb[35].mxu0  ;;  %10178 = vmatprep.subr.bf16.mxu1 %v12249_v32  ;;  %v12266_v32 = vld [vmem:[%s13218_s1 + $0x390] ss:$12 sps:$4 sm:$0xff]  }
 0x14e   : > { %v1756_v8 = vpop.f32.mrb[34].mxu1 }
 0x14f   : > { %3933 = vmatmul.mubr.f32.gmra.mrb[50].mxu1 %v13648_v35  ;;  %11984 = vrot.lane.b32.xlu0 %v11983_v23, %s12918_s8  ;;  %v12008_v40 = vpack.i.bf16 %v1756_v8, %v1657_v26  ;;  %v13833_v51 = vpop.f32.mrb[35].mxu1  ;;  %v12255_v35 = vld [vmem:[%s13218_s1 + $0x34c] ss:$12 sps:$4 sm:$0xff]   ;;  %v12257_v23 = vld [vmem:[%s13218_s1 + $0x348] ss:$12 sps:$4 sm:$0xff]  }
 0x150   : > { %3938 = vmatprep.mubr.f32.mxu1 %v13658_v3  ;;  %11979 = vrot.lane.b32.xlu1 %v11978_v22, %s12918_s8  ;;  %v1858_v58 = vpop.f32.mrb[36].mxu0 }
 0x151   : > { %10180 = vmatpush1.bf16.msra.mxu1 %v12251_v31  ;;  %v1860_v53 = vpop.f32.mrb[37].mxu0  ;;  %v12270_v31 = vld [vmem:[%s13218_s1 + $0x3c4] ss:$12 sps:$4 sm:$0xff]  }
 0x152   : > { %v12013_v10 = vpack.i.bf16 %v1860_v53, %v1858_v58  ;;  %10182 = vmatprep.subr.bf16.mxu1 %v12252_v39  ;;  %v13839_v1 = vpop.f32.mrb[36].mxu1 }
 0x153   : > { %3939 = vmatmul.mubr.f32.gmra.mrb[52].mxu1 %v13655_v57  ;;  %11994 = vrot.lane.b32.xlu0 %v11993_v19, %s12918_s8  ;;  %v13843_v7 = vpop.f32.mrb[37].mxu1  ;;  %v12258_v57 = vld [vmem:[%s13218_s1 + $0x364] ss:$12 sps:$4 sm:$0xff]  }
 0x154   : > { %3944 = vmatprep.mubr.f32.mxu1 %v13666_v41  ;;  %11989 = vrot.lane.b32.xlu1 %v11988_v17, %s12918_s8  ;;  %v1864_v3 = vpop.f32.mrb[38].mxu0  ;;  %v12053_v16 = vpack.i.bf16 %v13843_v7, %v13839_v1  ;;  %v12260_v17 = vld [vmem:[%s13218_s1 + $0x360] ss:$12 sps:$4 sm:$0xff]   ;;  %v12287_v7 = vld [vmem:[%s13218_s1 + $0x408] ss:$12 sps:$4 sm:$0xff]  }
 0x155   : > { %10184 = vmatpush1.bf16.msra.mxu1 %v12254_v63  ;;  %v1866_v18 = vpop.f32.mrb[39].mxu0  ;;  %v12272_v63 = vld [vmem:[%s13218_s1 + $0x3c0] ss:$12 sps:$4 sm:$0xff]  }
 0x156   : > { %10186 = vmatprep.subr.bf16.mxu1 %v12255_v35  ;;  %v12023_v19 = vpack.i.bf16 %v1866_v18, %v1864_v3  ;;  %v13854_v48 = vpop.f32.mrb[38].mxu1  ;;  %v12275_v35 = vld [vmem:[%s13218_s1 + $0x3dc] ss:$12 sps:$4 sm:$0xff]  }
 0x157   : > { %3945 = vmatmul.mubr.f32.gmra.mrb[54].mxu1 %v13662_v20  ;;  %12004 = vrot.lane.b32.xlu0 %v12003_v38, %s12918_s8  ;;  %v13858_v41 = vpop.f32.mrb[39].mxu1  ;;  %v12267_v38 = vld [vmem:[%s13218_s1 + $0x3ac] ss:$12 sps:$4 sm:$0xff]  }
 0x158   : > { %3950 = vmatprep.mubr.f32.mxu1 %v13674_v56  ;;  %11999 = vrot.lane.b32.xlu1 %v11998_v6, %s12918_s8  ;;  %v1870_v36 = vpop.f32.mrb[40].mxu0  ;;  %v12058_v4 = vpack.i.bf16 %v13858_v41, %v13854_v48  ;;  %v12263_v6 = vld [vmem:[%s13218_s1 + $0x378] ss:$12 sps:$4 sm:$0xff]   ;;  %v12295_v48 = vld [vmem:[%s13218_s1 + $0x43c] ss:$12 sps:$4 sm:$0xff]  }
 0x159   : > { %10188 = vmatpush1.bf16.msra.mxu1 %v12257_v23  ;;  %v1872_v54 = vpop.f32.mrb[41].mxu0  ;;  %v12277_v23 = vld [vmem:[%s13218_s1 + $0x3d8] ss:$12 sps:$4 sm:$0xff]  }
 0x15a   : > { %10190 = vmatprep.subr.bf16.mxu1 %v12258_v57  ;;  %v12033_v20 = vpack.i.bf16 %v1872_v54, %v1870_v36  ;;  %v13866_v59 = vpop.f32.mrb[40].mxu1  ;;  %v12285_v57 = vld [vmem:[%s13218_s1 + $0x40c] ss:$12 sps:$4 sm:$0xff]  }
 0x15b   : > { %3951 = vmatmul.mubr.f32.gmra.mrb[56].mxu1 %v13670_v49  ;;  %2141 = vrot.lane.b32.xlu0 %v13773_v28, %s12918_s8  ;;  %v13871_v56 = vpop.f32.mrb[41].mxu1  ;;  %v12264_v49 = vld [vmem:[%s13218_s1 + $0x394] ss:$12 sps:$4 sm:$0xff]  }
 0x15c   : > { %3956 = vmatprep.mubr.f32.mxu1 %v13680_v5  ;;  %12009 = vrot.lane.b32.xlu1 %v12008_v40, %s12918_s8  ;;  %v1876_v60 = vpop.f32.mrb[42].mxu0  ;;  %v12063_v62 = vpack.i.bf16 %v13871_v56, %v13866_v59  ;;  %v12302_v59 = vld [vmem:[%s13218_s1 + $0x450] ss:$12 sps:$4 sm:$0xff]   ;;  %v12305_v56 = vld [vmem:[%s13218_s1 + $0x46c] ss:$12 sps:$4 sm:$0xff]  }
 0x15d   : > { %10192 = vmatpush1.bf16.msra.mxu1 %v12260_v17  ;;  %v1878_v12 = vpop.f32.mrb[43].mxu0  ;;  %v12292_v17 = vld [vmem:[%s13218_s1 + $0x420] ss:$12 sps:$4 sm:$0xff]  }
 0x15e   : > { %10194 = vmatprep.subr.bf16.mxu1 %v12261_v55  ;;  %v12038_v21 = vpack.i.bf16 %v1878_v12, %v1876_v60  ;;  %v1977_v52 = vpop.f32.mrb[42].mxu1  ;;  %v12307_v60 = vld [vmem:[%s13218_s1 + $0x468] ss:$12 sps:$4 sm:$0xff]   ;;  %v12312_v12 = vld [vmem:[%s13218_s1 + $0x480] ss:$12 sps:$4 sm:$0xff]  }
 0x15f   : > { %3957 = vmatmul.mubr.f32.gmra.mrb[58].mxu1 %v13678_v61  ;;  %12019 = vrot.lane.b32.xlu0 %v12018_v47, %s12918_s8  ;;  %v1979_v5 = vpop.f32.mrb[43].mxu1  ;;  %v12269_v47 = vld [vmem:[%s13218_s1 + $0x3a8] ss:$12 sps:$4 sm:$0xff]  }
 0x160   : > { %12014 = vrot.lane.b32.xlu1 %v12013_v10, %s12919_s4  ;;  %v1882_v28 = vpop.f32.mrb[44].mxu0  ;;  %v12068_v30 = vpack.i.bf16 %v1979_v5, %v1977_v52  ;;  %v12315_v52 = vld [vmem:[%s13218_s1 + $0x49c] ss:$12 sps:$4 sm:$0xff]   ;;  %v12318_v5 = vld [vmem:[%s13218_s1 + $0x560] ss:$12 sps:$4 sm:$0xff]  }
 0x161   : > { %10196 = vmatpush1.bf16.msra.mxu1 %v12263_v6  ;;  %v1884_v37 = vpop.f32.mrb[45].mxu0 }
 0x162   : > { %10198 = vmatprep.subr.bf16.mxu1 %v12264_v49  ;;  %v12043_v9 = vpack.i.bf16 %v1884_v37, %v1882_v28  ;;  %v1983_v61 = vpop.f32.mrb[44].mxu1  ;;  %v12314_v49 = vld [vmem:[%s13218_s1 + $0x488] ss:$12 sps:$4 sm:$0xff]  }
 0x163   : > { %12034 = vrot.lane.b32.xlu0 %v12033_v20, %s12919_s4  ;;  %v1985_v22 = vpop.f32.mrb[45].mxu1  ;;  %v12300_v20 = vld [vmem:[%s13218_s1 + $0x454] ss:$12 sps:$4 sm:$0xff]  }
 0x164   : > { %12024 = vrot.lane.b32.xlu1 %v12023_v19, %s12919_s4  ;;  %v1888_v42 = vpop.f32.mrb[46].mxu0  ;;  %v12073_v29 = vpack.i.bf16 %v1985_v22, %v1983_v61  ;;  %v12290_v19 = vld [vmem:[%s13218_s1 + $0x424] ss:$12 sps:$4 sm:$0xff]   ;;  %v12320_v37 = vld [vmem:[%s13218_s1 + $0x4b4] ss:$12 sps:$4 sm:$0xff]  }
 0x165   : > { %10200 = vmatpush1.bf16.msra.mxu1 %v12266_v32  ;;  %v1890_v26 = vpop.f32.mrb[47].mxu0  ;;  %v12319_v32 = vld [vmem:[%s13218_s1 + $0x4a0] ss:$12 sps:$4 sm:$0xff]  }
 0x166   : > { %10202 = vmatprep.subr.bf16.mxu1 %v12267_v38  ;;  %v12048_v8 = vpack.i.bf16 %v1890_v26, %v1888_v42  ;;  %v1989_v39 = vpop.f32.mrb[46].mxu1  ;;  %v12323_v38 = vld [vmem:[%s13218_s1 + $0x578] ss:$12 sps:$4 sm:$0xff]   ;;  %v12328_v42 = vld [vmem:[%s13218_s1 + $0x590] ss:$12 sps:$4 sm:$0xff]  }
 0x167   : > { %12039 = vrot.lane.b32.xlu0 %v12038_v21, %s12919_s4  ;;  %v1991_v40 = vpop.f32.mrb[47].mxu1  ;;  %v12325_v22 = vld [vmem:[%s13218_s1 + $0x4cc] ss:$12 sps:$4 sm:$0xff]   ;;  %v12330_v26 = vld [vmem:[%s13218_s1 + $0x4e4] ss:$12 sps:$4 sm:$0xff]  }
 0x168   : > { %12029 = vrot.lane.b32.xlu1 %v12028_v33, %s12918_s8  ;;  %v2060_v58 = vpop.f32.mrb[48].mxu0  ;;  %v12078_v53 = vpack.i.bf16 %v1991_v40, %v1989_v39  ;;  %v12335_v40 = vld [vmem:[%s13218_s1 + $0x4fc] ss:$12 sps:$4 sm:$0xff]  }
 0x169   : > { %10204 = vmatpush1.bf16.msra.mxu1 %v12269_v47  ;;  %v2062_v10 = vpop.f32.mrb[49].mxu0 }
 0x16a   : > { %10206 = vmatprep.subr.bf16.mxu1 %v12270_v31  ;;  %v12333_v31 = vld [vmem:[%s13218_s1 + $0x5a8] ss:$12 sps:$4 sm:$0xff]  }
 0x16b   : > { %2201 = vrot.lane.b32.xlu0 %v13833_v51, %s12918_s8  ;;  %v12282_v51 = vld [vmem:[%s13218_s1 + $0x3f0] ss:$12 sps:$4 sm:$0xff]   ;;  %s12923_s8 = smov 111  }
 0x16c   : > { %12044 = vrot.lane.b32.xlu1 %v12043_v9, %s12919_s4  ;;  %v2066_v3 = vpop.f32.mrb[50].mxu0  ;;  %v12322_v9 = vld [vmem:[%s13218_s1 + $0x4b0] ss:$12 sps:$4 sm:$0xff]  }
 0x16d   : > { %10208 = vmatpush1.bf16.msra.mxu1 %v12272_v63  ;;  %v2068_v11 = vpop.f32.mrb[51].mxu0 }
 0x16e   : > { %10210 = vmatprep.subr.bf16.mxu1 %v12275_v35  ;;  %v12343_v35 = vld [vmem:[%s13218_s1 + $0x5d8] ss:$12 sps:$4 sm:$0xff]  }
 0x16f   : > { %12054 = vrot.lane.b32.xlu0 %v12053_v16, %s12919_s4 }
 0x170   : > { %12049 = vrot.lane.b32.xlu1 %v12048_v8, %s12919_s4  ;;  %v2072_v33 = vpop.f32.mrb[52].mxu0  ;;  %v12332_v8 = vld [vmem:[%s13218_s1 + $0x4e0] ss:$12 sps:$4 sm:$0xff]  }
 0x171   : > { %10212 = vmatpush1.bf16.msra.mxu1 %v12277_v23  ;;  %v2074_v18 = vpop.f32.mrb[53].mxu0  ;;  %v12345_v23 = vld [vmem:[%s13218_s1 + $0x52c] ss:$12 sps:$4 sm:$0xff]  }
 0x172   : > { %10214 = vmatprep.subr.bf16.mxu1 %v12280_v43 }
 0x173   : > { %12064 = vrot.lane.b32.xlu0 %v12063_v62, %s12919_s4  ;;  %v12310_v62 = vld [vmem:[%s13218_s1 + $0x484] ss:$12 sps:$4 sm:$0xff]  }
 0x174   : > { %12059 = vrot.lane.b32.xlu1 %v12058_v4, %s12919_s4  ;;  %v2078_v1 = vpop.f32.mrb[54].mxu0  ;;  %v12297_v4 = vld [vmem:[%s13218_s1 + $0x438] ss:$12 sps:$4 sm:$0xff]  }
 0x175   : > { %10216 = vmatpush1.bf16.msra.mxu1 %v12282_v51  ;;  %v2080_v16 = vpop.f32.mrb[55].mxu0 }
 0x176   : > { %10218 = vmatprep.subr.bf16.mxu1 %v12285_v57 }
 0x177   : > { %12074 = vrot.lane.b32.xlu0 %v12073_v29, %s12919_s4  ;;  %v12327_v29 = vld [vmem:[%s13218_s1 + $0x4c8] ss:$12 sps:$4 sm:$0xff]  }
 0x178   : > { %12069 = vrot.lane.b32.xlu1 %v12068_v30, %s12919_s4  ;;  %v2084_v36 = vpop.f32.mrb[56].mxu0  ;;  %v12317_v30 = vld [vmem:[%s13218_s1 + $0x498] ss:$12 sps:$4 sm:$0xff]  }
 0x179   : > { %10220 = vmatpush1.bf16.msra.mxu1 %v12287_v7  ;;  %v2086_v54 = vpop.f32.mrb[57].mxu0  ;;  %v12353_v7 = vld [vmem:[%s13218_s1 + $0x6c8] ss:$12 sps:$4 sm:$0xff]  }
 0x17a   : > { %10222 = vmatprep.subr.bf16.mxu1 %v12290_v19 }
 0x17b   : > { %2314 = vrot.lane.b32.xlu0 %v2060_v58, %s12919_s4  ;;  %v12338_v58 = vld [vmem:[%s13218_s1 + $0x5c0] ss:$12 sps:$4 sm:$0xff]  }
 0x17c   : > { %12079 = vrot.lane.b32.xlu1 %v12078_v53, %s12919_s4  ;;  %v2090_v41 = vpop.f32.mrb[58].mxu0  ;;  %v12337_v53 = vld [vmem:[%s13218_s1 + $0x4f8] ss:$12 sps:$4 sm:$0xff]  }
 0x17d   : > { %10224 = vmatpush1.bf16.msra.mxu1 %v12292_v17  ;;  %v2092_v55 = vpop.f32.mrb[59].mxu0  ;;  %v12354_v17 = vld [vmem:[%s13218_s1 + $0x608] ss:$12 sps:$4 sm:$0xff]  }
 0x17e   : > { %10226 = vmatprep.subr.bf16.mxu1 %v12295_v48  ;;  %v12355_v48 = vld [vmem:[%s13218_s1 + $0x55c] ss:$12 sps:$4 sm:$0xff]  }
 0x17f   : > { %2326 = vrot.lane.b32.xlu0 %v2066_v3, %s12919_s4  ;;  %v12344_v3 = vld [vmem:[%s13218_s1 + $0x518] ss:$12 sps:$4 sm:$0xff]  }
 0x180   : > { %2316 = vrot.lane.b32.xlu1 %v2062_v10, %s12919_s4  ;;  %v12340_v10 = vld [vmem:[%s13218_s1 + $0x514] ss:$12 sps:$4 sm:$0xff]  }
 0x181   : > { %10228 = vmatpush1.bf16.msra.mxu1 %v12297_v4 }
 0x182   : > { %10230 = vmatprep.subr.bf16.mxu1 %v12300_v20 }
 0x183   : > { %2338 = vrot.lane.b32.xlu0 %v2072_v33, %s12919_s4  ;;  %v12348_v33 = vld [vmem:[%s13218_s1 + $0x5f0] ss:$12 sps:$4 sm:$0xff]  }
 0x184   : > { %2328 = vrot.lane.b32.xlu1 %v2068_v11, %s12919_s4 }
 0x185   : > { %10232 = vmatpush1.bf16.msra.mxu1 %v12302_v59  ;;  %v12358_v59 = vld [vmem:[%s13218_s1 + $0x6e0] ss:$12 sps:$4 sm:$0xff]  }
 0x186   : > { %10234 = vmatprep.subr.bf16.mxu1 %v12305_v56  ;;  %v12357_v56 = vld [vmem:[%s13218_s1 + $0x558] ss:$12 sps:$4 sm:$0xff]  }
 0x187   : > { %2350 = vrot.lane.b32.xlu0 %v2078_v1, %s12919_s4  ;;  %v12350_v1 = vld [vmem:[%s13218_s1 + $0x544] ss:$12 sps:$4 sm:$0xff]  }
 0x188   : > { %2340 = vrot.lane.b32.xlu1 %v2074_v18, %s12919_s4  ;;  %v12349_v18 = vld [vmem:[%s13218_s1 + $0x530] ss:$12 sps:$4 sm:$0xff]  }
 0x189   : > { %10236 = vmatpush1.bf16.msra.mxu1 %v12307_v60 }
 0x18a   : > { %10238 = vmatprep.subr.bf16.mxu1 %v12310_v62  ;;  %v12359_v62 = vld [vmem:[%s13218_s1 + $0x620] ss:$12 sps:$4 sm:$0xff]  }
 0x18b   : > { %2362 = vrot.lane.b32.xlu0 %v2084_v36, %s12919_s4  ;;  %v12352_v36 = vld [vmem:[%s13218_s1 + $0x540] ss:$12 sps:$4 sm:$0xff]  }
 0x18c   : > { %2352 = vrot.lane.b32.xlu1 %v2080_v16, %s12919_s4 }
 0x18f   : > { %2374 = vrot.lane.b32.xlu0 %v2090_v41, %s12919_s4 }
 0x190   : > { %2364 = vrot.lane.b32.xlu1 %v2086_v54, %s12919_s4 }
 0x194   : > { %v13939_v6 = vpop.permute.xlu0 %2131  ;;  %2376 = vrot.lane.b32.xlu1 %v2092_v55, %s12919_s4  ;;  %s15617_s4 = sld [smem:[#allocation10_spill]] }
 0x195   : > { %v2439_v21 = vsel %vm2203_vm4, %v13692_v25, %v13939_v6 }
 0x196   : > { %4027 = vmatprep.mubr.f32.mxu1 %v2439_v21  ;;  %4823 = vmatprep.mubr.f32.mxu0 %v2439_v21 }
 0x197   : > { %4028 = vmatmul.mubr.f32.vlgmr.msra.gmra.mrb[48].mxu1 %v13686_v14  ;;  %4824 = vmatmul.mubr.f32.vlgmr.msra.gmra.mrb[84].mxu0 %v13686_v14 }
 0x198   : > { %10240 = vmatpush1.bf16.msra.mxu1 %v12312_v12  ;;  %10654 = vmatpush3.bf16.msra.mxu0 %v12314_v49  ;;  %v13951_v28 = vpop.permute.xlu0 %2143  ;;  %v12360_v12 = vld [vmem:[%s13218_s1 + $0x574] ss:$12 sps:$4 sm:$0xff]  }
 0x199   : > { %v2440_v25 = vsel %vm2203_vm4, %v13702_v24, %v13951_v28  ;;  %10242 = vmatprep.subr.bf16.mxu1 %v12315_v52  ;;  %10656 = vmatprep.subr.bf16.mxu0 %v12318_v5  ;;  %v12324_v24 = vld [vmem:[%s13218_s1 + $0x4b8] ss:$12 sps:$4 sm:$0xff]  }
 0x19a   : > { %4033 = vmatprep.mubr.f32.mxu1 %v2440_v25  ;;  %4828 = vmatprep.mubr.f32.mxu0 %v2440_v25  ;;  %v12363_v5 = vld [vmem:[%s13218_s1 + $0x6f8] ss:$12 sps:$4 sm:$0xff]  }
 0x19b   : > { %4034 = vmatmul.mubr.f32.gmra.mrb[50].mxu1 %v13699_v34  ;;  %4829 = vmatmul.mubr.f32.gmra.mrb[86].mxu0 %v13699_v34 }
 0x19c   : > { %10244 = vmatpush1.bf16.msra.mxu1 %v12317_v30  ;;  %10658 = vmatpush3.bf16.msra.mxu0 %v12319_v32  ;;  %v13962_v14 = vpop.permute.xlu1 %2155  ;;  %v12364_v32 = vld [vmem:[%s13218_s1 + $0x638] ss:$12 sps:$4 sm:$0xff]  }
 0x19d   : > { %v2441_v61 = vsel %vm2203_vm4, %v13712_v13, %v13962_v14  ;;  %10246 = vmatprep.subr.bf16.mxu1 %v12320_v37  ;;  %10660 = vmatprep.subr.bf16.mxu0 %v12323_v38  ;;  %v12329_v13 = vld [vmem:[%s13218_s1 + $0x4d0] ss:$12 sps:$4 sm:$0xff]   ;;  %v12365_v37 = vld [vmem:[%s13218_s1 + $0x58c] ss:$12 sps:$4 sm:$0xff]  }
 0x19e   : > { %4039 = vmatprep.mubr.f32.mxu1 %v2441_v61  ;;  %4833 = vmatprep.mubr.f32.mxu0 %v2441_v61  ;;  %v12367_v61 = vld [vmem:[%s13218_s1 + $0x588] ss:$12 sps:$4 sm:$0xff]  }
 0x19f   : > { %4040 = vmatmul.mubr.f32.gmra.mrb[52].mxu1 %v13709_v46  ;;  %4834 = vmatmul.mubr.f32.gmra.mrb[88].mxu0 %v13709_v46 }
 0x1a0   : > { %10248 = vmatpush1.bf16.msra.mxu1 %v12322_v9  ;;  %10662 = vmatpush3.bf16.msra.mxu0 %v12324_v24  ;;  %v13973_v34 = vpop.permute.xlu1 %2167  ;;  %v12368_v24 = vld [vmem:[%s13218_s1 + $0x710] ss:$12 sps:$4 sm:$0xff]  }
 0x1a1   : > { %v2442_v47 = vsel %vm2203_vm4, %v13725_v44, %v13973_v34  ;;  %10250 = vmatprep.subr.bf16.mxu1 %v12325_v22  ;;  %10664 = vmatprep.subr.bf16.mxu0 %v12328_v42  ;;  %v12334_v44 = vld [vmem:[%s13218_s1 + $0x4e8] ss:$12 sps:$4 sm:$0xff]   ;;  %v12369_v42 = vld [vmem:[%s13218_s1 + $0x650] ss:$12 sps:$4 sm:$0xff]  }
 0x1a2   : > { %4045 = vmatprep.mubr.f32.mxu1 %v2442_v47  ;;  %4838 = vmatprep.mubr.f32.mxu0 %v2442_v47 }
 0x1a3   : > { %4046 = vmatmul.mubr.f32.gmra.mrb[54].mxu1 %v13722_v27  ;;  %4839 = vmatmul.mubr.f32.gmra.mrb[90].mxu0 %v13722_v27 }
 0x1a4   : > { %10252 = vmatpush1.bf16.msra.mxu1 %v12327_v29  ;;  %10666 = vmatpush3.bf16.msra.mxu0 %v12329_v13  ;;  %v13984_v46 = vpop.permute.xlu0 %2179  ;;  %v12370_v13 = vld [vmem:[%s13218_s1 + $0x5a4] ss:$12 sps:$4 sm:$0xff]  }
 0x1a5   : > { %v2443_v39 = vsel %vm2203_vm4, %v13737_v15, %v13984_v46  ;;  %10254 = vmatprep.subr.bf16.mxu1 %v12330_v26  ;;  %10668 = vmatprep.subr.bf16.mxu0 %v12333_v31  ;;  %v12339_v15 = vld [vmem:[%s13218_s1 + $0x500] ss:$12 sps:$4 sm:$0xff]  }
 0x1a6   : > { %4051 = vmatprep.mubr.f32.mxu1 %v2443_v39  ;;  %4843 = vmatprep.mubr.f32.mxu0 %v2443_v39 }
 0x1a7   : > { %4052 = vmatmul.mubr.f32.gmra.mrb[56].mxu1 %v13735_v2  ;;  %4844 = vmatmul.mubr.f32.gmra.mrb[92].mxu0 %v13735_v2  ;;  %v12342_v2 = vld [vmem:[%s13218_s1 + $0x510] ss:$12 sps:$4 sm:$0xff]  }
 0x1a8   : > { %10256 = vmatpush1.bf16.msra.mxu1 %v12332_v8  ;;  %10670 = vmatpush3.bf16.msra.mxu0 %v12334_v44  ;;  %v13995_v27 = vpop.permute.xlu1 %2191  ;;  %v12372_v44 = vld [vmem:[%s13218_s1 + $0x5a0] ss:$12 sps:$4 sm:$0xff]  }
 0x1a9   : > { %v2444_v63 = vsel %vm2203_vm4, %v13750_v50, %v13995_v27  ;;  %10258 = vmatprep.subr.bf16.mxu1 %v12335_v40  ;;  %10672 = vmatprep.subr.bf16.mxu0 %v12338_v58  ;;  %v12374_v40 = vld [vmem:[%s13218_s1 + $0x668] ss:$12 sps:$4 sm:$0xff]  }
 0x1aa   : > { %4057 = vmatprep.mubr.f32.mxu1 %v2444_v63  ;;  %4848 = vmatprep.mubr.f32.mxu0 %v2444_v63  ;;  %v12378_v63 = vld [vmem:[%s13218_s1 + $0x740] ss:$12 sps:$4 sm:$0xff]  }
 0x1ab   : > { %4058 = vmatmul.mubr.f32.gmra.mrb[58].mxu1 %v13747_v45  ;;  %4849 = vmatmul.mubr.f32.gmra.mrb[94].mxu0 %v13747_v45  ;;  %v12347_v45 = vld [vmem:[%s13218_s1 + $0x528] ss:$12 sps:$4 sm:$0xff]  }
 0x1ac   : > { %10260 = vmatpush1.bf16.msra.mxu1 %v12337_v53  ;;  %10674 = vmatpush3.bf16.msra.mxu0 %v12339_v15  ;;  %v12375_v53 = vld [vmem:[%s13218_s1 + $0x5bc] ss:$12 sps:$4 sm:$0xff]  }
 0x1ad   : > { %10262 = vmatprep.subr.bf16.mxu1 %v12340_v10  ;;  %10676 = vmatprep.subr.bf16.mxu0 %v12343_v35  ;;  %v14008_v50 = vpop.permute.xlu0 %11954 }
 0x1ae   : > { %v11957_v11 = vunpack.i.h.bf16 %v14008_v50  ;;  %v11956_v43 = vunpack.i.l.bf16 %v14008_v50  ;;  %v12397_v50 = vld [vmem:[%s13218_s1 + $0x618] ss:$12 sps:$4 sm:$0xff]  }
 0x1b0   : > { %10264 = vmatpush1.bf16.msra.mxu1 %v12342_v2  ;;  %10678 = vmatpush3.bf16.msra.mxu0 %v12344_v3  ;;  %v2205_v51 = vsel %vm2203_vm4, %v11956_v43, %v11957_v11  ;;  %v14032_v41 = vsel %vm2203_vm4, %v13939_v6, %v11956_v43  ;;  %v12379_v2 = vld [vmem:[%s13218_s1 + $0x680] ss:$12 sps:$4 sm:$0xff]   ;;  %v12383_v43 = vld [vmem:[%s13218_s1 + $0x758] ss:$12 sps:$4 sm:$0xff]  }
 0x1b1   : > { %10266 = vmatprep.subr.bf16.mxu1 %v12345_v23  ;;  %4128 = vmatprep.mubr.f32.mxu1 %v2205_v51  ;;  %v14019_v57 = vpop.permute.xlu1 %11959  ;;  %v12380_v23 = vld [vmem:[%s13218_s1 + $0x5d4] ss:$12 sps:$4 sm:$0xff]  }
 0x1b2   : > { %10680 = vmatprep.subr.bf16.mxu0 %v12348_v33  ;;  %4918 = vmatprep.mubr.f32.mxu0 %v2205_v51  ;;  %v11962_v16 = vunpack.i.h.bf16 %v14019_v57  ;;  %v11961_v19 = vunpack.i.l.bf16 %v14019_v57  ;;  %v12384_v51 = vld [vmem:[%s13218_s1 + $0x698] ss:$12 sps:$4 sm:$0xff]   ;;  %v12402_v57 = vld [vmem:[%s13218_s1 + $0x630] ss:$12 sps:$4 sm:$0xff]  }
 0x1b4   : > { %10268 = vmatpush1.bf16.msra.mxu1 %v12347_v45  ;;  %10682 = vmatpush3.bf16.msra.mxu0 %v12349_v18  ;;  %v14037_v4 = vsel %vm2203_vm4, %v11961_v19, %v11962_v16  ;;  %v14046_v60 = vsel %vm2203_vm4, %v13951_v28, %v11961_v19  ;;  %v12362_v28 = vld [vmem:[%s13218_s1 + $0x570] ss:$12 sps:$4 sm:$0xff]   ;;  %v12385_v18 = vld [vmem:[%s13218_s1 + $0x5ec] ss:$12 sps:$4 sm:$0xff]   ;;  %v12387_v19 = vld [vmem:[%s13218_s1 + $0x5e8] ss:$12 sps:$4 sm:$0xff]  }
 0x1b5   : > { %10270 = vmatprep.subr.bf16.mxu1 %v12350_v1  ;;  %10684 = vmatprep.subr.bf16.mxu0 %v12353_v7  ;;  %v14027_v54 = vpop.permute.xlu0 %11964  ;;  %v12382_v45 = vld [vmem:[%s13218_s1 + $0x5d0] ss:$12 sps:$4 sm:$0xff]  }
 0x1b6   : > { %v11967_v55 = vunpack.i.h.bf16 %v14027_v54  ;;  %v11966_v20 = vunpack.i.l.bf16 %v14027_v54  ;;  %v12388_v1 = vld [vmem:[%s13218_s1 + $0x770] ss:$12 sps:$4 sm:$0xff]  }
 0x1b7   : > { %4919 = vmatmul.mubr.f32.vlgmr.msra.gmra.mrb[96].mxu0 %v14032_v41 }
 0x1b8   : > { %10272 = vmatpush1.bf16.msra.mxu1 %v12352_v36  ;;  %10686 = vmatpush3.bf16.msra.mxu0 %v12354_v17  ;;  %v14056_v49 = vsel %vm2203_vm4, %v11966_v20, %v11967_v55  ;;  %v14065_v30 = vsel %vm2203_vm4, %v13962_v14, %v11966_v20  ;;  %v12389_v36 = vld [vmem:[%s13218_s1 + $0x6b0] ss:$12 sps:$4 sm:$0xff]   ;;  %v12393_v20 = vld [vmem:[%s13218_s1 + $0x848] ss:$12 sps:$4 sm:$0xff]  }
 0x1b9   : > { %4923 = vmatprep.mubr.f32.mxu0 %v14037_v4  ;;  %10274 = vmatprep.subr.bf16.mxu1 %v12355_v48  ;;  %v14050_v6 = vpop.permute.xlu1 %11969  ;;  %v12390_v48 = vld [vmem:[%s13218_s1 + $0x604] ss:$12 sps:$4 sm:$0xff]  }
 0x1ba   : > { %10688 = vmatprep.subr.bf16.mxu0 %v12358_v59  ;;  %v11972_v21 = vunpack.i.h.bf16 %v14050_v6  ;;  %v11971_v52 = vunpack.i.l.bf16 %v14050_v6 }
 0x1bb   : > { %4924 = vmatmul.mubr.f32.gmra.mrb[98].mxu0 %v14046_v60 }
 0x1bc   : > { %10276 = vmatpush1.bf16.msra.mxu1 %v12357_v56  ;;  %10690 = vmatpush3.bf16.msra.mxu0 %v12359_v62  ;;  %v14077_v14 = vsel %vm2203_vm4, %v11971_v52, %v11972_v21  ;;  %v14084_v22 = vsel %vm2203_vm4, %v13973_v34, %v11971_v52  ;;  %v12373_v34 = vld [vmem:[%s13218_s1 + $0x728] ss:$12 sps:$4 sm:$0xff]  }
 0x1bd   : > { %4928 = vmatprep.mubr.f32.mxu0 %v14056_v49  ;;  %10278 = vmatprep.subr.bf16.mxu1 %v12360_v12  ;;  %v14069_v25 = vpop.permute.xlu0 %11974  ;;  %v12392_v12 = vld [vmem:[%s13218_s1 + $0x600] ss:$12 sps:$4 sm:$0xff]   ;;  %v12394_v52 = vld [vmem:[%s13218_s1 + $0x788] ss:$12 sps:$4 sm:$0xff]  }
 0x1be   : > { %10692 = vmatprep.subr.bf16.mxu0 %v12363_v5  ;;  %v11977_v38 = vunpack.i.h.bf16 %v14069_v25  ;;  %v11976_v9 = vunpack.i.l.bf16 %v14069_v25 }
 0x1bf   : > { %4929 = vmatmul.mubr.f32.gmra.mrb[100].mxu0 %v14065_v30 }
 0x1c0   : > { %10280 = vmatpush1.bf16.msra.mxu1 %v12362_v28  ;;  %10694 = vmatpush3.bf16.msra.mxu0 %v12364_v32  ;;  %v14096_v26 = vsel %vm2203_vm4, %v11976_v9, %v11977_v38  ;;  %v14105_v39 = vsel %vm2203_vm4, %v13984_v46, %v11976_v9  ;;  %v12377_v46 = vld [vmem:[%s13218_s1 + $0x5b8] ss:$12 sps:$4 sm:$0xff]   ;;  %v12395_v9 = vld [vmem:[%s13218_s1 + $0x61c] ss:$12 sps:$4 sm:$0xff]  }
 0x1c1   : > { %4933 = vmatprep.mubr.f32.mxu0 %v14077_v14  ;;  %10282 = vmatprep.subr.bf16.mxu1 %v12365_v37  ;;  %v14088_v29 = vpop.permute.xlu0 %11984 }
 0x1c2   : > { %10696 = vmatprep.subr.bf16.mxu0 %v12368_v24  ;;  %v14091_v47 = vpop.permute.xlu1 %11979  ;;  %v11987_v10 = vunpack.i.h.bf16 %v14088_v29  ;;  %v11986_v3 = vunpack.i.l.bf16 %v14088_v29  ;;  %v12398_v24 = vld [vmem:[%s13218_s1 + $0x860] ss:$12 sps:$4 sm:$0xff]  }
 0x1c3   : > { %4934 = vmatmul.mubr.f32.gmra.mrb[102].mxu0 %v14084_v22  ;;  %v11982_v31 = vunpack.i.h.bf16 %v14091_v47  ;;  %v11981_v8 = vunpack.i.l.bf16 %v14091_v47 }
 0x1c4   : > { %10284 = vmatpush1.bf16.msra.mxu1 %v12367_v61  ;;  %10698 = vmatpush3.bf16.msra.mxu0 %v12369_v42  ;;  %v14163_v32 = vsel %vm2203_vm4, %v11957_v11, %v11986_v3  ;;  %v12399_v42 = vld [vmem:[%s13218_s1 + $0x7a0] ss:$12 sps:$4 sm:$0xff]  }
 0x1c5   : > { %4938 = vmatprep.mubr.f32.mxu0 %v14096_v26  ;;  %10286 = vmatprep.subr.bf16.mxu1 %v12370_v13  ;;  %v14109_v58 = vpop.permute.xlu0 %11994  ;;  %v14115_v15 = vsel %vm2203_vm4, %v11981_v8, %v11982_v31  ;;  %v14123_v35 = vsel %vm2203_vm4, %v13995_v27, %v11981_v8  ;;  %v14136_v27 = vsel %vm2203_vm4, %v11986_v3, %v11987_v10  ;;  %v12400_v8 = vld [vmem:[%s13218_s1 + $0x634] ss:$12 sps:$4 sm:$0xff]  }
 0x1c6   : > { %10700 = vmatprep.subr.bf16.mxu0 %v12373_v34  ;;  %v14147_v17 = vpop.permute.xlu1 %11989  ;;  %v11997_v28 = vunpack.i.h.bf16 %v14109_v58  ;;  %v11996_v61 = vunpack.i.l.bf16 %v14109_v58  ;;  %v12443_v58 = vld [vmem:[%s13218_s1 + $0x9f8] ss:$12 sps:$4 sm:$0xff]  }
 0x1c7   : > { %4939 = vmatmul.mubr.f32.gmra.mrb[104].mxu0 %v14105_v39  ;;  %v11992_v56 = vunpack.i.h.bf16 %v14147_v17  ;;  %v11991_v62 = vunpack.i.l.bf16 %v14147_v17 }
 0x1c8   : > { %10288 = vmatpush1.bf16.msra.mxu1 %v12372_v44  ;;  %10702 = vmatpush3.bf16.msra.mxu0 %v12374_v40  ;;  %v12403_v44 = vld [vmem:[%s13218_s1 + $0x878] ss:$12 sps:$4 sm:$0xff]  }
 0x1c9   : > { %4943 = vmatprep.mubr.f32.mxu0 %v14115_v15  ;;  %10290 = vmatprep.subr.bf16.mxu1 %v12375_v53  ;;  %v14130_v33 = vpop.permute.xlu0 %12004  ;;  %v14168_v37 = vsel %vm2203_vm4, %v11991_v62, %v11992_v56  ;;  %v14187_v34 = vsel %vm2203_vm4, %v11962_v16, %v11991_v62  ;;  %v12404_v16 = vld [vmem:[%s13218_s1 + $0x7b8] ss:$12 sps:$4 sm:$0xff]  }
 0x1ca   : > { %10704 = vmatprep.subr.bf16.mxu0 %v12378_v63  ;;  %v14177_v11 = vpop.permute.xlu1 %11999  ;;  %v12007_v63 = vunpack.i.h.bf16 %v14130_v33  ;;  %v12006_v54 = vunpack.i.l.bf16 %v14130_v33 }
 0x1cb   : > { %4944 = vmatmul.mubr.f32.gmra.mrb[106].mxu0 %v14123_v35  ;;  %v12001_v40 = vunpack.i.l.bf16 %v14177_v11 }
 0x1cc   : > { %10292 = vmatpush1.bf16.msra.mxu1 %v12377_v46  ;;  %10706 = vmatpush3.bf16.msra.mxu0 %v12379_v2  ;;  %v12405_v46 = vld [vmem:[%s13218_s1 + $0x64c] ss:$12 sps:$4 sm:$0xff]   ;;  %v12408_v2 = vld [vmem:[%s13218_s1 + $0x890] ss:$12 sps:$4 sm:$0xff]  }
 0x1cd   : > { %10294 = vmatprep.subr.bf16.mxu1 %v12380_v23  ;;  %10708 = vmatprep.subr.bf16.mxu0 %v12383_v43  ;;  %v14142_v7 = vpop.permute.xlu0 %2141  ;;  %v12407_v43 = vld [vmem:[%s13218_s1 + $0x648] ss:$12 sps:$4 sm:$0xff]  }
 0x1ce   : > { %5013 = vmatprep.mubr.f32.mxu0 %v14136_v27 }
 0x1d0   : > { %10296 = vmatpush1.bf16.msra.mxu1 %v12382_v45  ;;  %10710 = vmatpush3.bf16.msra.mxu0 %v12384_v51  ;;  %v12409_v51 = vld [vmem:[%s13218_s1 + $0x7d0] ss:$12 sps:$4 sm:$0xff]  }
 0x1d1   : > { %10298 = vmatprep.subr.bf16.mxu1 %v12385_v18  ;;  %10712 = vmatprep.subr.bf16.mxu0 %v12388_v1  ;;  %v14151_v59 = vpop.permute.xlu0 %12019  ;;  %v14235_v1 = vsel %vm2203_vm4, %v11972_v21, %v12001_v40  ;;  %v12412_v21 = vld [vmem:[%s13218_s1 + $0x660] ss:$12 sps:$4 sm:$0xff]  }
 0x1d4   : > { %10300 = vmatpush1.bf16.msra.mxu1 %v12387_v19  ;;  %10714 = vmatpush3.bf16.msra.mxu0 %v12389_v36  ;;  %v12410_v19 = vld [vmem:[%s13218_s1 + $0x664] ss:$12 sps:$4 sm:$0xff]   ;;  %v12413_v36 = vld [vmem:[%s13218_s1 + $0x8a8] ss:$12 sps:$4 sm:$0xff]  }
 0x1d5   : > { %10302 = vmatprep.subr.bf16.mxu1 %v12390_v48  ;;  %10716 = vmatprep.subr.bf16.mxu0 %v12393_v20  ;;  %v14157_v5 = vpop.permute.xlu0 %12034 }
 0x1d7   : > { %4129 = vmatmul.mubr.f32.vlgmr.msra.gmra.mrb[48].mxu1 %v14032_v41  ;;  %5014 = vmatmul.mubr.f32.vlgmr.msra.gmra.mrb[108].mxu0 %v14163_v32  ;;  %v12002_v41 = vunpack.i.h.bf16 %v14177_v11 }
 0x1d8   : > { %4134 = vmatprep.mubr.f32.mxu1 %v14037_v4  ;;  %10304 = vmatpush1.bf16.msra.mxu1 %v12392_v12  ;;  %v14192_v4 = vsel %vm2203_vm4, %v11996_v61, %v11997_v28  ;;  %v12414_v12 = vld [vmem:[%s13218_s1 + $0x7e8] ss:$12 sps:$4 sm:$0xff]  }
 0x1d9   : > { %10718 = vmatpush3.bf16.msra.mxu0 %v12394_v52  ;;  %5018 = vmatprep.mubr.f32.mxu0 %v14168_v37  ;;  %v14181_v13 = vpop.permute.xlu0 %12039 }
 0x1da   : > { %10306 = vmatprep.subr.bf16.mxu1 %v12395_v9  ;;  %10720 = vmatprep.subr.bf16.mxu0 %v12398_v24  ;;  %v14260_v9 = vsel %vm2203_vm4, %v11977_v38, %v12006_v54  ;;  %v12415_v24 = vld [vmem:[%s13218_s1 + $0x67c] ss:$12 sps:$4 sm:$0xff]   ;;  %v12417_v38 = vld [vmem:[%s13218_s1 + $0x678] ss:$12 sps:$4 sm:$0xff]  }
 0x1db   : > { %4135 = vmatmul.mubr.f32.gmra.mrb[50].mxu1 %v14046_v60  ;;  %5019 = vmatmul.mubr.f32.gmra.mrb[110].mxu0 %v14187_v34  ;;  %v14209_v60 = vsel %vm2203_vm4, %v11967_v55, %v11996_v61  ;;  %v14221_v55 = vpop.permute.xlu1 %12009  ;;  %v12418_v61 = vld [vmem:[%s13218_s1 + $0x8c0] ss:$12 sps:$4 sm:$0xff]  }
 0x1dc   : > { %4140 = vmatprep.mubr.f32.mxu1 %v14056_v49  ;;  %10308 = vmatpush1.bf16.msra.mxu1 %v12397_v50  ;;  %v14214_v49 = vsel %vm2203_vm4, %v12001_v40, %v12002_v41  ;;  %v12012_v18 = vunpack.i.h.bf16 %v14221_v55  ;;  %v12011_v6 = vunpack.i.l.bf16 %v14221_v55  ;;  %v12419_v40 = vld [vmem:[%s13218_s1 + $0x800] ss:$12 sps:$4 sm:$0xff]  }
 0x1dd   : > { %10722 = vmatpush3.bf16.msra.mxu0 %v12399_v42  ;;  %5023 = vmatprep.mubr.f32.mxu0 %v14192_v4  ;;  %v14203_v53 = vpop.permute.xlu0 %2201 }
 0x1de   : > { %10310 = vmatprep.subr.bf16.mxu1 %v12400_v8  ;;  %10724 = vmatprep.subr.bf16.mxu0 %v12403_v44  ;;  %v9207_v3 = vpop.f32.mrb[60].mxu0 }
 0x1df   : > { %4141 = vmatmul.mubr.f32.gmra.mrb[52].mxu1 %v14065_v30  ;;  %5024 = vmatmul.mubr.f32.gmra.mrb[112].mxu0 %v14209_v60  ;;  %v9208_v23 = vpop.f32.mrb[61].mxu0 }
 0x1e0   : > { %4146 = vmatprep.mubr.f32.mxu1 %v14077_v14  ;;  %10312 = vmatpush1.bf16.msra.mxu1 %v12402_v57  ;;  %v14225_v45 = vadd.f32 %v9208_v23, %v9207_v3  ;;  %v14240_v14 = vsel %vm2203_vm4, %v12006_v54, %v12007_v63  ;;  %v12420_v57 = vld [vmem:[%s13218_s1 + $0x694] ss:$12 sps:$4 sm:$0xff]   ;;  %v12425_v54 = vld [vmem:[%s13218_s1 + $0x6ac] ss:$12 sps:$4 sm:$0xff]  }
 0x1e1   : > { %10726 = vmatpush3.bf16.msra.mxu0 %v12404_v16  ;;  %5028 = vmatprep.mubr.f32.mxu0 %v14214_v49  ;;  %v14229_v30 = vpop.permute.xlu0 %12054 }
 0x1e2   : > { %10314 = vmatprep.subr.bf16.mxu1 %v12405_v46  ;;  %10728 = vmatprep.subr.bf16.mxu0 %v12408_v2  ;;  %v9210_v48 = vpop.f32.mrb[62].mxu0  ;;  %v12057_v23 = vunpack.i.h.bf16 %v14229_v30 }
 0x1e3   : > { %4147 = vmatmul.mubr.f32.gmra.mrb[54].mxu1 %v14084_v22  ;;  %5029 = vmatmul.mubr.f32.gmra.mrb[114].mxu0 %v14235_v1  ;;  %v9211_v20 = vpop.f32.mrb[63].mxu0  ;;  %v14255_v22 = vpop.permute.xlu1 %12014 }
 0x1e4   : > { %4152 = vmatprep.mubr.f32.mxu1 %v14096_v26  ;;  %10316 = vmatpush1.bf16.msra.mxu1 %v12407_v43  ;;  %v14249_v62 = vadd.f32 %v9211_v20, %v9210_v48  ;;  %v14265_v26 = vsel %vm2203_vm4, %v12011_v6, %v12012_v18  ;;  %v12017_v42 = vunpack.i.h.bf16 %v14255_v22  ;;  %v12016_v44 = vunpack.i.l.bf16 %v14255_v22 }
 0x1e5   : > { %10730 = vmatpush3.bf16.msra.mxu0 %v12409_v51  ;;  %5033 = vmatprep.mubr.f32.mxu0 %v14240_v14  ;;  %v14253_v52 = vpop.permute.xlu0 %12064  ;;  %v12428_v51 = vld [vmem:[%s13218_s1 + $0x8f0] ss:$12 sps:$4 sm:$0xff]   ;;  %v3723_v20 = vlaneseq }
 0x1e6   : > { %10318 = vmatprep.subr.bf16.mxu1 %v12410_v19  ;;  %10732 = vmatprep.subr.bf16.mxu0 %v12413_v36  ;;  %v9213_v50 = vpop.f32.mrb[64].mxu0  ;;  %v14295_v2 = vsel %vm2378_vm5, %v12016_v44, %v12017_v42 }
 0x1e7   : > { %4153 = vmatmul.mubr.f32.gmra.mrb[56].mxu1 %v14105_v39  ;;  %5034 = vmatmul.mubr.f32.gmra.mrb[116].mxu0 %v14260_v9  ;;  %v9214_v25 = vpop.f32.mrb[65].mxu0  ;;  %v14285_v39 = vsel %vm2203_vm4, %v11982_v31, %v12011_v6  ;;  %v12422_v31 = vld [vmem:[%s13218_s1 + $0x690] ss:$12 sps:$4 sm:$0xff]   ;;  %v14314_v36 = vpop.permute.xlu1 %12024  ;;  %v12427_v6 = vld [vmem:[%s13218_s1 + $0x6a8] ss:$12 sps:$4 sm:$0xff]  }
 0x1e8   : > { %4158 = vmatprep.mubr.f32.mxu1 %v14115_v15  ;;  %10320 = vmatpush1.bf16.msra.mxu1 %v12412_v21  ;;  %v14274_v8 = vadd.f32 %v9214_v25, %v9213_v50  ;;  %v12423_v15 = vld [vmem:[%s13218_s1 + $0x8d8] ss:$12 sps:$4 sm:$0xff]   ;;  %v12027_v50 = vunpack.i.h.bf16 %v14314_v36  ;;  %v12026_v25 = vunpack.i.l.bf16 %v14314_v36 }
 0x1e9   : > { %10734 = vmatpush3.bf16.msra.mxu0 %v12414_v12  ;;  %5038 = vmatprep.mubr.f32.mxu0 %v14265_v26  ;;  %v14280_v16 = vpop.permute.xlu0 %12074  ;;  %v12429_v12 = vld [vmem:[%s13218_s1 + $0x830] ss:$12 sps:$4 sm:$0xff]  }
 0x1ea   : > { %10322 = vmatprep.subr.bf16.mxu1 %v12415_v24  ;;  %10736 = vmatprep.subr.bf16.mxu0 %v12418_v61  ;;  %v9216_v46 = vpop.f32.mrb[66].mxu0  ;;  %v12430_v24 = vld [vmem:[%s13218_s1 + $0x6c4] ss:$12 sps:$4 sm:$0xff]   ;;  %v12021_v61 = vunpack.i.l.bf16 %v14151_v59  ;;  %v14347_v29 = vsel %vm2378_vm5, %v12026_v25, %v12027_v50 }
 0x1eb   : > { %4159 = vmatmul.mubr.f32.gmra.mrb[58].mxu1 %v14123_v35  ;;  %5039 = vmatmul.mubr.f32.gmra.mrb[118].mxu0 %v14285_v39  ;;  %v9217_v47 = vpop.f32.mrb[67].mxu0  ;;  %v12424_v35 = vld [vmem:[%s13218_s1 + $0x818] ss:$12 sps:$4 sm:$0xff]  }
 0x1ec   : > { %10324 = vmatpush1.bf16.msra.mxu1 %v12417_v38  ;;  %4229 = vmatprep.mubr.f32.mxu1 %v14136_v27  ;;  %v14299_v3 = vadd.f32 %v9217_v47, %v9216_v46  ;;  %v12433_v38 = vld [vmem:[%s13218_s1 + $0x9c8] ss:$12 sps:$4 sm:$0xff]   ;;  %v2208_v46 = vsel %vm2203_vm4, %v11987_v10, %v14142_v7  ;;  %v14332_v47 = vshrl.u32 %v3723_v20, 7  ;;  %v12037_v10 = vunpack.i.h.bf16 %v14157_v5 }
 0x1ed   : > { %10738 = vmatpush3.bf16.msra.mxu0 %v12419_v40  ;;  %10326 = vmatprep.subr.bf16.mxu1 %v12420_v57  ;;  %v14304_v43 = vpop.permute.xlu0 %2314  ;;  %v14326_v57 = vpop.permute.xlu1 %12029  ;;  %v12036_v7 = vunpack.i.l.bf16 %v14157_v5  ;;  %v14359_v20 = vsel %vm2378_vm5, %v2208_v46, %v12016_v44  ;;  %v12440_v46 = vld [vmem:[%s13218_s1 + $0x6f4] ss:$12 sps:$4 sm:$0xff]  }
 0x1ee   : > { %10740 = vmatprep.subr.bf16.mxu0 %v12423_v15  ;;  %5108 = vmatprep.mubr.f32.mxu0 %v14295_v2  ;;  %v9219_v27 = vpop.f32.mrb[68].mxu0  ;;  %v14312_v19 = vsel %vm2378_vm5, %v12057_v23, %v14304_v43 }
 0x1ef   : > { %v9220_v48 = vpop.f32.mrb[69].mxu0 }
 0x1f0   : > { %10328 = vmatpush1.bf16.msra.mxu1 %v12422_v31  ;;  %v14317_v21 = vadd.f32 %v9220_v48, %v9219_v27  ;;  %v12432_v31 = vld [vmem:[%s13218_s1 + $0x6c0] ss:$12 sps:$4 sm:$0xff]   ;;  %v2213_v27 = vsel %vm2203_vm4, %v11992_v56, %v12021_v61 }
 0x1f1   : > { %10742 = vmatpush3.bf16.msra.mxu0 %v12424_v35  ;;  %10330 = vmatprep.subr.bf16.mxu1 %v12425_v54  ;;  %v12022_v54 = vunpack.i.h.bf16 %v14151_v59  ;;  %v12435_v59 = vld [vmem:[%s13218_s1 + $0x6dc] ss:$12 sps:$4 sm:$0xff]   ;;  %v12438_v48 = vld [vmem:[%s13218_s1 + $0x9e0] ss:$12 sps:$4 sm:$0xff]   ;;  %v14367_v17 = vsel %vm2378_vm5, %v2213_v27, %v12026_v25  ;;  %v14373_v61 = vpop.permute.xlu1 %12044  ;;  %v15589_v25 = vunpack.i.h.bf16 %v14181_v13 }
 0x1f2   : > { %10744 = vmatprep.subr.bf16.mxu0 %v12428_v51  ;;  %v9222_v40 = vpop.f32.mrb[70].mxu0  ;;  %v12434_v51 = vld [vmem:[%s13218_s1 + $0x908] ss:$12 sps:$4 sm:$0xff]   ;;  %v12439_v56 = vld [vmem:[%s13218_s1 + $0x920] ss:$12 sps:$4 sm:$0xff]   ;;  %v15588_v27 = vunpack.i.h.bf16 %v14373_v61 }
 0x1f3   : > { %v9223_v15 = vpop.f32.mrb[71].mxu0  ;;  %v2218_v44 = vsel %vm2203_vm4, %v11997_v28, %v12022_v54  ;;  %v12032_v54 = vunpack.i.h.bf16 %v14326_v57 }
 0x1f4   : > { %10332 = vmatpush1.bf16.msra.mxu1 %v12427_v6  ;;  %v14335_v35 = vadd.f32 %v9223_v15, %v9222_v40  ;;  %v3733_v6 = vsub.s32 2, %v14332_v47  ;;  %v14379_v40 = vsel %vm2378_vm5, %v12036_v7, %v12037_v10  ;;  %v12041_v15 = vunpack.i.l.bf16 %v14181_v13 }
 0x1f5   : > { %10746 = vmatpush3.bf16.msra.mxu0 %v12429_v12  ;;  %10334 = vmatprep.subr.bf16.mxu1 %v12430_v24  ;;  %v12437_v12 = vld [vmem:[%s13218_s1 + $0x6d8] ss:$12 sps:$4 sm:$0xff]   ;;  %v3721_v24 = vld [vmem:[%s14342_s0] sm:$0x7] }
 0x1f6   : > { %10748 = vmatprep.subr.bf16.mxu0 %v12433_v38  ;;  %v12031_v38 = vunpack.i.l.bf16 %v14326_v57  ;;  %v14385_v28 = vrot.slane %v3721_v24, %v3733_v6  ;;  %v12445_v57 = vld [vmem:[%s13218_s1 + $0x70c] ss:$12 sps:$4 sm:$0xff]   ;;  %v12448_v24 = vld [vmem:[%s13218_s1 + $0xa10] ss:$12 sps:$4 sm:$0xff]  }
 0x1f8   : > { %5109 = vmatmul.mubr.f32.vlgmr.msra.gmra.mrb[120].mxu0 %v14359_v20  ;;  %10336 = vmatpush1.bf16.msra.mxu1 %v12432_v31  ;;  %v12442_v31 = vld [vmem:[%s13218_s1 + $0x6f0] ss:$12 sps:$4 sm:$0xff]  }
 0x1f9   : > { %10750 = vmatpush3.bf16.msra.mxu0 %v12434_v51  ;;  %5113 = vmatprep.mubr.f32.mxu0 %v14347_v29  ;;  %v14392_v51 = vsel %vm2378_vm5, %v2218_v44, %v12036_v7  ;;  %v2223_v7 = vsel %vm2203_vm4, %v12002_v41, %v12031_v38  ;;  %v14407_v44 = vpop.permute.xlu1 %12049  ;;  %v12449_v41 = vld [vmem:[%s13218_s1 + $0x950] ss:$12 sps:$4 sm:$0xff]  }
 0x1fa   : > { %10338 = vmatprep.subr.bf16.mxu1 %v12435_v59  ;;  %10752 = vmatprep.subr.bf16.mxu0 %v12438_v48  ;;  %v12444_v59 = vld [vmem:[%s13218_s1 + $0x938] ss:$12 sps:$4 sm:$0xff]   ;;  %v12046_v48 = vunpack.i.l.bf16 %v14373_v61  ;;  %v14415_v11 = vsel %vm2378_vm5, %v2223_v7, %v12041_v15  ;;  %v12051_v7 = vunpack.i.l.bf16 %v14407_v44 }
 0x1fc   : > { %5114 = vmatmul.mubr.f32.gmra.mrb[122].mxu0 %v14367_v17  ;;  %10340 = vmatpush1.bf16.msra.mxu1 %v12437_v12  ;;  %v14400_v12 = vsel %vm2378_vm5, %v12041_v15, %v15589_v25  ;;  %v14421_v38 = vsel %vm2378_vm5, %v12046_v48, %v15588_v27  ;;  %v12453_v27 = vld [vmem:[%s13218_s1 + $0xa28] ss:$12 sps:$4 sm:$0xff]  }
 0x1fd   : > { %10754 = vmatpush3.bf16.msra.mxu0 %v12439_v56  ;;  %5118 = vmatprep.mubr.f32.mxu0 %v14379_v40 }
 0x1fe   : > { %10342 = vmatprep.subr.bf16.mxu1 %v12440_v46  ;;  %v9257_v6 = vpop.f32.mrb[72].mxu0  ;;  %10756 = vmatprep.subr.bf16.mxu0 %v12443_v58  ;;  %v4636_v46 = vadd.f32 %v14225_v45, %v14385_v28  ;;  %v2228_v45 = vsel %vm2203_vm4, %v12007_v63, %v12032_v54  ;;  %v12452_v63 = vld [vmem:[%s13218_s1 + $0x720] ss:$12 sps:$4 sm:$0xff]   ;;  %v12454_v54 = vld [vmem:[%s13218_s1 + $0x968] ss:$12 sps:$4 sm:$0xff]  }
 0x1ff   : > { %v9258_v56 = vpop.f32.mrb[73].mxu0 }
 0x200   : > { %5119 = vmatmul.mubr.f32.gmra.mrb[124].mxu0 %v14392_v51  ;;  %10344 = vmatpush1.bf16.msra.mxu1 %v12442_v31  ;;  %v9259_v58 = vadd.f32 %v9258_v56, %v9257_v6  ;;  %v4641_v31 = vadd.f32 %v14249_v62, %v14385_v28  ;;  %v12052_v6 = vunpack.i.h.bf16 %v14407_v44  ;;  %v12450_v56 = vld [vmem:[%s13218_s1 + $0x724] ss:$12 sps:$4 sm:$0xff]   ;;  %v14438_v62 = vsel %vm2378_vm5, %v2228_v45, %v12046_v48  ;;  %v12455_v48 = vld [vmem:[%s13218_s1 + $0x73c] ss:$12 sps:$4 sm:$0xff]   ;;  %v12460_v45 = vld [vmem:[%s13218_s1 + $0x754] ss:$12 sps:$4 sm:$0xff]  }
 0x201   : > { %10758 = vmatpush3.bf16.msra.mxu0 %v12444_v59  ;;  %5123 = vmatprep.mubr.f32.mxu0 %v14400_v12  ;;  %v12496_v44 = vld [vmem:[%s13218_s1 + $0x810] ss:$12 sps:$4 sm:$0xff]  }
 0x202   : > { %v14428_v59 = vadd.f32 %v9259_v58, %v4636_v46  ;;  %10346 = vmatprep.subr.bf16.mxu1 %v12445_v57  ;;  %v9260_v15 = vpop.f32.mrb[74].mxu0  ;;  %10760 = vmatprep.subr.bf16.mxu0 %v12448_v24  ;;  %v2233_v57 = vsel %vm2203_vm4, %v12012_v18, %v14203_v53  ;;  %v4646_v24 = vadd.f32 %v14274_v8, %v14385_v28  ;;  %v12458_v58 = vld [vmem:[%s13218_s1 + $0xa40] ss:$12 sps:$4 sm:$0xff]   ;;  %v12056_v53 = vunpack.i.l.bf16 %v14229_v30  ;;  %v12457_v8 = vld [vmem:[%s13218_s1 + $0x738] ss:$12 sps:$4 sm:$0xff]  }
 0x203   : > { %v9261_v25 = vpop.f32.mrb[75].mxu0  ;;  %vm6376_vm4 = vcmask 300032  }
 0x204   : > { %5124 = vmatmul.mubr.f32.gmra.mrb[126].mxu0 %v14415_v11  ;;  %10348 = vmatpush1.bf16.msra.mxu1 %v12447_v0  ;;  %v9262_v33 = vadd.f32 %v9261_v25, %v9260_v15  ;;  %v14452_v25 = vsel %vm2378_vm5, %v12051_v7, %v12052_v6 }
 0x205   : > { %10762 = vmatpush3.bf16.msra.mxu0 %v12449_v41  ;;  %5128 = vmatprep.mubr.f32.mxu0 %v14421_v38  ;;  %v12459_v41 = vld [vmem:[%s13218_s1 + $0x980] ss:$12 sps:$4 sm:$0xff]  }
 0x206   : > { %v14447_v46 = vadd.f32 %v9262_v33, %v4641_v31  ;;  %10350 = vmatprep.subr.bf16.mxu1 %v12450_v56  ;;  %v9263_v0 = vpop.f32.mrb[76].mxu0  ;;  %10764 = vmatprep.subr.bf16.mxu0 %v12453_v27  ;;  %v14461_v27 = vsel %vm2378_vm5, %v2233_v57, %v12051_v7  ;;  %v4651_v31 = vadd.f32 %v14299_v3, %v14385_v28  ;;  %v12463_v33 = vld [vmem:[%s13218_s1 + $0xa58] ss:$12 sps:$4 sm:$0xff]   ;;  %v12462_v57 = vld [vmem:[%s13218_s1 + $0x750] ss:$12 sps:$4 sm:$0xff]  }
 0x207   : > { %v9264_v55 = vpop.f32.mrb[77].mxu0  ;;  %v14473_v7 = vsel %vm2378_vm5, %v12056_v53, %v12057_v23  ;;  %v12464_v3 = vld [vmem:[%s13218_s1 + $0x998] ss:$12 sps:$4 sm:$0xff]   ;;  %v12468_v23 = vld [vmem:[%s13218_s1 + $0xa70] ss:$12 sps:$4 sm:$0xff]  }
 0x208   : > { %5129 = vmatmul.mubr.f32.gmra.mrb[128].mxu0 %v14438_v62  ;;  %10352 = vmatpush1.bf16.msra.mxu1 %v12452_v63  ;;  %v9265_v18 = vadd.f32 %v9264_v55, %v9263_v0  ;;  %v4656_v0 = vadd.f32 %v14317_v21, %v14385_v28  ;;  %v4661_v21 = vadd.f32 %v14335_v35, %v14385_v28  ;;  %v12473_v28 = vld [vmem:[%s13218_s1 + $0xa88] ss:$12 sps:$4 sm:$0xff]  }
 0x209   : > { %10766 = vmatpush3.bf16.msra.mxu0 %v12454_v54  ;;  %5133 = vmatprep.mubr.f32.mxu0 %v14452_v25  ;;  %v14500_v35 = vsel %vm2378_vm5, %v12017_v42, %v12056_v53  ;;  %v12476_v53 = vld [vmem:[%s13218_s1 + $0x798] ss:$12 sps:$4 sm:$0xff]  }
 0x20a   : > { %v14467_v15 = vadd.f32 %v9265_v18, %v4646_v24  ;;  %10354 = vmatprep.subr.bf16.mxu1 %v12455_v48  ;;  %v9266_v56 = vpop.f32.mrb[78].mxu0  ;;  %10768 = vmatprep.subr.bf16.mxu0 %v12458_v58  ;;  %v12465_v24 = vld [vmem:[%s13218_s1 + $0x76c] ss:$12 sps:$4 sm:$0xff]   ;;  %v12467_v18 = vld [vmem:[%s13218_s1 + $0x768] ss:$12 sps:$4 sm:$0xff]  }
 0x20b   : > { %v9267_v63 = vpop.f32.mrb[79].mxu0 }
 0x20c   : > { %5134 = vmatmul.mubr.f32.gmra.mrb[130].mxu0 %v14461_v27  ;;  %10356 = vmatpush1.bf16.msra.mxu1 %v12457_v8  ;;  %v9268_v54 = vadd.f32 %v9267_v63, %v9266_v56  ;;  %v14486_v8 = vpop.permute.xlu1 %12059 }
 0x20d   : > { %10770 = vmatpush3.bf16.msra.mxu0 %v12459_v41  ;;  %10358 = vmatprep.subr.bf16.mxu1 %v12460_v45  ;;  %v12469_v41 = vld [vmem:[%s13218_s1 + $0x9b0] ss:$12 sps:$4 sm:$0xff]   ;;  %v12062_v63 = vunpack.i.h.bf16 %v14486_v8 }
 0x20e   : > { %v14481_v48 = vadd.f32 %v9268_v54, %v4651_v31  ;;  %v9269_v30 = vpop.f32.mrb[80].mxu0  ;;  %10772 = vmatprep.subr.bf16.mxu0 %v12463_v33  ;;  %5203 = vmatprep.mubr.f32.mxu0 %v14473_v7  ;;  %v12470_v45 = vld [vmem:[%s13218_s1 + $0x784] ss:$12 sps:$4 sm:$0xff]   ;;  %v12061_v54 = vunpack.i.l.bf16 %v14486_v8  ;;  %v12539_v8 = vld [vmem:[%s13218_s1 + $0x934] ss:$12 sps:$4 sm:$0xff]  }
 0x20f   : > { %v9270_v58 = vpop.f32.mrb[81].mxu0 }
 0x210   : > { %10360 = vmatpush1.bf16.msra.mxu1 %v12462_v57  ;;  %v9271_v55 = vadd.f32 %v9270_v58, %v9269_v30  ;;  %v12474_v30 = vld [vmem:[%s13218_s1 + $0x79c] ss:$12 sps:$4 sm:$0xff]   ;;  %v12066_v58 = vunpack.i.l.bf16 %v14253_v52  ;;  %v14513_v22 = vsel %vm2378_vm5, %v12061_v54, %v12062_v63  ;;  %v14517_v42 = vpop.permute.xlu1 %12069 }
 0x211   : > { %10774 = vmatpush3.bf16.msra.mxu0 %v12464_v3  ;;  %10362 = vmatprep.subr.bf16.mxu1 %v12465_v24  ;;  %v12472_v3 = vld [vmem:[%s13218_s1 + $0x780] ss:$12 sps:$4 sm:$0xff]  }
 0x212   : > { %v14492_v31 = vadd.f32 %v9271_v55, %v4656_v0  ;;  %v9272_v56 = vpop.f32.mrb[82].mxu0  ;;  %10776 = vmatprep.subr.bf16.mxu0 %v12468_v23  ;;  %v12920_v0 = vmov 0.0|0.0   ;;  %v12067_v23 = vunpack.i.h.bf16 %v14253_v52  ;;  %v12477_v55 = vld [vmem:[%s13218_s1 + $0xaa0] ss:$12 sps:$4 sm:$0xff]  }
 0x213   : > { %v9273_v33 = vpop.f32.mrb[83].mxu0  ;;  %v12542_v52 = vld [vmem:[%s13218_s1 + $0x94c] ss:$12 sps:$4 sm:$0xff]  }
 0x214   : > { %10364 = vmatpush1.bf16.msra.mxu1 %v12467_v18  ;;  %v9274_v57 = vadd.f32 %v9273_v33, %v9272_v56  ;;  %v12478_v18 = vld [vmem:[%s13218_s1 + $0x7b4] ss:$12 sps:$4 sm:$0xff]   ;;  %v14535_v36 = vsel %vm2378_vm5, %v12066_v58, %v12067_v23  ;;  %v12077_v56 = vunpack.i.h.bf16 %v14280_v16 }
 0x215   : > { %10778 = vmatpush3.bf16.msra.mxu0 %v12469_v41  ;;  %10366 = vmatprep.subr.bf16.mxu1 %v12470_v45  ;;  %v12071_v41 = vunpack.i.l.bf16 %v14517_v42  ;;  %v12481_v45 = vld [vmem:[%s13218_s1 + $0xab8] ss:$12 sps:$4 sm:$0xff]   ;;  %v12484_v33 = vld [vmem:[%s13218_s1 + $0x7c8] ss:$12 sps:$4 sm:$0xff]  }
 0x216   : > { %v14503_v24 = vadd.f32 %v9274_v57, %v4661_v21  ;;  %10779 = vmatprep.subr.bf16.mxu0 %v12920_v0  ;;  %v12482_v21 = vld [vmem:[%s13218_s1 + $0x7cc] ss:$12 sps:$4 sm:$0xff]   ;;  %v12485_v57 = vld [vmem:[%s13218_s1 + $0xad0] ss:$12 sps:$4 sm:$0xff]  }
 0x217   : > { %4230 = vmatmul.mubr.f32.vlgmr.msra.gmra.mrb[48].mxu1 %v14163_v32  ;;  %v14523_v32 = vsel %vm2378_vm5, %v12027_v50, %v12061_v54  ;;  %v12480_v50 = vld [vmem:[%s13218_s1 + $0x7b0] ss:$12 sps:$4 sm:$0xff]   ;;  %v15608_v54 = vunpack.i.h.bf16 %v14181_v13 }
 0x218   : > { %5204 = vmatmul.mubr.f32.vlgmr.msra.gmra.mrb[132].mxu0 %v14500_v35  ;;  %4235 = vmatprep.mubr.f32.mxu1 %v14168_v37  ;;  %v12072_v37 = vunpack.i.h.bf16 %v14517_v42  ;;  %v12545_v42 = vld [vmem:[%s13218_s1 + $0x964] ss:$12 sps:$4 sm:$0xff]  }
 0x219   : > { %10368 = vmatpush1.bf16.msra.mxu1 %v12472_v3  ;;  %10781 = vmatpush1.bf16.msra.mxu0 %v12473_v28  ;;  %v12486_v3 = vld [vmem:[%s13218_s1 + $0x7e4] ss:$12 sps:$4 sm:$0xff]  }
 0x21a   : > { %5208 = vmatprep.mubr.f32.mxu0 %v14513_v22  ;;  %10370 = vmatprep.subr.bf16.mxu1 %v12474_v30  ;;  %v14555_v5 = vsel %vm2378_vm5, %v12071_v41, %v12072_v37  ;;  %v15609_v30 = vunpack.i.h.bf16 %v14373_v61  ;;  %v12492_v61 = vld [vmem:[%s13218_s1 + $0x7f8] ss:$12 sps:$4 sm:$0xff]  }
 0x21b   : > { %4236 = vmatmul.mubr.f32.gmra.mrb[50].mxu1 %v14187_v34  ;;  %10782 = vmatprep.subr.bf16.mxu0 %v12920_v0  ;;  %v14543_v34 = vsel %vm2378_vm5, %v12037_v10, %v12066_v58  ;;  %v14559_v10 = vpop.permute.xlu1 %12079 }
 0x21c   : > { %5209 = vmatmul.mubr.f32.gmra.mrb[134].mxu0 %v14523_v32  ;;  %4241 = vmatprep.mubr.f32.mxu1 %v14192_v4  ;;  %v12076_v4 = vunpack.i.l.bf16 %v14280_v16  ;;  %v12081_v28 = vunpack.i.l.bf16 %v14559_v10  ;;  %v12548_v16 = vld [vmem:[%s13218_s1 + $0x97c] ss:$12 sps:$4 sm:$0xff]  }
 0x21d   : > { %10372 = vmatpush1.bf16.msra.mxu1 %v12476_v53  ;;  %10784 = vmatpush1.bf16.msra.mxu0 %v12477_v55  ;;  %v12489_v53 = vld [vmem:[%s13218_s1 + $0xae8] ss:$12 sps:$4 sm:$0xff]  }
 0x21e   : > { %5213 = vmatprep.mubr.f32.mxu0 %v14535_v36  ;;  %10374 = vmatprep.subr.bf16.mxu1 %v12478_v18  ;;  %v14577_v13 = vsel %vm2378_vm5, %v12076_v4, %v12077_v56  ;;  %v14585_v58 = vsel %vm2378_vm5, %v15609_v30, %v12076_v4  ;;  %v12490_v55 = vld [vmem:[%s13218_s1 + $0x7fc] ss:$12 sps:$4 sm:$0xff]   ;;  %v12493_v18 = vld [vmem:[%s13218_s1 + $0xb00] ss:$12 sps:$4 sm:$0xff]  }
 0x21f   : > { %4242 = vmatmul.mubr.f32.gmra.mrb[52].mxu1 %v14209_v60  ;;  %10785 = vmatprep.subr.bf16.mxu0 %v12920_v0  ;;  %v14565_v60 = vsel %vm2378_vm5, %v15608_v54, %v12071_v41  ;;  %v2317_v41 = vpop.permute.xlu1 %2316  ;;  %v12505_v4 = vld [vmem:[%s13218_s1 + $0xb48] ss:$12 sps:$4 sm:$0xff]   ;;  %v12508_v54 = vld [vmem:[%s13218_s1 + $0x858] ss:$12 sps:$4 sm:$0xff]  }
 0x220   : > { %5214 = vmatmul.mubr.f32.gmra.mrb[136].mxu0 %v14543_v34  ;;  %4247 = vmatprep.mubr.f32.mxu1 %v14214_v49  ;;  %v12082_v49 = vunpack.i.h.bf16 %v14559_v10  ;;  %v12514_v30 = vld [vmem:[%s13218_s1 + $0x88c] ss:$12 sps:$4 sm:$0xff]  }
 0x221   : > { %10376 = vmatpush1.bf16.msra.mxu1 %v12480_v50  ;;  %10787 = vmatpush1.bf16.msra.mxu0 %v12481_v45  ;;  %v12494_v50 = vld [vmem:[%s13218_s1 + $0x814] ss:$12 sps:$4 sm:$0xff]   ;;  %v12502_v45 = vld [vmem:[%s13218_s1 + $0x844] ss:$12 sps:$4 sm:$0xff]  }
 0x222   : > { %5218 = vmatprep.mubr.f32.mxu0 %v14555_v5  ;;  %10378 = vmatprep.subr.bf16.mxu1 %v12482_v21  ;;  %v12504_v21 = vld [vmem:[%s13218_s1 + $0x840] ss:$12 sps:$4 sm:$0xff]  }
 0x223   : > { %4248 = vmatmul.mubr.f32.gmra.mrb[54].mxu1 %v14235_v1  ;;  %10788 = vmatprep.subr.bf16.mxu0 %v12920_v0  ;;  %v12488_v1 = vld [vmem:[%s13218_s1 + $0x7e0] ss:$12 sps:$4 sm:$0xff]  }
 0x224   : > { %5219 = vmatmul.mubr.f32.gmra.mrb[138].mxu0 %v14565_v60  ;;  %4253 = vmatprep.mubr.f32.mxu1 %v14240_v14  ;;  %v14595_v14 = vsel %vm2378_vm5, %v12081_v28, %v12082_v49 }
 0x225   : > { %10380 = vmatpush1.bf16.msra.mxu1 %v12484_v33  ;;  %10790 = vmatpush1.bf16.msra.mxu0 %v12485_v57  ;;  %v12506_v33 = vld [vmem:[%s13218_s1 + $0x85c] ss:$12 sps:$4 sm:$0xff]   ;;  %v12509_v57 = vld [vmem:[%s13218_s1 + $0xb60] ss:$12 sps:$4 sm:$0xff]  }
 0x226   : > { %5223 = vmatprep.mubr.f32.mxu0 %v14577_v13  ;;  %10382 = vmatprep.subr.bf16.mxu1 %v12486_v3  ;;  %v12510_v3 = vld [vmem:[%s13218_s1 + $0x874] ss:$12 sps:$4 sm:$0xff]  }
 0x227   : > { %4254 = vmatmul.mubr.f32.gmra.mrb[56].mxu1 %v14260_v9  ;;  %10791 = vmatprep.subr.bf16.mxu0 %v12920_v0  ;;  %v14603_v9 = vsel %vm2378_vm5, %v12052_v6, %v12081_v28  ;;  %v12498_v6 = vld [vmem:[%s13218_s1 + $0x82c] ss:$12 sps:$4 sm:$0xff]   ;;  %v12512_v28 = vld [vmem:[%s13218_s1 + $0x870] ss:$12 sps:$4 sm:$0xff]  }
 0x228   : > { %5224 = vmatmul.mubr.f32.gmra.mrb[140].mxu0 %v14585_v58  ;;  %4259 = vmatprep.mubr.f32.mxu1 %v14265_v26  ;;  %v14613_v26 = vsel %vm2378_vm5, %v14304_v43, %v2317_v41  ;;  %v12500_v43 = vld [vmem:[%s13218_s1 + $0x828] ss:$12 sps:$4 sm:$0xff]  }
 0x229   : > { %10384 = vmatpush1.bf16.msra.mxu1 %v12488_v1  ;;  %10793 = vmatpush1.bf16.msra.mxu0 %v12489_v53  ;;  %v12513_v1 = vld [vmem:[%s13218_s1 + $0xb78] ss:$12 sps:$4 sm:$0xff]   ;;  %v12516_v53 = vld [vmem:[%s13218_s1 + $0x888] ss:$12 sps:$4 sm:$0xff]  }
 0x22a   : > { %5228 = vmatprep.mubr.f32.mxu0 %v14595_v14  ;;  %10386 = vmatprep.subr.bf16.mxu1 %v12490_v55  ;;  %v12517_v55 = vld [vmem:[%s13218_s1 + $0xb90] ss:$12 sps:$4 sm:$0xff]   ;;  %v12521_v41 = vld [vmem:[%s13218_s1 + $0xba8] ss:$12 sps:$4 sm:$0xff]  }
 0x22b   : > { %4260 = vmatmul.mubr.f32.gmra.mrb[58].mxu1 %v14285_v39  ;;  %10794 = vmatprep.subr.bf16.mxu0 %v12920_v0  ;;  %v12497_v39 = vld [vmem:[%s13218_s1 + $0xb18] ss:$12 sps:$4 sm:$0xff]  }
 0x22c   : > { %5229 = vmatmul.mubr.f32.gmra.mrb[142].mxu0 %v14603_v9  ;;  %4330 = vmatprep.mubr.f32.mxu1 %v14295_v2  ;;  %v12501_v2 = vld [vmem:[%s13218_s1 + $0xb30] ss:$12 sps:$4 sm:$0xff]  }
 0x22d   : > { %10388 = vmatpush1.bf16.msra.mxu1 %v12492_v61  ;;  %10796 = vmatpush1.bf16.msra.mxu0 %v12493_v18  ;;  %v12518_v61 = vld [vmem:[%s13218_s1 + $0x8a4] ss:$12 sps:$4 sm:$0xff]   ;;  %v12520_v18 = vld [vmem:[%s13218_s1 + $0x8a0] ss:$12 sps:$4 sm:$0xff]  }
 0x22e   : > { %10390 = vmatprep.subr.bf16.mxu1 %v12494_v50  ;;  %10797 = vmatprep.subr.bf16.mxu0 %v12920_v0  ;;  %v12522_v50 = vld [vmem:[%s13218_s1 + $0x8bc] ss:$12 sps:$4 sm:$0xff]  }
 0x22f   : > { %8571 = vmatprep.mubr.msk.f32.mxu0 %vm3738_vm6, %v14613_v26 }
 0x231   : > { %10392 = vmatpush1.bf16.msra.mxu1 %v12496_v44  ;;  %10799 = vmatpush1.bf16.msra.mxu0 %v12497_v39  ;;  %v2329_v44 = vpop.permute.xlu1 %2328  ;;  %v12524_v39 = vld [vmem:[%s13218_s1 + $0x8b8] ss:$12 sps:$4 sm:$0xff]  }
 0x232   : > { %10394 = vmatprep.subr.bf16.mxu1 %v12498_v6  ;;  %10800 = vmatprep.subr.bf16.mxu0 %v12920_v0  ;;  %v12525_v6 = vld [vmem:[%s13218_s1 + $0xbc0] ss:$12 sps:$4 sm:$0xff]  }
 0x235   : > { %10396 = vmatpush1.bf16.msra.mxu1 %v12500_v43  ;;  %10802 = vmatpush1.bf16.msra.mxu0 %v12501_v2  ;;  %v2327_v43 = vpop.permute.xlu0 %2326  ;;  %v12526_v2 = vld [vmem:[%s13218_s1 + $0x8d4] ss:$12 sps:$4 sm:$0xff]  }
 0x236   : > { %10398 = vmatprep.subr.bf16.mxu1 %v12502_v45  ;;  %10803 = vmatprep.subr.bf16.mxu0 %v12920_v0  ;;  %v12528_v45 = vld [vmem:[%s13218_s1 + $0x8d0] ss:$12 sps:$4 sm:$0xff]  }
 0x239   : > { %10400 = vmatpush1.bf16.msra.mxu1 %v12504_v21  ;;  %10805 = vmatpush1.bf16.msra.mxu0 %v12505_v4  ;;  %v12529_v21 = vld [vmem:[%s13218_s1 + $0xbd8] ss:$12 sps:$4 sm:$0x1f]  }
 0x23a   : > { %10402 = vmatprep.subr.bf16.mxu1 %v12506_v33  ;;  %10806 = vmatprep.subr.bf16.mxu0 %v12920_v0  ;;  %v12530_v33 = vld [vmem:[%s13218_s1 + $0x8ec] ss:$12 sps:$4 sm:$0xff]  }
 0x23d   : > { %10404 = vmatpush1.bf16.msra.mxu1 %v12508_v54  ;;  %10808 = vmatpush1.bf16.msra.mxu0 %v12509_v57  ;;  %v2341_v54 = vpop.permute.xlu1 %2340  ;;  %v2339_v57 = vpop.permute.xlu0 %2338 }
 0x23e   : > { %10406 = vmatprep.subr.bf16.mxu1 %v12510_v3  ;;  %10809 = vmatprep.subr.bf16.mxu0 %v12920_v0  ;;  %v12532_v3 = vld [vmem:[%s13218_s1 + $0x8e8] ss:$12 sps:$4 sm:$0xff]  }
 0x241   : > { %10408 = vmatpush1.bf16.msra.mxu1 %v12512_v28  ;;  %10811 = vmatpush1.bf16.msra.mxu0 %v12513_v1  ;;  %v14664_v28 = vsel %vm2378_vm5, %v2327_v43, %v2329_v44  ;;  %v12533_v1 = vld [vmem:[%s13218_s1 + $0x904] ss:$12 sps:$4 sm:$0xff]   ;;  %v14690_v44 = vsel %vm2378_vm5, %v12067_v23, %v2339_v57 }
 0x242   : > { %10410 = vmatprep.subr.bf16.mxu1 %v12514_v30  ;;  %10812 = vmatprep.subr.bf16.mxu0 %v12920_v0  ;;  %v2353_v30 = vpop.permute.xlu1 %2352 }
 0x245   : > { %10412 = vmatpush1.bf16.msra.mxu1 %v12516_v53  ;;  %10814 = vmatpush1.bf16.msra.mxu0 %v12517_v55  ;;  %v12535_v53 = vld [vmem:[%s13218_s1 + $0x900] ss:$12 sps:$4 sm:$0xff]   ;;  %v2351_v55 = vpop.permute.xlu0 %2350 }
 0x246   : > { %10414 = vmatprep.subr.bf16.mxu1 %v12518_v61  ;;  %10815 = vmatprep.subr.bf16.mxu0 %v12920_v0  ;;  %v12536_v61 = vld [vmem:[%s13218_s1 + $0x91c] ss:$12 sps:$4 sm:$0xff]   ;;  %v14705_v23 = vsel %vm2378_vm5, %v12072_v37, %v2351_v55 }
 0x249   : > { %10416 = vmatpush1.bf16.msra.mxu1 %v12520_v18  ;;  %10817 = vmatpush1.bf16.msra.mxu0 %v12521_v41  ;;  %v14675_v18 = vsel %vm2378_vm5, %v12062_v63, %v2327_v43  ;;  %v14678_v41 = vsel %vm2378_vm5, %v2339_v57, %v2341_v54  ;;  %v2365_v63 = vpop.permute.xlu1 %2364 }
 0x24a   : > { %10418 = vmatprep.subr.bf16.mxu1 %v12522_v50  ;;  %10818 = vmatprep.subr.bf16.mxu0 %v12920_v0  ;;  %v12538_v50 = vld [vmem:[%s13218_s1 + $0x918] ss:$12 sps:$4 sm:$0xff]  }
 0x24d   : > { %10420 = vmatpush1.bf16.msra.mxu1 %v12524_v39  ;;  %10820 = vmatpush1.bf16.msra.mxu0 %v12525_v6  ;;  %v2363_v39 = vpop.permute.xlu0 %2362 }
 0x24e   : > { %10422 = vmatprep.subr.bf16.mxu1 %v12526_v2  ;;  %10821 = vmatprep.subr.bf16.mxu0 %v12920_v0  ;;  %v14708_v6 = vsel %vm2378_vm5, %v2363_v39, %v2365_v63  ;;  %v12551_v2 = vld [vmem:[%s13218_s1 + $0x994] ss:$12 sps:$4 sm:$0xff]  }
 0x251   : > { %10424 = vmatpush1.bf16.msra.mxu1 %v12528_v45  ;;  %10824 = vmatpush1.bf16.msk.msra.mxu0 %vm14655_vm8, %v12529_v21  ;;  %v2375_v43 = vpop.permute.xlu0 %2374  ;;  %v15612_v45 = vmov 0.0  }
 0x252   : > { %10426 = vmatprep.subr.bf16.mxu1 %v12530_v33  ;;  %v12554_v33 = vld [vmem:[%s13218_s1 + $0x9ac] ss:$12 sps:$4 sm:$0xff]  }
 0x254   : > { %5299 = vmatmul.mubr.f32.vlgmr.msra.gmra.mrb[144].mxu0 %v14312_v19 }
 0x255   : > { %10428 = vmatpush1.bf16.msra.mxu1 %v12532_v3  ;;  %8572 = vmatprep.mubr.msk.f32.mxu0 %vm3738_vm6, %v14664_v28  ;;  %v12556_v3 = vld [vmem:[%s13218_s1 + $0x9a8] ss:$12 sps:$4 sm:$0xff]  }
 0x256   : > { %10430 = vmatprep.subr.bf16.mxu1 %v12533_v1 }
 0x258   : > { %4331 = vmatmul.mubr.f32.vlgmr.msra.gmra.mrb[48].mxu1 %v14359_v20  ;;  %5304 = vmatmul.mubr.f32.gmra.mrb[146].mxu0 %v14675_v18  ;;  %v14693_v20 = vsel %vm2378_vm5, %v2351_v55, %v2353_v30  ;;  %v12557_v30 = vld [vmem:[%s13218_s1 + $0x9c4] ss:$12 sps:$4 sm:$0xff]   ;;  %v12559_v55 = vld [vmem:[%s13218_s1 + $0x9c0] ss:$12 sps:$4 sm:$0xff]  }
 0x259   : > { %10432 = vmatpush1.bf16.msra.mxu1 %v12535_v53  ;;  %4336 = vmatprep.mubr.f32.mxu1 %v14347_v29  ;;  %v12541_v29 = vld [vmem:[%s13218_s1 + $0x930] ss:$12 sps:$4 sm:$0xff]  }
 0x25a   : > { %8573 = vmatprep.mubr.msk.f32.mxu0 %vm3738_vm6, %v14678_v41  ;;  %10434 = vmatprep.subr.bf16.mxu1 %v12536_v61 }
 0x25c   : > { %4337 = vmatmul.mubr.f32.gmra.mrb[50].mxu1 %v14367_v17  ;;  %5309 = vmatmul.mubr.f32.gmra.mrb[148].mxu0 %v14690_v44  ;;  %v2377_v17 = vpop.permute.xlu1 %2376 }
 0x25d   : > { %10436 = vmatpush1.bf16.msra.mxu1 %v12538_v50  ;;  %4342 = vmatprep.mubr.f32.mxu1 %v14379_v40  ;;  %v12544_v40 = vld [vmem:[%s13218_s1 + $0x948] ss:$12 sps:$4 sm:$0xff]   ;;  %v14723_v37 = vsel %vm2378_vm5, %v2375_v43, %v2377_v17 }
 0x25e   : > { %8574 = vmatprep.mubr.msk.f32.mxu0 %vm3738_vm6, %v14693_v20  ;;  %10438 = vmatprep.subr.bf16.mxu1 %v12539_v8  ;;  %v12560_v50 = vld [vmem:[%s13218_s1 + $0x9dc] ss:$12 sps:$4 sm:$0xff]  }
 0x260   : > { %4343 = vmatmul.mubr.f32.gmra.mrb[52].mxu1 %v14392_v51  ;;  %5314 = vmatmul.mubr.f32.gmra.mrb[150].mxu0 %v14705_v23  ;;  %v14720_v51 = vsel %vm2378_vm5, %v12077_v56, %v2363_v39  ;;  %v14735_v56 = vsel %vm2378_vm5, %v12082_v49, %v2375_v43  ;;  %v12562_v39 = vld [vmem:[%s13218_s1 + $0x9d8] ss:$12 sps:$4 sm:$0xff]   ;;  %vm6687_vm5 = vcmask 1046528  }
 0x261   : > { %10440 = vmatpush1.bf16.msra.mxu1 %v12541_v29  ;;  %4348 = vmatprep.mubr.f32.mxu1 %v14400_v12  ;;  %v12547_v12 = vld [vmem:[%s13218_s1 + $0x960] ss:$12 sps:$4 sm:$0xff]  }
 0x262   : > { %8575 = vmatprep.mubr.msk.f32.mxu0 %vm3738_vm6, %v14708_v6  ;;  %10442 = vmatprep.subr.bf16.mxu1 %v12542_v52  ;;  %v12563_v52 = vld [vmem:[%s13218_s1 + $0x9f4] ss:$12 sps:$4 sm:$0xff]  }
 0x264   : > { %4349 = vmatmul.mubr.f32.gmra.mrb[54].mxu1 %v14415_v11  ;;  %5319 = vmatmul.mubr.f32.gmra.mrb[152].mxu0 %v14720_v51  ;;  %v12550_v11 = vld [vmem:[%s13218_s1 + $0x978] ss:$12 sps:$4 sm:$0xff]  }
 0x265   : > { %10444 = vmatpush1.bf16.msra.mxu1 %v12544_v40  ;;  %4354 = vmatprep.mubr.f32.mxu1 %v14421_v38 }
 0x266   : > { %8576 = vmatprep.mubr.msk.f32.mxu0 %vm3738_vm6, %v14723_v37  ;;  %10446 = vmatprep.subr.bf16.mxu1 %v12545_v42 }
 0x268   : > { %4355 = vmatmul.mubr.f32.gmra.mrb[56].mxu1 %v14438_v62  ;;  %5324 = vmatmul.mubr.f32.gmra.mrb[154].mxu0 %v14735_v56  ;;  %v12553_v62 = vld [vmem:[%s13218_s1 + $0x990] ss:$12 sps:$4 sm:$0xff]  }
 0x269   : > { %10448 = vmatpush1.bf16.msra.mxu1 %v12547_v12  ;;  %4360 = vmatprep.mubr.f32.mxu1 %v14452_v25  ;;  %v12566_v12 = vld [vmem:[%s13218_s1 + $0xa0c] ss:$12 sps:$4 sm:$0xff]  }
 0x26a   : > { %10450 = vmatprep.subr.bf16.mxu1 %v12548_v16  ;;  %v9307_v38 = vpop.f32.mrb[84].mxu0  ;;  %5527 = vmatprep.mubr.f32.mxu0 %v15612_v45 }
 0x26b   : > { %v9308_v10 = vpop.f32.mrb[85].mxu0 }
 0x26c   : > { %4361 = vmatmul.mubr.f32.gmra.mrb[58].mxu1 %v14461_v27  ;;  %v9309_v49 = vadd.f32 %v9308_v10, %v9307_v38  ;;  %v12571_v10 = vld [vmem:[%s13218_s1 + $0xa20] ss:$12 sps:$4 sm:$0xff]  }
 0x26d   : > { %10452 = vmatpush1.bf16.msra.mxu1 %v12550_v11  ;;  %4431 = vmatprep.mubr.f32.mxu1 %v14473_v7 }
 0x26e   : > { %v4826_v21 = vadd.f32 %v9309_v49, %v14428_v59  ;;  %10454 = vmatprep.subr.bf16.mxu1 %v12551_v2  ;;  %v9310_v25 = vpop.f32.mrb[86].mxu0  ;;  %v12569_v2 = vld [vmem:[%s13218_s1 + $0xa24] ss:$12 sps:$4 sm:$0xff]   ;;  %v12572_v49 = vld [vmem:[%s13218_s1 + $0xa3c] ss:$12 sps:$4 sm:$0xff]  }
 0x26f   : > { %v9311_v54 = vpop.f32.mrb[87].mxu0 }
 0x270   : > { %v9312_v57 = vadd.f32 %v9311_v54, %v9310_v25  ;;  %v12575_v25 = vld [vmem:[%s13218_s1 + $0xa54] ss:$12 sps:$4 sm:$0xff]  }
 0x271   : > { %10456 = vmatpush1.bf16.msra.mxu1 %v12553_v62 }
 0x272   : > { %v4831_v27 = vadd.f32 %v9312_v57, %v14447_v46  ;;  %10458 = vmatprep.subr.bf16.mxu1 %v12554_v33  ;;  %v9313_v1 = vpop.f32.mrb[88].mxu0  ;;  %v12577_v57 = vld [vmem:[%s13218_s1 + $0xa50] ss:$12 sps:$4 sm:$0xff]  }
 0x273   : > { %v9314_v7 = vpop.f32.mrb[89].mxu0 }
 0x274   : > { %v9315_v53 = vadd.f32 %v9314_v7, %v9313_v1  ;;  %v12578_v1 = vld [vmem:[%s13218_s1 + $0xa6c] ss:$12 sps:$4 sm:$0xff]  }
 0x275   : > { %10460 = vmatpush1.bf16.msra.mxu1 %v12556_v3 }
 0x276   : > { %v4836_v59 = vadd.f32 %v9315_v53, %v14467_v15  ;;  %10462 = vmatprep.subr.bf16.mxu1 %v12557_v30  ;;  %v9316_v61 = vpop.f32.mrb[90].mxu0  ;;  %v12565_v15 = vld [vmem:[%s13218_s1 + $0x9f0] ss:$12 sps:$4 sm:$0xff]   ;;  %v12580_v53 = vld [vmem:[%s13218_s1 + $0xa68] ss:$12 sps:$4 sm:$0xff]  }
 0x277   : > { %v9317_v8 = vpop.f32.mrb[91].mxu0 }
 0x278   : > { %v9318_v63 = vadd.f32 %v9317_v8, %v9316_v61 }
 0x279   : > { %10464 = vmatpush1.bf16.msra.mxu1 %v12559_v55 }
 0x27a   : > { %v4841_v46 = vadd.f32 %v9318_v63, %v14481_v48  ;;  %10466 = vmatprep.subr.bf16.mxu1 %v12560_v50  ;;  %v9319_v29 = vpop.f32.mrb[92].mxu0  ;;  %v12568_v48 = vld [vmem:[%s13218_s1 + $0xa08] ss:$12 sps:$4 sm:$0xff]   ;;  %v12581_v50 = vld [vmem:[%s13218_s1 + $0xa84] ss:$12 sps:$4 sm:$0xff]  }
 0x27b   : > { %v9320_v17 = vpop.f32.mrb[93].mxu0 }
 0x27c   : > { %v9321_v40 = vadd.f32 %v9320_v17, %v9319_v29 }
 0x27d   : > { %10468 = vmatpush1.bf16.msra.mxu1 %v12562_v39 }
 0x27e   : > { %v4846_v43 = vadd.f32 %v9321_v40, %v14492_v31  ;;  %10470 = vmatprep.subr.bf16.mxu1 %v12563_v52  ;;  %v9322_v42 = vpop.f32.mrb[94].mxu0  ;;  %v12574_v31 = vld [vmem:[%s13218_s1 + $0xa38] ss:$12 sps:$4 sm:$0xff]   ;;  %v12584_v52 = vld [vmem:[%s13218_s1 + $0xa9c] ss:$12 sps:$4 sm:$0xff]  }
 0x27f   : > { %v9323_v16 = vpop.f32.mrb[95].mxu0  ;;  %v12586_v40 = vld [vmem:[%s13218_s1 + $0xa98] ss:$12 sps:$4 sm:$0xff]  }
 0x280   : > { %v9324_v11 = vadd.f32 %v9323_v16, %v9322_v42 }
 0x281   : > { %10472 = vmatpush1.bf16.msra.mxu1 %v12565_v15 }
 0x282   : > { %v4851_v38 = vadd.f32 %v9324_v11, %v14503_v24  ;;  %10474 = vmatprep.subr.bf16.mxu1 %v12566_v12  ;;  %v12587_v12 = vld [vmem:[%s13218_s1 + $0xab4] ss:$12 sps:$4 sm:$0xff]  }
 0x285   : > { %10476 = vmatpush1.bf16.msra.mxu1 %v12568_v48 }
 0x286   : > { %10478 = vmatprep.subr.bf16.mxu1 %v12569_v2 }
 0x289   : > { %10480 = vmatpush1.bf16.msra.mxu1 %v12571_v10  ;;  %v12593_v10 = vld [vmem:[%s13218_s1 + $0xae4] ss:$12 sps:$4 sm:$0xff]  }
 0x28a   : > { %v9357_v62 = vpop.f32.mrb[96].mxu0  ;;  %10482 = vmatprep.subr.bf16.mxu1 %v12572_v49  ;;  %v12596_v49 = vld [vmem:[%s13218_s1 + $0xafc] ss:$12 sps:$4 sm:$0xff]  }
 0x28b   : > { %v9358_v33 = vpop.f32.mrb[97].mxu0 }
 0x28c   : > { %v9359_v54 = vadd.f32 %v9358_v33, %v9357_v62  ;;  %v12602_v62 = vld [vmem:[%s13218_s1 + $0xb2c] ss:$12 sps:$4 sm:$0xff]  }
 0x28d   : > { %10484 = vmatpush1.bf16.msra.mxu1 %v12574_v31 }
 0x28e   : > { %v14768_v24 = vadd.f32 %v9359_v54, %v4826_v21  ;;  %v9360_v3 = vpop.f32.mrb[98].mxu0  ;;  %10486 = vmatprep.subr.bf16.mxu1 %v12575_v25  ;;  %v12583_v21 = vld [vmem:[%s13218_s1 + $0xa80] ss:$12 sps:$4 sm:$0xff]   ;;  %v12604_v54 = vld [vmem:[%s13218_s1 + $0xb28] ss:$12 sps:$4 sm:$0xff]  }
 0x28f   : > { %v9361_v30 = vpop.f32.mrb[99].mxu0 }
 0x290   : > { %v9362_v7 = vadd.f32 %v9361_v30, %v9360_v3  ;;  %v12605_v3 = vld [vmem:[%s13218_s1 + $0xb44] ss:$12 sps:$4 sm:$0xff]   ;;  %v12607_v30 = vld [vmem:[%s13218_s1 + $0xb40] ss:$12 sps:$4 sm:$0xff]  }
 0x291   : > { %10488 = vmatpush1.bf16.msra.mxu1 %v12577_v57 }
 0x292   : > { %v14772_v55 = vadd.f32 %v9362_v7, %v4831_v27  ;;  %v9363_v61 = vpop.f32.mrb[100].mxu0  ;;  %10490 = vmatprep.subr.bf16.mxu1 %v12578_v1 }
 0x293   : > { %v9364_v8 = vpop.f32.mrb[101].mxu0 }
 0x294   : > { %v9365_v63 = vadd.f32 %v9364_v8, %v9363_v61  ;;  %v12610_v8 = vld [vmem:[%s13218_s1 + $0xb58] ss:$12 sps:$4 sm:$0xff]  }
 0x295   : > { %10492 = vmatpush1.bf16.msra.mxu1 %v12580_v53  ;;  %v12608_v53 = vld [vmem:[%s13218_s1 + $0xb5c] ss:$12 sps:$4 sm:$0xff]  }
 0x296   : > { %v14776_v39 = vadd.f32 %v9365_v63, %v4836_v59  ;;  %v9366_v29 = vpop.f32.mrb[102].mxu0  ;;  %10494 = vmatprep.subr.bf16.mxu1 %v12581_v50 }
 0x297   : > { %v9367_v17 = vpop.f32.mrb[103].mxu0 }
 0x298   : > { %4432 = vmatmul.mubr.f32.vlgmr.msra.gmra.mrb[48].mxu1 %v14500_v35  ;;  %v9368_v27 = vadd.f32 %v9367_v17, %v9366_v29  ;;  %v12589_v35 = vld [vmem:[%s13218_s1 + $0xab0] ss:$12 sps:$4 sm:$0xff]  }
 0x299   : > { %4437 = vmatprep.mubr.f32.mxu1 %v14513_v22  ;;  %10496 = vmatpush1.bf16.msra.mxu1 %v12583_v21  ;;  %v12611_v21 = vld [vmem:[%s13218_s1 + $0xb74] ss:$12 sps:$4 sm:$0xff]  }
 0x29a   : > { %v14782_v15 = vadd.f32 %v9368_v27, %v4841_v46  ;;  %v9369_v42 = vpop.f32.mrb[104].mxu0  ;;  %10498 = vmatprep.subr.bf16.mxu1 %v12584_v52  ;;  %v12590_v46 = vld [vmem:[%s13218_s1 + $0xacc] ss:$12 sps:$4 sm:$0xff]  }
 0x29b   : > { %v9370_v59 = vpop.f32.mrb[105].mxu0 }
 0x29c   : > { %4438 = vmatmul.mubr.f32.gmra.mrb[50].mxu1 %v14523_v32  ;;  %v9371_v16 = vadd.f32 %v9370_v59, %v9369_v42  ;;  %v12592_v32 = vld [vmem:[%s13218_s1 + $0xac8] ss:$12 sps:$4 sm:$0xff]  }
 0x29d   : > { %4443 = vmatprep.mubr.f32.mxu1 %v14535_v36  ;;  %10500 = vmatpush1.bf16.msra.mxu1 %v12586_v40  ;;  %v12614_v40 = vld [vmem:[%s13218_s1 + $0xb8c] ss:$12 sps:$4 sm:$0xff]  }
 0x29e   : > { %v14788_v11 = vadd.f32 %v9371_v16, %v4846_v43  ;;  %v9372_v22 = vpop.f32.mrb[106].mxu0  ;;  %10502 = vmatprep.subr.bf16.mxu1 %v12587_v12  ;;  %v12595_v43 = vld [vmem:[%s13218_s1 + $0xae0] ss:$12 sps:$4 sm:$0xff]   ;;  %v12617_v16 = vld [vmem:[%s13218_s1 + $0xba4] ss:$12 sps:$4 sm:$0xff]  }
 0x29f   : > { %v9373_v48 = vpop.f32.mrb[107].mxu0 }
 0x2a0   : > { %4444 = vmatmul.mubr.f32.gmra.mrb[52].mxu1 %v14543_v34  ;;  %v9374_v2 = vadd.f32 %v9373_v48, %v9372_v22  ;;  %v12598_v34 = vld [vmem:[%s13218_s1 + $0xaf8] ss:$12 sps:$4 sm:$0xff]   ;;  %v12620_v22 = vld [vmem:[%s13218_s1 + $0xbbc] ss:$12 sps:$4 sm:$0xff]  }
 0x2a1   : > { %4449 = vmatprep.mubr.f32.mxu1 %v14555_v5  ;;  %10504 = vmatpush1.bf16.msra.mxu1 %v12589_v35  ;;  %v12619_v35 = vld [vmem:[%s13218_s1 + $0xba0] ss:$12 sps:$4 sm:$0xff]  }
 0x2a2   : > { %v4946_v36 = vadd.f32 %v9374_v2, %v4851_v38  ;;  %10506 = vmatprep.subr.bf16.mxu1 %v12590_v46  ;;  %v12599_v38 = vld [vmem:[%s13218_s1 + $0xb14] ss:$12 sps:$4 sm:$0xff]   ;;  %v12622_v46 = vld [vmem:[%s13218_s1 + $0xbb8] ss:$12 sps:$4 sm:$0xff]  }
 0x2a4   : > { %4450 = vmatmul.mubr.f32.gmra.mrb[54].mxu1 %v14565_v60 }
 0x2a5   : > { %4455 = vmatprep.mubr.f32.mxu1 %v14577_v13  ;;  %10508 = vmatpush1.bf16.msra.mxu1 %v12592_v32  ;;  %v12601_v13 = vld [vmem:[%s13218_s1 + $0xb10] ss:$12 sps:$4 sm:$0xff]  }
 0x2a6   : > { %10510 = vmatprep.subr.bf16.mxu1 %v12593_v10  ;;  %v12625_v10 = vld [vmem:[%s13218_s1 + $0xbd0] ss:$12 sps:$4 sm:$0x1f]  }
 0x2a8   : > { %4456 = vmatmul.mubr.f32.gmra.mrb[56].mxu1 %v14585_v58 }
 0x2a9   : > { %4461 = vmatprep.mubr.f32.mxu1 %v14595_v14  ;;  %10512 = vmatpush1.bf16.msra.mxu1 %v12595_v43 }
 0x2aa   : > { %v9407_v5 = vpop.f32.mrb[108].mxu0  ;;  %10514 = vmatprep.subr.bf16.mxu1 %v12596_v49 }
 0x2ab   : > { %v9408_v31 = vpop.f32.mrb[109].mxu0 }
 0x2ac   : > { %4462 = vmatmul.mubr.f32.gmra.mrb[58].mxu1 %v14603_v9  ;;  %v9409_v60 = vadd.f32 %v9408_v31, %v9407_v5 }
 0x2ad   : > { %10516 = vmatpush1.bf16.msra.mxu1 %v12598_v34  ;;  %8564 = vmatprep.mubr.msk.f32.mxu1 %vm3738_vm6, %v14613_v26 }
 0x2ae   : > { %v5016_v58 = vadd.f32 %v9409_v60, %v14768_v24  ;;  %v9410_v14 = vpop.f32.mrb[110].mxu0  ;;  %10518 = vmatprep.subr.bf16.mxu1 %v12599_v38 }
 0x2af   : > { %v9411_v25 = vpop.f32.mrb[111].mxu0 }
 0x2b0   : > { %v9412_v33 = vadd.f32 %v9411_v25, %v9410_v14 }
 0x2b1   : > { %10520 = vmatpush1.bf16.msra.mxu1 %v12601_v13 }
 0x2b2   : > { %v5021_v9 = vadd.f32 %v9412_v33, %v14772_v55  ;;  %v9413_v57 = vpop.f32.mrb[112].mxu0  ;;  %10522 = vmatprep.subr.bf16.mxu1 %v12602_v62 }
 0x2b3   : > { %v9414_v1 = vpop.f32.mrb[113].mxu0 }
 0x2b4   : > { %v9415_v26 = vadd.f32 %v9414_v1, %v9413_v57 }
 0x2b5   : > { %10524 = vmatpush1.bf16.msra.mxu1 %v12604_v54 }
 0x2b6   : > { %v5026_v24 = vadd.f32 %v9415_v26, %v14776_v39  ;;  %v9416_v7 = vpop.f32.mrb[114].mxu0  ;;  %10526 = vmatprep.subr.bf16.mxu1 %v12605_v3  ;;  %v12613_v39 = vld [vmem:[%s13218_s1 + $0xb70] ss:$12 sps:$4 sm:$0xff]  }
 0x2b7   : > { %v9417_v61 = vpop.f32.mrb[115].mxu0 }
 0x2b8   : > { %v9418_v50 = vadd.f32 %v9417_v61, %v9416_v7 }
 0x2b9   : > { %10528 = vmatpush1.bf16.msra.mxu1 %v12607_v30 }
 0x2ba   : > { %v5031_v55 = vadd.f32 %v9418_v50, %v14782_v15  ;;  %v9419_v63 = vpop.f32.mrb[116].mxu0  ;;  %10530 = vmatprep.subr.bf16.mxu1 %v12608_v53  ;;  %v12616_v15 = vld [vmem:[%s13218_s1 + $0xb88] ss:$12 sps:$4 sm:$0xff]  }
 0x2bb   : > { %v9420_v29 = vpop.f32.mrb[117].mxu0 }
 0x2bc   : > { %v9421_v52 = vadd.f32 %v9420_v29, %v9419_v63 }
 0x2bd   : > { %10532 = vmatpush1.bf16.msra.mxu1 %v12610_v8 }
 0x2be   : > { %v5036_v17 = vadd.f32 %v9421_v52, %v14788_v11  ;;  %v9422_v27 = vpop.f32.mrb[118].mxu0  ;;  %10534 = vmatprep.subr.bf16.mxu1 %v12611_v21  ;;  %v12623_v11 = vld [vmem:[%s13218_s1 + $0xbd4] ss:$12 sps:$4 sm:$0x1f]   ;;  %s11927_s1 = smul.u32 664, %s15622_s26 }
 0x2bf   : > { %v9423_v42 = vpop.f32.mrb[119].mxu0 }
 0x2c0   : > { %v9424_v12 = vadd.f32 %v9423_v42, %v9422_v27  ;;  %s14858_s25 = scalar_lea.vmem %s15613_s30, %s11927_s1  ;;  %s957_s30 = scalar_lea.vmem %s15619_s7, %s15204_s6 }
 0x2c1   : > { %10536 = vmatpush1.bf16.msra.mxu1 %v12613_v39  ;;  %s968_s7 = scalar_lea.vmem %s15569_s11, %s15622_s26  ;;  %s1001_s1 = scalar_lea.vmem %s15582_s24, %s15204_s6 }
 0x2c2   : > { %v5041_v59 = vadd.f32 %v9424_v12, %v4946_v36  ;;  %10538 = vmatprep.subr.bf16.mxu1 %v12614_v40 }
 0x2c5   : > { %10540 = vmatpush1.bf16.msra.mxu1 %v12616_v15 }
 0x2c6   : > { %10542 = vmatprep.subr.bf16.mxu1 %v12617_v16 }
 0x2c9   : > { %10544 = vmatpush1.bf16.msra.mxu1 %v12619_v35 }
 0x2ca   : > { %10546 = vmatprep.subr.bf16.mxu1 %v12620_v22 }
 0x2cb   : > { %v9457_v48 = vpop.f32.mrb[120].mxu0 }
 0x2cc   : > { %v9458_v2 = vpop.f32.mrb[121].mxu0 }
 0x2cd   : > { %v9459_v32 = vadd.f32 %v9458_v2, %v9457_v48  ;;  %10548 = vmatpush1.bf16.msra.mxu1 %v12622_v46 }
 0x2ce   : > { %10551 = vmatprep.subr.msk.bf16.mxu1 %vm14655_vm8, %v12623_v11 }
 0x2cf   : > { %v5111_v43 = vadd.f32 %v9459_v32, %v5016_v58  ;;  %v9460_v36 = vpop.f32.mrb[122].mxu0 }
 0x2d0   : > { %v9461_v49 = vpop.f32.mrb[123].mxu0 }
 0x2d1   : > { %v9462_v34 = vadd.f32 %v9461_v49, %v9460_v36  ;;  %10554 = vmatpush1.bf16.msk.msra.mxu1 %vm14655_vm8, %v12625_v10  ;;  %vm7170_vm8 = vcmask 982016  }
 0x2d3   : > { %v5116_v5 = vadd.f32 %v9462_v34, %v5021_v9  ;;  %v9463_v38 = vpop.f32.mrb[124].mxu0 }
 0x2d4   : > { %4533 = vmatmul.mubr.f32.vlgmr.msra.gmra.mrb[48].mxu1 %v14312_v19  ;;  %v9464_v31 = vpop.f32.mrb[125].mxu0 }
 0x2d5   : > { %v9465_v60 = vadd.f32 %v9464_v31, %v9463_v38  ;;  %8565 = vmatprep.mubr.msk.f32.mxu1 %vm3738_vm6, %v14664_v28 }
 0x2d7   : > { %v5121_v13 = vadd.f32 %v9465_v60, %v5026_v24  ;;  %v9466_v14 = vpop.f32.mrb[126].mxu0 }
 0x2d8   : > { %4539 = vmatmul.mubr.f32.gmra.mrb[50].mxu1 %v14675_v18  ;;  %v9467_v58 = vpop.f32.mrb[127].mxu0 }
 0x2d9   : > { %v9468_v62 = vadd.f32 %v9467_v58, %v9466_v14  ;;  %8566 = vmatprep.mubr.msk.f32.mxu1 %vm3738_vm6, %v14678_v41 }
 0x2db   : > { %v5126_v4 = vadd.f32 %v9468_v62, %v5031_v55  ;;  %v9469_v25 = vpop.f32.mrb[128].mxu0 }
 0x2dc   : > { %4545 = vmatmul.mubr.f32.gmra.mrb[52].mxu1 %v14690_v44  ;;  %v9470_v33 = vpop.f32.mrb[129].mxu0 }
 0x2dd   : > { %v9471_v19 = vadd.f32 %v9470_v33, %v9469_v25  ;;  %8567 = vmatprep.mubr.msk.f32.mxu1 %vm3738_vm6, %v14693_v20 }
 0x2df   : > { %v5131_v54 = vadd.f32 %v9471_v19, %v5036_v17  ;;  %v9472_v28 = vpop.f32.mrb[130].mxu0 }
 0x2e0   : > { %4551 = vmatmul.mubr.f32.gmra.mrb[54].mxu1 %v14705_v23  ;;  %v9473_v9 = vpop.f32.mrb[131].mxu0 }
 0x2e1   : > { %v9474_v18 = vadd.f32 %v9473_v9, %v9472_v28  ;;  %8568 = vmatprep.mubr.msk.f32.mxu1 %vm3738_vm6, %v14708_v6 }
 0x2e3   : > { %v5136_v57 = vadd.f32 %v9474_v18, %v5041_v59 }
 0x2e4   : > { %4557 = vmatmul.mubr.f32.gmra.mrb[56].mxu1 %v14720_v51 }
 0x2e5   : > { %8569 = vmatprep.mubr.msk.f32.mxu1 %vm3738_vm6, %v14723_v37  ;;  %vm6706_vm6 = vcmask 1042432  }
 0x2e8   : > { %4563 = vmatmul.mubr.f32.gmra.mrb[58].mxu1 %v14735_v56 }
 0x2eb   : > { %v9507_v41 = vpop.f32.mrb[132].mxu0 }
 0x2ec   : > { %v9508_v44 = vpop.f32.mrb[133].mxu0 }
 0x2ed   : > { %v9509_v20 = vadd.f32 %v9508_v44, %v9507_v41 }
 0x2ef   : > { %v9510_v3 = vpop.f32.mrb[134].mxu0  ;;  %v5206_v1 = vadd.f32 %v9509_v20, %v5111_v43 }
 0x2f0   : > { %v9511_v26 = vpop.f32.mrb[135].mxu0 }
 0x2f1   : > { %v9512_v23 = vadd.f32 %v9511_v26, %v9510_v3 }
 0x2f3   : > { %v9513_v30 = vpop.f32.mrb[136].mxu0  ;;  %v5211_v24 = vadd.f32 %v9512_v23, %v5116_v5 }
 0x2f4   : > { %v9514_v7 = vpop.f32.mrb[137].mxu0 }
 0x2f5   : > { %v9515_v53 = vadd.f32 %v9514_v7, %v9513_v30  ;;  %v14864_v7 = vsub.s32 1, %v14332_v47 }
 0x2f7   : > { %v9516_v6 = vpop.f32.mrb[138].mxu0  ;;  %v5216_v61 = vadd.f32 %v9515_v53, %v5121_v13  ;;  %v12907_v53 = vld [vmem:[%s14342_s0] sm:$0x7]  ;;  %s15620_s0 = smov 74  }
 0x2f8   : > { %v9517_v50 = vpop.f32.mrb[139].mxu0 }
 0x2f9   : > { %v9518_v51 = vadd.f32 %v9517_v50, %v9516_v6 }
 0x2fb   : > { %v9519_v8 = vpop.f32.mrb[140].mxu0  ;;  %v5221_v55 = vadd.f32 %v9518_v51, %v5126_v4 }
 0x2fc   : > { %v9520_v37 = vpop.f32.mrb[141].mxu0 }
 0x2fd   : > { %v9521_v63 = vadd.f32 %v9520_v37, %v9519_v8 }
 0x2ff   : > { %v9522_v56 = vpop.f32.mrb[142].mxu0  ;;  %v5226_v21 = vadd.f32 %v9521_v63, %v5131_v54 }
 0x300   : > { %v9523_v29 = vpop.f32.mrb[143].mxu0 }
 0x301   : > { %v9524_v52 = vadd.f32 %v9523_v29, %v9522_v56 }
 0x303   : > { %v5231_v39 = vadd.f32 %v9524_v52, %v5136_v57 }
 0x327   : > { %v5300_v17 = vpop.f32.mrb[144].mxu0 }
 0x328   : > { %v5301_v27 = vadd.f32 %v5300_v17, %v5206_v1  ;;  %v5302_v40 = vpop.f32.mrb[145].mxu0 }
 0x32a   : > { %v8579_v42 = vmul.f32 -1.442695, %v5301_v27 }
 0x32b   : > { %v5305_v12 = vpop.f32.mrb[146].mxu0 }
 0x32c   : > { %12781 = vpow2.f32 %v8579_v42  ;;  %v5306_v15 = vadd.f32 %v5305_v12, %v5211_v24  ;;  %v5307_v59 = vpop.f32.mrb[147].mxu0  ;;  %v14861_v24 = vsub.s32 0, %v14332_v47 }
 0x32e   : > { %v8582_v16 = vmul.f32 -1.442695, %v5306_v15  ;;  %v3726_v6 = vrot.slane %v12907_v53, %v14861_v24 }
 0x32f   : > { %v5310_v35 = vpop.f32.mrb[148].mxu0 }
 0x330   : > { %12783 = vpow2.f32 %v8582_v16  ;;  %v5311_v22 = vadd.f32 %v5310_v35, %v5216_v61  ;;  %v5312_v46 = vpop.f32.mrb[149].mxu0  ;;  %v3730_v61 = vrot.slane %v12907_v53, %v14864_v7 }
 0x332   : > { %v8585_v11 = vmul.f32 -1.442695, %v5311_v22 }
 0x333   : > { %v5315_v48 = vpop.f32.mrb[150].mxu0 }
 0x334   : > { %12785 = vpow2.f32 %v8585_v11  ;;  %v5316_v2 = vadd.f32 %v5315_v48, %v5221_v55  ;;  %v5317_v32 = vpop.f32.mrb[151].mxu0 }
 0x336   : > { %v12782_v10 = vpop.eup %12781  ;;  %v8588_v43 = vmul.f32 -1.442695, %v5316_v2 }
 0x337   : > { %v5385_v36 = vadd.f32 1.0, %v12782_v10  ;;  %v5320_v49 = vpop.f32.mrb[152].mxu0 }
 0x338   : > { %12787 = vpow2.f32 %v8588_v43  ;;  %v5321_v34 = vadd.f32 %v5320_v49, %v5226_v21  ;;  %v5322_v5 = vpop.f32.mrb[153].mxu0 }
 0x339   : > { %12789 = vrcp.f32 %v5385_v36 }
 0x33a   : > { %v12784_v38 = vpop.eup %12783  ;;  %v8591_v31 = vmul.f32 -1.442695, %v5321_v34 }
 0x33b   : > { %v5388_v60 = vadd.f32 1.0, %v12784_v38  ;;  %v5325_v13 = vpop.f32.mrb[154].mxu0 }
 0x33c   : > { %12791 = vpow2.f32 %v8591_v31  ;;  %v5326_v14 = vadd.f32 %v5325_v13, %v5231_v39  ;;  %v5327_v58 = vpop.f32.mrb[155].mxu0 }
 0x33d   : > { %12793 = vrcp.f32 %v5388_v60 }
 0x33e   : > { %v12786_v62 = vpop.eup %12785  ;;  %v8594_v4 = vmul.f32 -1.442695, %v5326_v14 }
 0x33f   : > { %v5391_v25 = vadd.f32 1.0, %v12786_v62 }
 0x340   : > { %12795 = vpow2.f32 %v8594_v4 }
 0x341   : > { %12797 = vrcp.f32 %v5391_v25 }
 0x342   : > { %v12788_v33 = vpop.eup %12787 }
 0x343   : > { %v5394_v19 = vadd.f32 1.0, %v12788_v33  ;;  %v12790_v54 = vpop.eup %12789 }
 0x345   : > { %12799 = vrcp.f32 %v5394_v19 }
 0x346   : > { %v12792_v28 = vpop.eup %12791 }
 0x347   : > { %v12794_v9 = vpop.eup %12793  ;;  %v5397_v18 = vadd.f32 1.0, %v12792_v28 }
 0x348   : > { %v14848_v57 = vpack.c.bf16 %v12794_v9, %v12790_v54 }
 0x349   : > { %12801 = vrcp.f32 %v5397_v18 }
 0x34a   : > { %v12796_v41 = vpop.eup %12795 }
 0x34b   : > { %v5400_v44 = vadd.f32 1.0, %v12796_v41  ;;  %v12798_v20 = vpop.eup %12797 }
 0x34d   : > { %12803 = vrcp.f32 %v5400_v44 }
 0x34f   : > { %v12800_v3 = vpop.eup %12799 }
 0x350   : > { %v14850_v1 = vpack.c.bf16 %v12800_v3, %v12798_v20 }
 0x353   : > { %v12802_v26 = vpop.eup %12801 }
 0x357   : > { %v12804_v23 = vpop.eup %12803 }
 0x358   : > { %v14852_v30 = vpack.c.bf16 %v12804_v23, %v12802_v26 }
 0x3a7   : > { %v4534_v50 = vpop.f32.mrb[48].mxu1 }
 0x3a8   : > { %v11331_v51 = vadd.f32 %v4534_v50, %v3726_v6  ;;  %v4536_v8 = vpop.f32.mrb[49].mxu1 }
 0x3a9   : > { %v11332_v55 = vadd.f32 %v4536_v8, %v3730_v61 }
 0x3aa   : > { %v8577_v37 = vmul.f32 -1.442695, %v11331_v51 }
 0x3ab   : > { %v8578_v63 = vmul.f32 -1.442695, %v11332_v55  ;;  %v4540_v56 = vpop.f32.mrb[50].mxu1 }
 0x3ac   : > { %12805 = vpow2.f32 %v8577_v37  ;;  %v11333_v21 = vadd.f32 %v4540_v56, %v3726_v6  ;;  %v4542_v29 = vpop.f32.mrb[51].mxu1 }
 0x3ad   : > { %12807 = vpow2.f32 %v8578_v63  ;;  %v11334_v52 = vadd.f32 %v4542_v29, %v3730_v61 }
 0x3ae   : > { %v8580_v39 = vmul.f32 -1.442695, %v11333_v21 }
 0x3af   : > { %v8581_v47 = vmul.f32 -1.442695, %v11334_v52  ;;  %v4546_v17 = vpop.f32.mrb[52].mxu1 }
 0x3b0   : > { %12809 = vpow2.f32 %v8580_v39  ;;  %v11335_v27 = vadd.f32 %v4546_v17, %v3726_v6  ;;  %v4548_v40 = vpop.f32.mrb[53].mxu1 }
 0x3b1   : > { %12811 = vpow2.f32 %v8581_v47  ;;  %v11336_v42 = vadd.f32 %v4548_v40, %v3730_v61 }
 0x3b2   : > { %v8583_v12 = vmul.f32 -1.442695, %v11335_v27 }
 0x3b3   : > { %v8584_v15 = vmul.f32 -1.442695, %v11336_v42  ;;  %v4552_v59 = vpop.f32.mrb[54].mxu1 }
 0x3b4   : > { %12813 = vpow2.f32 %v8583_v12  ;;  %v11337_v16 = vadd.f32 %v4552_v59, %v3726_v6  ;;  %v4554_v35 = vpop.f32.mrb[55].mxu1 }
 0x3b5   : > { %v11338_v22 = vadd.f32 %v4554_v35, %v3730_v61  ;;  %12815 = vpow2.f32 %v8584_v15  ;;  %v12686_v35 = vld [vmem:[%s14858_s25 + $0x144] ss:$8 sps:$4 sm:$0xff]  }
 0x3b6   : > { %v12806_v46 = vpop.eup %12805  ;;  %v8586_v11 = vmul.f32 -1.442695, %v11337_v16 }
 0x3b7   : > { %v12808_v48 = vpop.eup %12807  ;;  %v5383_v2 = vadd.f32 1.0, %v12806_v46  ;;  %v8587_v32 = vmul.f32 -1.442695, %v11338_v22  ;;  %v4558_v10 = vpop.f32.mrb[56].mxu1  ;;  %v8683_v22 = vld [vmem:[%s15616_s27] sm:$0xff]  }
 0x3b8   : > { %v5384_v43 = vadd.f32 1.0, %v12808_v48  ;;  %12817 = vpow2.f32 %v8586_v11  ;;  %v11339_v36 = vadd.f32 %v4558_v10, %v3726_v6  ;;  %v4560_v49 = vpop.f32.mrb[57].mxu1  ;;  %v8684_v11 = vunpack.c.l.bf16 %v8683_v22  ;;  %v8604_v10 = vld [vmem:[%s15616_s27 + $0xc] sm:$0xff]  }
 0x3b9   : > { %12819 = vrcp.f32 %v5383_v2  ;;  %v11340_v34 = vadd.f32 %v4560_v49, %v3730_v61  ;;  %v8685_v48 = vunpack.c.h.bf16 %v8683_v22  ;;  %v5439_v2 = vld [vmem:[%s15616_s27 + $0x8] sm:$0x7]  ;;  %v8606_v49 = vld [vmem:[%s15616_s27 + $0x14] sm:$0x7] }
 0x3ba   : > { %v12810_v5 = vpop.eup %12809  ;;  %12821 = vrcp.f32 %v5384_v43  ;;  %v8589_v38 = vmul.f32 -1.442695, %v11339_v36  ;;  %v5630_v43 = vunpack.c.l.bf16 %v8604_v10  ;;  %v5631_v36 = vunpack.c.h.bf16 %v8604_v10 }
 0x3bb   : > { %v12812_v31 = vpop.eup %12811  ;;  %v5386_v60 = vadd.f32 1.0, %v12810_v5  ;;  %12823 = vpow2.f32 %v8587_v32  ;;  %v8590_v13 = vmul.f32 -1.442695, %v11340_v34  ;;  %v4564_v14 = vpop.f32.mrb[58].mxu1  ;;  %v5442_v32 = vunpack.c.l.bf16 %v5439_v2  ;;  %v12628_v5 = vld [vmem:[%s14858_s25] ss:$8 sps:$4 sm:$0xff]  }
 0x3bc   : > { %v5387_v58 = vadd.f32 1.0, %v12812_v31  ;;  %12825 = vpow2.f32 %v8589_v38  ;;  %v11341_v62 = vadd.f32 %v4564_v14, %v3726_v6  ;;  %v4566_v4 = vpop.f32.mrb[59].mxu1  ;;  %v5632_v34 = vunpack.c.l.bf16 %v8606_v49  ;;  %v12631_v38 = vld [vmem:[%s14858_s25 + $0x10] ss:$8 sps:$4 sm:$0xff]   ;;  %v12634_v31 = vld [vmem:[%s14858_s25 + $0x20] ss:$8 sps:$4 sm:$0xff]  }
 0x3bd   : > { %12827 = vrcp.f32 %v5386_v60  ;;  %v11342_v25 = vadd.f32 %v4566_v4, %v3730_v61  ;;  %v12635_v60 = vld [vmem:[%s14858_s25 + $0x34] ss:$8 sps:$4 sm:$0xff]   ;;  %v12638_v14 = vld [vmem:[%s14858_s25 + $0x44] ss:$8 sps:$4 sm:$0xff]   ;;  %v12643_v4 = vld [vmem:[%s14858_s25 + $0x50] ss:$8 sps:$4 sm:$0xff]  }
 0x3be   : > { %v12814_v33 = vpop.eup %12813  ;;  %12829 = vrcp.f32 %v5387_v58  ;;  %v8592_v19 = vmul.f32 -1.442695, %v11341_v62  ;;  %v12640_v58 = vld [vmem:[%s14858_s25 + $0x40] ss:$8 sps:$4 sm:$0xff]   ;;  %v12641_v62 = vld [vmem:[%s14858_s25 + $0x54] ss:$8 sps:$4 sm:$0xff]  }
 0x3bf   : > { %12831 = vpow2.f32 %v8590_v13  ;;  %v8593_v54 = vmul.f32 -1.442695, %v11342_v25  ;;  %v12816_v28 = vpop.eup %12815  ;;  %v5389_v9 = vadd.f32 1.0, %v12814_v33  ;;  %v12637_v13 = vld [vmem:[%s14858_s25 + $0x30] ss:$8 sps:$4 sm:$0xff]  }
 0x3c0   : > { %12833 = vpow2.f32 %v8592_v19  ;;  %v5390_v44 = vadd.f32 1.0, %v12816_v28  ;;  %v12644_v25 = vld [vmem:[%s14858_s25 + $0x64] ss:$8 sps:$4 sm:$0xff]   ;;  %v12646_v33 = vld [vmem:[%s14858_s25 + $0x60] ss:$8 sps:$4 sm:$0xff]  }
 0x3c1   : > { %12835 = vpow2.f32 %v8593_v54  ;;  %v12647_v19 = vld [vmem:[%s14858_s25 + $0x74] ss:$8 sps:$4 sm:$0xff]   ;;  %v12649_v54 = vld [vmem:[%s14858_s25 + $0x70] ss:$8 sps:$4 sm:$0xff]   ;;  %v12650_v28 = vld [vmem:[%s14858_s25 + $0x84] ss:$8 sps:$4 sm:$0xff]  }
 0x3c2   : > { %v12818_v18 = vpop.eup %12817  ;;  %12837 = vrcp.f32 %v5389_v9  ;;  %v12652_v9 = vld [vmem:[%s14858_s25 + $0x80] ss:$8 sps:$4 sm:$0xff]  }
 0x3c3   : > { %v12820_v41 = vpop.eup %12819  ;;  %v5392_v20 = vadd.f32 1.0, %v12818_v18  ;;  %v12653_v18 = vld [vmem:[%s14858_s25 + $0x94] ss:$8 sps:$4 sm:$0xff]   ;;  %v12694_v49 = vld [vmem:[%s14858_s25 + $0x160] ss:$8 sps:$4 sm:$0xff]  }
 0x3c4   : > { %v12822_v3 = vpop.eup %12821 }
 0x3c5   : > { %v12824_v26 = vpop.eup %12823  ;;  %12839 = vrcp.f32 %v5392_v20  ;;  %v12658_v20 = vld [vmem:[%s14858_s25 + $0xa0] ss:$8 sps:$4 sm:$0xff]  }
 0x3c6   : > { %v12826_v23 = vpop.eup %12825  ;;  %v5393_v53 = vadd.f32 1.0, %v12824_v26  ;;  %12841 = vrcp.f32 %v5390_v44  ;;  %v12656_v44 = vld [vmem:[%s14858_s25 + $0xa4] ss:$8 sps:$4 sm:$0xff]   ;;  %v12661_v26 = vld [vmem:[%s14858_s25 + $0xb0] ss:$8 sps:$4 sm:$0xff]  }
 0x3c7   : > { %v12828_v6 = vpop.eup %12827  ;;  %v5395_v50 = vadd.f32 1.0, %v12826_v23  ;;  %v12662_v23 = vld [vmem:[%s14858_s25 + $0xc4] ss:$8 sps:$4 sm:$0xff]  }
 0x3c8   : > { %v12830_v61 = vpop.eup %12829  ;;  %12843 = vrcp.f32 %v5393_v53  ;;  %v10827_v51 = vpack.c.bf16 %v12828_v6, %v12820_v41  ;;  %v12655_v41 = vld [vmem:[%s14858_s25 + $0x90] ss:$8 sps:$4 sm:$0xff]   ;;  %v12664_v53 = vld [vmem:[%s14858_s25 + $0xc0] ss:$8 sps:$4 sm:$0xff]   ;;  %v12665_v6 = vld [vmem:[%s14858_s25 + $0xd4] ss:$8 sps:$4 sm:$0xff]  }
 0x3c9   : > { %v12832_v8 = vpop.eup %12831  ;;  %v10825_v55 = vpack.c.bf16 %v12830_v61, %v12822_v3  ;;  %12845 = vrcp.f32 %v5395_v50  ;;  %v12659_v3 = vld [vmem:[%s14858_s25 + $0xb4] ss:$8 sps:$4 sm:$0xff]   ;;  %v12667_v61 = vld [vmem:[%s14858_s25 + $0xd0] ss:$8 sps:$4 sm:$0xff]   ;;  %v12668_v50 = vld [vmem:[%s14858_s25 + $0xe4] ss:$8 sps:$4 sm:$0xff]  }
 0x3ca   : > { %v12834_v37 = vpop.eup %12833  ;;  %v5396_v63 = vadd.f32 1.0, %v12832_v8  ;;  %v12671_v8 = vld [vmem:[%s14858_s25 + $0xf4] ss:$8 sps:$4 sm:$0xff]  }
 0x3cb   : > { %v5398_v56 = vadd.f32 1.0, %v12834_v37  ;;  %10826 = vmatprep.subr.bf16.mxu0 %v10825_v55  ;;  %v12836_v21 = vpop.eup %12835  ;;  %v12674_v37 = vld [vmem:[%s14858_s25 + $0x104] ss:$8 sps:$4 sm:$0xff]  }
 0x3cc   : > { %10828 = vmatpush1.bf16.msra.mxu0 %v10827_v51  ;;  %v12838_v29 = vpop.eup %12837  ;;  %v5399_v52 = vadd.f32 1.0, %v12836_v21 }
 0x3cd   : > { %12847 = vrcp.f32 %v5398_v56  ;;  %v12676_v56 = vld [vmem:[%s14858_s25 + $0x100] ss:$8 sps:$4 sm:$0xff]  }
 0x3ce   : > { %12849 = vrcp.f32 %v5396_v63 }
 0x3cf   : > { %v12840_v39 = vpop.eup %12839  ;;  %12851 = vrcp.f32 %v5399_v52 }
 0x3d0   : > { %v10831_v47 = vpack.c.bf16 %v12840_v39, %v12838_v29  ;;  %v12842_v17 = vpop.eup %12841  ;;  %v12677_v29 = vld [vmem:[%s14858_s25 + $0x114] ss:$8 sps:$4 sm:$0xff]   ;;  %v12679_v39 = vld [vmem:[%s14858_s25 + $0x110] ss:$8 sps:$4 sm:$0xff]  }
 0x3d2   : > { %v12844_v27 = vpop.eup %12843 }
 0x3d3   : > { %v10829_v40 = vpack.c.bf16 %v12844_v27, %v12842_v17  ;;  %v12846_v42 = vpop.eup %12845  ;;  %v12680_v17 = vld [vmem:[%s14858_s25 + $0x124] ss:$8 sps:$4 sm:$0xff]  }
 0x3d5   : > { %10830 = vmatprep.subr.bf16.mxu0 %v10829_v40 }
 0x3d6   : > { %10832 = vmatpush1.bf16.msra.mxu0 %v10831_v47 }
 0x3d7   : > { %v12848_v12 = vpop.eup %12847 }
 0x3d8   : > { %v10836_v15 = vpack.c.bf16 %v12848_v12, %v12846_v42  ;;  %v12850_v59 = vpop.eup %12849  ;;  %v12683_v12 = vld [vmem:[%s14858_s25 + $0x134] ss:$8 sps:$4 sm:$0xff]  }
 0x3d9   : > { %v12852_v16 = vpop.eup %12851 }
 0x3da   : > { %v10833_v46 = vpack.c.bf16 %v12852_v16, %v12850_v59  ;;  %v12685_v59 = vld [vmem:[%s14858_s25 + $0x130] ss:$8 sps:$4 sm:$0xff]  }
 0x3dc   : > { %10835 = vmatprep.subr.msk.bf16.mxu0 %vm14871_vm10, %v10833_v46 }
 0x3dd   : > { %10838 = vmatpush1.bf16.msk.msra.mxu0 %vm14871_vm10, %v10836_v15 }
 0x3de   : > { %10839 = vmatprep.subr.bf16.mxu0 %v12920_v0 }
 0x3e0   : > { %8597 = vmatmul.mubr.msk.f32.vlgmr.msra.gmra.mrb[156].mxu0 %vm5443_vm11, %v8684_v11 }
 0x3e1   : > { %10841 = vmatpush3.bf16.msra.mxu0 %v14848_v57  ;;  %5533 = vmatprep.mubr.f32.mxu0 %v15612_v45 }
 0x3e2   : > { %10842 = vmatprep.subr.bf16.mxu0 %v12920_v0 }
 0x3e4   : > { %8598 = vmatmul.mubr.msk.f32.gmra.mrb[158].mxu0 %vm5443_vm11, %v8685_v48 }
 0x3e5   : > { %10844 = vmatpush3.bf16.msra.mxu0 %v14850_v1  ;;  %5539 = vmatprep.mubr.f32.mxu0 %v15612_v45 }
 0x3e6   : > { %10845 = vmatprep.subr.bf16.mxu0 %v12920_v0 }
 0x3e8   : > { %8599 = vmatmul.mubr.msk.f32.gmra.mrb[160].mxu0 %vm5443_vm11, %v5442_v32 }
 0x3e9   : > { %10848 = vmatpush3.bf16.msk.msra.mxu0 %vm14871_vm10, %v14852_v30  ;;  %9705 = vmatprep.mubr.msk.f32.mxu0 %vm12921_vm12, %v15612_v45 }
 0x3ea   : > { %10850 = vmatprep.subr.bf16.mxu0 %v10825_v55  ;;  %v12673_v55 = vld [vmem:[%s14858_s25 + $0xf0] ss:$8 sps:$4 sm:$0xff]  }
 0x3ec   : > { %9706 = vmatmul.mubr.msk.f32.vlgmr.msra.gmra.mrb[162].mxu0 %vm5443_vm11, %v8684_v11 }
 0x3ed   : > { %10852 = vmatpush1.bf16.msra.mxu0 %v10827_v51  ;;  %9708 = vmatprep.mubr.msk.f32.mxu0 %vm12921_vm12, %v15612_v45  ;;  %v12670_v51 = vld [vmem:[%s14858_s25 + $0xe0] ss:$8 sps:$4 sm:$0xff]  }
 0x3ee   : > { %10854 = vmatprep.subr.bf16.mxu0 %v10829_v40  ;;  %v12682_v40 = vld [vmem:[%s14858_s25 + $0x120] ss:$8 sps:$4 sm:$0xff]  }
 0x3f0   : > { %9709 = vmatmul.mubr.msk.f32.gmra.mrb[164].mxu0 %vm5443_vm11, %v8685_v48  ;;  %v12689_v48 = vld [vmem:[%s14858_s25 + $0x154] ss:$8 sps:$4 sm:$0xff]  }
 0x3f1   : > { %10856 = vmatpush1.bf16.msra.mxu0 %v10831_v47  ;;  %9711 = vmatprep.mubr.msk.f32.mxu0 %vm12921_vm12, %v15612_v45 }
 0x3f2   : > { %10859 = vmatprep.subr.msk.bf16.mxu0 %vm14871_vm10, %v10833_v46  ;;  %v12688_v46 = vld [vmem:[%s14858_s25 + $0x140] ss:$8 sps:$4 sm:$0xff]  }
 0x3f4   : > { %9712 = vmatmul.mubr.msk.f32.gmra.mrb[166].mxu0 %vm5443_vm11, %v5442_v32  ;;  %v12691_v32 = vld [vmem:[%s14858_s25 + $0x150] ss:$8 sps:$4 sm:$0xff]  }
 0x3f5   : > { %10862 = vmatpush1.bf16.msk.msra.mxu0 %vm14871_vm10, %v10836_v15  ;;  %5706 = vmatprep.mubr.f32.mxu0 %v15612_v45 }
 0x3f6   : > { %10863 = vmatprep.subr.bf16.mxu0 %v12920_v0 }
 0x3f8   : > { %8609 = vmatmul.mubr.msk.f32.vlgmr.msra.gmra.mrb[168].mxu0 %vm5443_vm11, %v5630_v43 }
 0x3f9   : > { %10865 = vmatpush3.bf16.msra.mxu0 %v14848_v57  ;;  %5712 = vmatprep.mubr.f32.mxu0 %v15612_v45  ;;  %v12626_v57 = vld [vmem:[%s14858_s25 + $0x4] ss:$8 sps:$4 sm:$0xff]  }
 0x3fa   : > { %10866 = vmatprep.subr.bf16.mxu0 %v12920_v0 }
 0x3fc   : > { %8610 = vmatmul.mubr.msk.f32.gmra.mrb[170].mxu0 %vm5443_vm11, %v5631_v36 }
 0x3fd   : > { %10868 = vmatpush3.bf16.msra.mxu0 %v14850_v1  ;;  %5718 = vmatprep.mubr.f32.mxu0 %v15612_v45  ;;  %v12629_v1 = vld [vmem:[%s14858_s25 + $0x14] ss:$8 sps:$4 sm:$0xff]  }
 0x3fe   : > { %10869 = vmatprep.subr.bf16.mxu0 %v12920_v0 }
 0x400   : > { %8611 = vmatmul.mubr.msk.f32.gmra.mrb[172].mxu0 %vm5443_vm11, %v5632_v34 }
 0x401   : > { %10872 = vmatpush3.bf16.msk.msra.mxu0 %vm14871_vm10, %v14852_v30  ;;  %9726 = vmatprep.mubr.msk.f32.mxu0 %vm12921_vm12, %v15612_v45  ;;  %v12632_v30 = vld [vmem:[%s14858_s25 + $0x24] ss:$8 sps:$4 sm:$0xff]   ;;  %vm7391_vm10 = vcmask 850944  }
 0x402   : > { %10874 = vmatprep.subr.bf16.mxu0 %v12626_v57  ;;  %v12695_v57 = vld [vmem:[%s14858_s25 + $0x174] ss:$8 sps:$4 sm:$0xff]  }
 0x404   : > { %9727 = vmatmul.mubr.msk.f32.vlgmr.msra.gmra.mrb[174].mxu0 %vm5443_vm11, %v5630_v43  ;;  %v12692_v43 = vld [vmem:[%s14858_s25 + $0x164] ss:$8 sps:$4 sm:$0xff]  }
 0x405   : > { %9729 = vmatprep.mubr.msk.f32.mxu0 %vm12921_vm12, %v15612_v45  ;;  %10876 = vmatpush1.bf16.msra.mxu0 %v12628_v5 }
 0x406   : > { %10878 = vmatprep.subr.bf16.mxu0 %v12629_v1 }
 0x408   : > { %9730 = vmatmul.mubr.msk.f32.gmra.mrb[176].mxu0 %vm5443_vm11, %v5631_v36 }
 0x409   : > { %9732 = vmatprep.mubr.msk.f32.mxu0 %vm12921_vm12, %v15612_v45  ;;  %10880 = vmatpush1.bf16.msra.mxu0 %v12631_v38  ;;  %v12697_v38 = vld [vmem:[%s14858_s25 + $0x170] ss:$8 sps:$4 sm:$0xff]  }
 0x40a   : > { %10882 = vmatprep.subr.bf16.mxu0 %v12632_v30 }
 0x40c   : > { %9733 = vmatmul.mubr.msk.f32.gmra.mrb[178].mxu0 %vm5443_vm11, %v5632_v34  ;;  %vm7514_vm11 = vcmask 785408  }
 0x40d   : > { %10884 = vmatpush1.bf16.msra.mxu0 %v12634_v31  ;;  %v12698_v31 = vld [vmem:[%s14858_s25 + $0x184] ss:$8 sps:$4 sm:$0xff]  }
 0x40e   : > { %10886 = vmatprep.subr.bf16.mxu0 %v12635_v60 }
 0x411   : > { %10888 = vmatpush1.bf16.msra.mxu0 %v12637_v13 }
 0x412   : > { %10890 = vmatprep.subr.bf16.mxu0 %v12638_v14  ;;  %v12700_v14 = vld [vmem:[%s14858_s25 + $0x180] ss:$8 sps:$4 sm:$0xff]  }
 0x415   : > { %10892 = vmatpush1.bf16.msra.mxu0 %v12640_v58 }
 0x416   : > { %10894 = vmatprep.subr.bf16.mxu0 %v12641_v62  ;;  %v12701_v62 = vld [vmem:[%s14858_s25 + $0x194] ss:$8 sps:$4 sm:$0xff]  }
 0x419   : > { %10896 = vmatpush1.bf16.msra.mxu0 %v12643_v4 }
 0x41a   : > { %10898 = vmatprep.subr.bf16.mxu0 %v12644_v25 }
 0x41d   : > { %10900 = vmatpush1.bf16.msra.mxu0 %v12646_v33  ;;  %v12703_v33 = vld [vmem:[%s14858_s25 + $0x190] ss:$8 sps:$4 sm:$0xff]  }
 0x41e   : > { %10902 = vmatprep.subr.bf16.mxu0 %v12647_v19 }
 0x421   : > { %10904 = vmatpush1.bf16.msra.mxu0 %v12649_v54  ;;  %v12704_v54 = vld [vmem:[%s14858_s25 + $0x1a4] ss:$8 sps:$4 sm:$0xff]  }
 0x422   : > { %10906 = vmatprep.subr.bf16.mxu0 %v12650_v28 }
 0x425   : > { %10908 = vmatpush1.bf16.msra.mxu0 %v12652_v9  ;;  %v12706_v9 = vld [vmem:[%s14858_s25 + $0x1a0] ss:$8 sps:$4 sm:$0xff]  }
 0x426   : > { %10910 = vmatprep.subr.bf16.mxu0 %v12653_v18 }
 0x429   : > { %10912 = vmatpush1.bf16.msra.mxu0 %v12655_v41  ;;  %v12707_v41 = vld [vmem:[%s14858_s25 + $0x1b4] ss:$8 sps:$4 sm:$0xff]  }
 0x42a   : > { %10914 = vmatprep.subr.bf16.mxu0 %v12656_v44 }
 0x42d   : > { %10916 = vmatpush1.bf16.msra.mxu0 %v12658_v20  ;;  %v12709_v20 = vld [vmem:[%s14858_s25 + $0x1b0] ss:$8 sps:$4 sm:$0xff]  }
 0x42e   : > { %10918 = vmatprep.subr.bf16.mxu0 %v12659_v3 }
 0x431   : > { %10920 = vmatpush1.bf16.msra.mxu0 %v12661_v26  ;;  %v12710_v26 = vld [vmem:[%s14858_s25 + $0x1c4] ss:$8 sps:$4 sm:$0xff]  }
 0x432   : > { %10922 = vmatprep.subr.bf16.mxu0 %v12662_v23  ;;  %v12712_v23 = vld [vmem:[%s14858_s25 + $0x1c0] ss:$8 sps:$4 sm:$0xff]  }
 0x435   : > { %10924 = vmatpush1.bf16.msra.mxu0 %v12664_v53  ;;  %v12713_v53 = vld [vmem:[%s14858_s25 + $0x1d4] ss:$8 sps:$4 sm:$0xff]  }
 0x436   : > { %10926 = vmatprep.subr.bf16.mxu0 %v12665_v6  ;;  %v12715_v6 = vld [vmem:[%s14858_s25 + $0x1d0] ss:$8 sps:$4 sm:$0xff]  }
 0x439   : > { %10928 = vmatpush1.bf16.msra.mxu0 %v12667_v61  ;;  %v12716_v61 = vld [vmem:[%s14858_s25 + $0x1e4] ss:$8 sps:$4 sm:$0xff]  }
 0x43a   : > { %10930 = vmatprep.subr.bf16.mxu0 %v12668_v50  ;;  %v12718_v50 = vld [vmem:[%s14858_s25 + $0x1e0] ss:$8 sps:$4 sm:$0xff]  }
 0x43d   : > { %10932 = vmatpush1.bf16.msra.mxu0 %v12670_v51  ;;  %v12719_v51 = vld [vmem:[%s14858_s25 + $0x1f4] ss:$8 sps:$4 sm:$0xff]  }
 0x43e   : > { %10934 = vmatprep.subr.bf16.mxu0 %v12671_v8  ;;  %v12721_v8 = vld [vmem:[%s14858_s25 + $0x1f0] ss:$8 sps:$4 sm:$0xff]  }
 0x441   : > { %10936 = vmatpush1.bf16.msra.mxu0 %v12673_v55  ;;  %v12722_v55 = vld [vmem:[%s14858_s25 + $0x204] ss:$8 sps:$4 sm:$0xff]  }
 0x442   : > { %10938 = vmatprep.subr.bf16.mxu0 %v12674_v37  ;;  %v12749_v37 = vld [vmem:[%s15617_s4 + $0x4] ss:$8 sps:$4 sm:$0xff]  }
 0x443   : > { %11038 = vmatprep.subr.bf16.mxu1 %v12749_v37  ;;  %v12778_v37 = vld [vmem:[%s15617_s4 + $0x90] ss:$8 sps:$4 sm:$0xff]  }
 0x4b3   : > { %v5529_v63 = vpop.f32.mrb[156].mxu0 }
 0x4b4   : > { %v5531_v21 = vpop.f32.mrb[157].mxu0 }
 0x4b5   : > { %6177 = vmatprep.mubr.f32.mxu0 %v5531_v21  ;;  %v12754_v21 = vld [vmem:[%s15617_s4 + $0x10] ss:$8 sps:$4 sm:$0xff]  }
 0x4b6   : > { %6178 = vmatmul.mubr.f32.vlgmr.msra.gmra.mrb[180].mxu0 %v5529_v63  ;;  %v12751_v63 = vld [vmem:[%s15617_s4] ss:$8 sps:$4 sm:$0xff]  }
 0x4b7   : > { %v5535_v52 = vpop.f32.mrb[158].mxu0  ;;  %10940 = vmatpush1.bf16.msra.mxu0 %v12676_v56  ;;  %v12752_v56 = vld [vmem:[%s15617_s4 + $0x14] ss:$8 sps:$4 sm:$0xff]   ;;  %11040 = vmatpush1.bf16.msra.mxu1 %v12751_v63  ;;  %v6433_v63 = vld [vmem:[%s15617_s4 + $0xa0] sm:$0x77] }
 0x4b8   : > { %v5537_v47 = vpop.f32.mrb[159].mxu0  ;;  %10942 = vmatprep.subr.bf16.mxu0 %v12677_v29  ;;  %11042 = vmatprep.subr.bf16.mxu1 %v12752_v56  ;;  %v12755_v29 = vld [vmem:[%s15617_s4 + $0x24] ss:$8 sps:$4 sm:$0xff]   ;;  %v6475_v56 = vunpack.c.h.bf16 %v6433_v63 }
 0x4b9   : > { %6183 = vmatprep.mubr.f32.mxu0 %v5537_v47  ;;  %v12760_v47 = vld [vmem:[%s15617_s4 + $0x30] ss:$8 sps:$4 sm:$0xff]  }
 0x4ba   : > { %6184 = vmatmul.mubr.f32.gmra.mrb[182].mxu0 %v5535_v52  ;;  %v12757_v52 = vld [vmem:[%s15617_s4 + $0x20] ss:$8 sps:$4 sm:$0xff]  }
 0x4bb   : > { %v5541_v27 = vpop.f32.mrb[160].mxu0  ;;  %10944 = vmatpush1.bf16.msra.mxu0 %v12679_v39  ;;  %11044 = vmatpush1.bf16.msra.mxu1 %v12754_v21  ;;  %v12758_v39 = vld [vmem:[%s15617_s4 + $0x34] ss:$8 sps:$4 sm:$0xff]   ;;  %v6474_v21 = vunpack.c.l.bf16 %v6433_v63  ;;  %v9106_v63 = vld [vmem:[%s15164_s28 + $0xc0] sm:$0xff]  }
 0x4bc   : > { %v5543_v42 = vpop.f32.mrb[161].mxu0  ;;  %10946 = vmatprep.subr.bf16.mxu0 %v12680_v17  ;;  %11046 = vmatprep.subr.bf16.mxu1 %v12755_v29 }
 0x4bd   : > { %6189 = vmatprep.mubr.f32.mxu0 %v5543_v42  ;;  %v12724_v42 = vld [vmem:[%s14858_s25 + $0x200] ss:$8 sps:$4 sm:$0xff]  }
 0x4be   : > { %6190 = vmatmul.mubr.f32.gmra.mrb[184].mxu0 %v5541_v27 }
 0x4bf   : > { %v14979_v15 = vpop.f32.mrb[162].mxu0  ;;  %10948 = vmatpush1.bf16.msra.mxu0 %v12682_v40  ;;  %11048 = vmatpush1.bf16.msra.mxu1 %v12757_v52 }
 0x4c0   : > { %v9707_v16 = vpop.f32.mrb[163].mxu0  ;;  %10950 = vmatprep.subr.bf16.mxu0 %v12683_v12  ;;  %11050 = vmatprep.subr.bf16.mxu1 %v12758_v39 }
 0x4c1   : > { %v12725_v16 = vld [vmem:[%s14858_s25 + $0x214] ss:$8 sps:$4 sm:$0xff]  }
 0x4c3   : > { %v14983_v22 = vpop.f32.mrb[164].mxu0  ;;  %10952 = vmatpush1.bf16.msra.mxu0 %v12685_v59  ;;  %11052 = vmatpush1.bf16.msra.mxu1 %v12760_v47 }
 0x4c4   : > { %v9710_v11 = vpop.f32.mrb[165].mxu0  ;;  %10954 = vmatprep.subr.bf16.mxu0 %v12686_v35 }
 0x4c7   : > { %v14987_v2 = vpop.f32.mrb[166].mxu0  ;;  %10956 = vmatpush1.bf16.msra.mxu0 %v12688_v46 }
 0x4c8   : > { %v9713_v10 = vpop.f32.mrb[167].mxu0  ;;  %10958 = vmatprep.subr.bf16.mxu0 %v12689_v48  ;;  %v12727_v48 = vld [vmem:[%s14858_s25 + $0x210] ss:$8 sps:$4 sm:$0xff]  }
 0x4cb   : > { %v5708_v36 = vpop.f32.mrb[168].mxu0  ;;  %10960 = vmatpush1.bf16.msra.mxu0 %v12691_v32 }
 0x4cc   : > { %v5710_v34 = vpop.f32.mrb[169].mxu0  ;;  %10962 = vmatprep.subr.bf16.mxu0 %v12692_v43  ;;  %v12728_v43 = vld [vmem:[%s14858_s25 + $0x224] ss:$8 sps:$4 sm:$0xff]  }
 0x4cd   : > { %v12083_v5 = vpack.i.bf16 %v5710_v34, %v5708_v36  ;;  %v12730_v34 = vld [vmem:[%s14858_s25 + $0x220] ss:$8 sps:$4 sm:$0xff]  }
 0x4cf   : > { %12084 = vrot.lane.b32.xlu0 %v12083_v5, %s15590_s29  ;;  %v5714_v1 = vpop.f32.mrb[170].mxu0  ;;  %10964 = vmatpush1.bf16.msra.mxu0 %v12694_v49 }
 0x4d0   : > { %v5716_v30 = vpop.f32.mrb[171].mxu0  ;;  %10966 = vmatprep.subr.bf16.mxu0 %v12695_v57 }
 0x4d1   : > { %v12088_v60 = vpack.i.bf16 %v5716_v30, %v5714_v1  ;;  %v12734_v30 = vld [vmem:[%s14858_s25 + $0x244] ss:$8 sps:$4 sm:$0xff]  }
 0x4d3   : > { %12089 = vrot.lane.b32.xlu1 %v12088_v60, %s15590_s29  ;;  %v5720_v13 = vpop.f32.mrb[172].mxu0  ;;  %10968 = vmatpush1.bf16.msra.mxu0 %v12697_v38  ;;  %v12733_v38 = vld [vmem:[%s14858_s25 + $0x230] ss:$8 sps:$4 sm:$0xff]  }
 0x4d4   : > { %v5722_v58 = vpop.f32.mrb[173].mxu0  ;;  %10970 = vmatprep.subr.bf16.mxu0 %v12698_v31  ;;  %v12737_v31 = vld [vmem:[%s14858_s25 + $0x254] ss:$8 sps:$4 sm:$0xff]   ;;  %v12739_v60 = vld [vmem:[%s14858_s25 + $0x250] ss:$8 sps:$4 sm:$0xff]  }
 0x4d5   : > { %v12093_v4 = vpack.i.bf16 %v5722_v58, %v5720_v13  ;;  %v12740_v13 = vld [vmem:[%s14858_s25 + $0x264] ss:$8 sps:$4 sm:$0xff]   ;;  %v12743_v58 = vld [vmem:[%s14858_s25 + $0x274] ss:$8 sps:$4 sm:$0xff]  }
 0x4d7   : > { %12094 = vrot.lane.b32.xlu0 %v12093_v4, %s15590_s29  ;;  %v5791_v25 = vpop.f32.mrb[174].mxu0  ;;  %10972 = vmatpush1.bf16.msra.mxu0 %v12700_v14  ;;  %v12742_v14 = vld [vmem:[%s14858_s25 + $0x260] ss:$8 sps:$4 sm:$0xff]   ;;  %v12746_v4 = vld [vmem:[%s14858_s25 + $0x284] ss:$8 sps:$4 sm:$0xff]  }
 0x4d8   : > { %5818 = vrot.lane.b32.xlu1 %v5791_v25, %s15590_s29  ;;  %v9728_v19 = vpop.f32.mrb[175].mxu0  ;;  %10974 = vmatprep.subr.bf16.mxu0 %v12701_v62  ;;  %v12745_v62 = vld [vmem:[%s14858_s25 + $0x270] ss:$8 sps:$4 sm:$0xff]  }
 0x4d9   : > { %v5933_v25 = vld [vmem:[%s14858_s25 + $0x290] sm:$0x33] }
 0x4da   : > { %v6099_v19 = vunpack.c.h.bf16 %v5933_v25 }
 0x4db   : > { %v5796_v28 = vpop.f32.mrb[176].mxu0  ;;  %10976 = vmatpush1.bf16.msra.mxu0 %v12703_v33  ;;  %v12748_v33 = vld [vmem:[%s14858_s25 + $0x280] ss:$8 sps:$4 sm:$0xff]  }
 0x4dc   : > { %5824 = vrot.lane.b32.xlu0 %v5796_v28, %s15590_s29  ;;  %v9731_v18 = vpop.f32.mrb[177].mxu0  ;;  %10978 = vmatprep.subr.bf16.mxu0 %v12704_v54  ;;  %v6098_v54 = vunpack.c.l.bf16 %v5933_v25 }
 0x4df   : > { %v5801_v44 = vpop.f32.mrb[178].mxu0  ;;  %10980 = vmatpush1.bf16.msra.mxu0 %v12706_v9 }
 0x4e0   : > { %5830 = vrot.lane.b32.xlu1 %v5801_v44, %s15590_s29  ;;  %v9734_v3 = vpop.f32.mrb[179].mxu0  ;;  %10982 = vmatprep.subr.bf16.mxu0 %v12707_v41  ;;  %s8476_s29 = sshll.u32 %s15622_s26, 3 }
 0x4e1   : > { %v12763_v3 = vld [vmem:[%s15617_s4 + $0x40] ss:$8 sps:$4 sm:$0xff]  }
 0x4e3   : > { %10984 = vmatpush1.bf16.msra.mxu0 %v12709_v20  ;;  %v12761_v20 = vld [vmem:[%s15617_s4 + $0x44] ss:$8 sps:$4 sm:$0xff]  }
 0x4e4   : > { %10986 = vmatprep.subr.bf16.mxu0 %v12710_v26  ;;  %11054 = vmatprep.subr.bf16.mxu1 %v12761_v20  ;;  %v12764_v26 = vld [vmem:[%s15617_s4 + $0x54] ss:$8 sps:$4 sm:$0xff]  }
 0x4e5   : > { %11056 = vmatpush1.bf16.msra.mxu1 %v12763_v3 }
 0x4e6   : > { %11058 = vmatprep.subr.bf16.mxu1 %v12764_v26 }
 0x4e7   : > { %10988 = vmatpush1.bf16.msra.mxu0 %v12712_v23  ;;  %v12766_v23 = vld [vmem:[%s15617_s4 + $0x50] ss:$8 sps:$4 sm:$0xff]  }
 0x4e8   : > { %10990 = vmatprep.subr.bf16.mxu0 %v12713_v53  ;;  %v12767_v53 = vld [vmem:[%s15617_s4 + $0x64] ss:$8 sps:$4 sm:$0xff]  }
 0x4e9   : > { %11060 = vmatpush1.bf16.msra.mxu1 %v12766_v23 }
 0x4ea   : > { %11062 = vmatprep.subr.bf16.mxu1 %v12767_v53 }
 0x4eb   : > { %10992 = vmatpush1.bf16.msra.mxu0 %v12715_v6  ;;  %v12769_v6 = vld [vmem:[%s15617_s4 + $0x60] ss:$8 sps:$4 sm:$0xff]  }
 0x4ec   : > { %10994 = vmatprep.subr.bf16.mxu0 %v12716_v61  ;;  %v12770_v61 = vld [vmem:[%s15617_s4 + $0x74] ss:$8 sps:$4 sm:$0xff]  }
 0x4ed   : > { %11064 = vmatpush1.bf16.msra.mxu1 %v12769_v6 }
 0x4ee   : > { %11066 = vmatprep.subr.bf16.mxu1 %v12770_v61 }
 0x4ef   : > { %10996 = vmatpush1.bf16.msra.mxu0 %v12718_v50  ;;  %v12772_v50 = vld [vmem:[%s15617_s4 + $0x70] ss:$8 sps:$4 sm:$0xff]  }
 0x4f0   : > { %10998 = vmatprep.subr.bf16.mxu0 %v12719_v51  ;;  %v12773_v51 = vld [vmem:[%s15617_s4 + $0x84] ss:$8 sps:$4 sm:$0xff]  }
 0x4f1   : > { %11068 = vmatpush1.bf16.msra.mxu1 %v12772_v50 }
 0x4f2   : > { %11070 = vmatprep.subr.bf16.mxu1 %v12773_v51 }
 0x4f3   : > { %11000 = vmatpush1.bf16.msra.mxu0 %v12721_v8  ;;  %v12775_v8 = vld [vmem:[%s15617_s4 + $0x80] ss:$8 sps:$4 sm:$0xff]  }
 0x4f4   : > { %11002 = vmatprep.subr.bf16.mxu0 %v12722_v55  ;;  %v12776_v55 = vld [vmem:[%s15617_s4 + $0x94] ss:$8 sps:$4 sm:$0xff]  }
 0x4f5   : > { %11072 = vmatpush1.bf16.msra.mxu1 %v12775_v8  ;;  %v9090_v8 = vld [vmem:[%s15164_s28 + $0x40] sm:$0xff]  }
 0x4f6   : > { %11074 = vmatprep.subr.bf16.mxu1 %v12776_v55  ;;  %v8687_v55 = vld [vmem:[%s15164_s28] sm:$0xff]  }
 0x4f9   : > { %11076 = vmatpush1.bf16.msra.mxu1 %v12778_v37  ;;  %v9091_v37 = vld [vmem:[%s15164_s28 + $0x48] sm:$0xff]  }
 0x4fa   : > { %8621 = vmatprep.subr.msk.mxu1 %vm6479_vm15, %v6475_v56  ;;  %v9098_v56 = vld [vmem:[%s15164_s28 + $0x80] sm:$0xff]  }
 0x4fd   : > { %8622 = vmatpush1.msk.msra.mxu1 %vm6479_vm15, %v6474_v21  ;;  %v9083_v21 = vld [vmem:[%s15164_s28 + $0x8] sm:$0xff]  }
 0x4fe   : > { %11110 = vmatprep.subr.bf16.mxu1 %v9106_v63 }
 0x541   : > { %v15041_v17 = vpop.permute.xlu0 %12084 }
 0x542   : > { %v12087_v27 = vunpack.i.h.bf16 %v15041_v17  ;;  %v12086_v40 = vunpack.i.l.bf16 %v15041_v17 }
 0x544   : > { %v5833_v12 = vsel %vm5832_vm13, %v12086_v40, %v12087_v27  ;;  %v5848_v59 = vsel %vm5832_vm13, %v14979_v15, %v12086_v40 }
 0x545   : > { %6260 = vmatprep.mubr.f32.mxu0 %v5833_v12  ;;  %v12090_v35 = vpop.permute.xlu1 %12089 }
 0x546   : > { %v12092_v46 = vunpack.i.h.bf16 %v12090_v35  ;;  %v12091_v11 = vunpack.i.l.bf16 %v12090_v35  ;;  %6261 = vmatmul.mubr.f32.vlgmr.msra.gmra.mrb[180].mxu0 %v5848_v59 }
 0x547   : > { %11004 = vmatpush1.bf16.msra.mxu0 %v12724_v42 }
 0x548   : > { %v5835_v32 = vsel %vm5832_vm13, %v12091_v11, %v12092_v46  ;;  %11006 = vmatprep.subr.bf16.mxu0 %v12725_v16  ;;  %v5849_v10 = vsel %vm5832_vm13, %v14983_v22, %v12091_v11  ;;  %v12731_v22 = vld [vmem:[%s14858_s25 + $0x234] ss:$8 sps:$4 sm:$0xff]  }
 0x549   : > { %6266 = vmatprep.mubr.f32.mxu0 %v5835_v32  ;;  %v12095_v15 = vpop.permute.xlu0 %12094 }
 0x54a   : > { %v12097_v36 = vunpack.i.h.bf16 %v12095_v15  ;;  %v12096_v49 = vunpack.i.l.bf16 %v12095_v15  ;;  %6267 = vmatmul.mubr.f32.gmra.mrb[182].mxu0 %v5849_v10  ;;  %v5819_v1 = vpop.permute.xlu1 %5818 }
 0x54b   : > { %11008 = vmatpush1.bf16.msra.mxu0 %v12727_v48  ;;  %v5834_v28 = vsel %vm5832_vm13, %v12087_v27, %v5819_v1 }
 0x54c   : > { %v5837_v57 = vsel %vm5832_vm13, %v12096_v49, %v12097_v36  ;;  %11010 = vmatprep.subr.bf16.mxu0 %v12728_v43  ;;  %v5850_v5 = vsel %vm5832_vm13, %v14987_v2, %v12096_v49  ;;  %v12736_v2 = vld [vmem:[%s14858_s25 + $0x240] ss:$8 sps:$4 sm:$0xff]   ;;  %s953_s25 = scalar_lea.vmem %s15618_s3, %s15204_s6  ;;  %s12929_s3 = smov 22  }
 0x54d   : > { %6272 = vmatprep.mubr.f32.mxu0 %v5837_v57 }
 0x54e   : > { %6273 = vmatmul.mubr.f32.gmra.mrb[184].mxu0 %v5850_v5  ;;  %v5825_v9 = vpop.permute.xlu0 %5824 }
 0x54f   : > { %11012 = vmatpush1.bf16.msra.mxu0 %v12730_v34  ;;  %8618 = vmatprep.mubr.msk.f32.mxu0 %vm6100_vm14, %v5819_v1  ;;  %v5836_v18 = vsel %vm5832_vm13, %v12092_v46, %v5825_v9 }
 0x550   : > { %11014 = vmatprep.subr.bf16.mxu0 %v12731_v22 }
 0x552   : > { %v5831_v41 = vpop.permute.xlu1 %5830 }
 0x553   : > { %11016 = vmatpush1.bf16.msra.mxu0 %v12733_v38  ;;  %v5838_v44 = vsel %vm5832_vm13, %v12097_v36, %v5831_v41 }
 0x554   : > { %11018 = vmatprep.subr.bf16.mxu0 %v12734_v30 }
 0x557   : > { %11020 = vmatpush1.bf16.msra.mxu0 %v12736_v2 }
 0x558   : > { %11022 = vmatprep.subr.bf16.mxu0 %v12737_v31 }
 0x55b   : > { %11024 = vmatpush1.bf16.msra.mxu0 %v12739_v60 }
 0x55c   : > { %11026 = vmatprep.subr.bf16.mxu0 %v12740_v13 }
 0x55f   : > { %11028 = vmatpush1.bf16.msra.mxu0 %v12742_v14 }
 0x560   : > { %11030 = vmatprep.subr.bf16.mxu0 %v12743_v58 }
 0x563   : > { %11032 = vmatpush1.bf16.msra.mxu0 %v12745_v62 }
 0x564   : > { %11034 = vmatprep.subr.bf16.mxu0 %v12746_v4 }
 0x567   : > { %11036 = vmatpush1.bf16.msra.mxu0 %v12748_v33 }
 0x568   : > { %8616 = vmatprep.subr.msk.mxu0 %vm5453_vm9, %v6099_v19 }
 0x56b   : > { %8617 = vmatpush1.msk.msra.mxu0 %vm5453_vm9, %v6098_v54 }
 0x56c   : > { %6344 = vmatmul.mubr.f32.vlgmr.msra.gmra.mrb[180].mxu0 %v5834_v28  ;;  %11078 = vmatprep.subr.bf16.mxu0 %v9090_v8 }
 0x56d   : > { %8619 = vmatprep.mubr.msk.f32.mxu0 %vm6100_vm14, %v5825_v9  ;;  %11080 = vmatpush3.bf16.msra.mxu0 %v8687_v55 }
 0x56e   : > { %11082 = vmatprep.subr.bf16.mxu0 %v9091_v37 }
 0x570   : > { %6350 = vmatmul.mubr.f32.gmra.mrb[182].mxu0 %v5836_v18 }
 0x571   : > { %8620 = vmatprep.mubr.msk.f32.mxu0 %vm6100_vm14, %v5831_v41  ;;  %11084 = vmatpush3.bf16.msra.mxu0 %v9083_v21 }
 0x574   : > { %6356 = vmatmul.mubr.f32.gmra.mrb[184].mxu0 %v5838_v44 }
 0x63f   : > { %v15121_v29 = vpop.f32.mrb[180].mxu0 }
 0x640   : > { %v15123_v52 = vpop.f32.mrb[181].mxu0  ;;  %v6385_v17 = vmul.f32 %v15121_v29, %v15121_v29 }
 0x641   : > { %v6386_v39 = vmul.f32 %v15123_v52, %v15123_v52  ;;  %v6373_v12 = vsel %vm6372_vm2, %v15123_v52, 0.0 }
 0x643   : > { %v15127_v47 = vpop.f32.mrb[182].mxu0  ;;  %v6400_v11 = vsel %vm6372_vm2, %v6386_v39, 0.0  ;;  %v9107_v39 = vld [vmem:[%s15164_s28 + $0xc8] sm:$0xff]  }
 0x644   : > { %v6362_v27 = vadd.f32 %v15127_v47, %v15121_v29  ;;  %v6387_v40 = vmul.f32 %v15127_v47, %v15127_v47  ;;  %v15135_v42 = vpop.f32.mrb[183].mxu0 }
 0x645   : > { %v6374_v59 = vsel %vm6372_vm2, %v15135_v42, 0.0  ;;  %v6388_v16 = vmul.f32 %v15135_v42, %v15135_v42 }
 0x646   : > { %v6391_v35 = vadd.f32 %v6387_v40, %v6385_v17  ;;  %v6375_v46 = vadd.f32 %v6374_v59, %v6373_v12  ;;  %v9092_v17 = vld [vmem:[%s15164_s28 + $0x50] sm:$0xff]   ;;  %v9093_v59 = vld [vmem:[%s15164_s28 + $0x58] sm:$0xff]  }
 0x647   : > { %v6401_v48 = vsel %vm6372_vm2, %v6388_v16, 0.0  ;;  %v15145_v32 = vpop.f32.mrb[184].mxu0  ;;  %v9108_v40 = vld [vmem:[%s15164_s28 + $0xd0] sm:$0xff]   ;;  %11086 = vmatprep.subr.bf16.mxu0 %v9092_v17 }
 0x648   : > { %v6402_v10 = vadd.f32 %v6401_v48, %v6400_v11  ;;  %v6364_v43 = vsel %vm6363_vm3, %v15145_v32, 0.0  ;;  %v6389_v15 = vmul.f32 %v15145_v32, %v15145_v32  ;;  %v15151_v36 = vpop.f32.mrb[185].mxu0  ;;  %v9084_v12 = vld [vmem:[%s15164_s28 + $0x10] sm:$0xff]   ;;  %v9094_v11 = vld [vmem:[%s15164_s28 + $0x60] sm:$0xff]   ;;  %v9101_v48 = vld [vmem:[%s15164_s28 + $0x98] sm:$0xff]  }
 0x649   : > { %v6365_v49 = vadd.f32 %v6364_v43, %v6362_v27  ;;  %v6377_v34 = vsel %vm6376_vm4, %v15151_v36, 0.0  ;;  %v6390_v57 = vmul.f32 %v15151_v36, %v15151_v36  ;;  %v9099_v27 = vld [vmem:[%s15164_s28 + $0x88] sm:$0xff]   ;;  %v9100_v16 = vld [vmem:[%s15164_s28 + $0x90] sm:$0xff]   ;;  %11088 = vmatpush3.bf16.msra.mxu0 %v9084_v12  ;;  %v9086_v43 = vld [vmem:[%s15164_s28 + $0x20] sm:$0xff]  }
 0x64a   : > { %v6392_v5 = vsel %vm6363_vm3, %v6389_v15, 0.0  ;;  %v6378_v22 = vadd.f32 %v6377_v34, %v6375_v46  ;;  %11090 = vmatprep.subr.bf16.mxu0 %v9093_v59  ;;  %v9085_v46 = vld [vmem:[%s15164_s28 + $0x18] sm:$0xff]   ;;  %v9095_v15 = vld [vmem:[%s15164_s28 + $0x68] sm:$0xff]  }
 0x64b   : > { %v6366_v1 = vrot.slane %v6365_v49, 4  ;;  %v6393_v38 = vadd.f32 %v6392_v5, %v6391_v35  ;;  %v6403_v30 = vsel %vm6376_vm4, %v6390_v57, 0.0  ;;  %v9109_v35 = vld [vmem:[%s15164_s28 + $0xd8] sm:$0xff]   ;;  %v9111_v34 = vld [vmem:[%s15164_s28 + $0xe8] sm:$0xff]   ;;  %v9096_v5 = vld [vmem:[%s15164_s28 + $0x70] sm:$0xff]   ;;  %vm7671_vm4 = vcmask 607232  }
 0x64c   : > { %v6379_v2 = vrot.slane %v6378_v22, 4  ;;  %v6404_v31 = vadd.f32 %v6403_v30, %v6402_v10  ;;  %v9110_v10 = vld [vmem:[%s15164_s28 + $0xe0] sm:$0xff]   ;;  %v9087_v57 = vld [vmem:[%s15164_s28 + $0x28] sm:$0xff]   ;;  %v9089_v30 = vld [vmem:[%s15164_s28 + $0x38] sm:$0xff]  }
 0x64d   : > { %v6367_v60 = vadd.f32 %v6366_v1, %v6365_v49  ;;  %v6394_v13 = vrot.slane %v6393_v38, 4  ;;  %11092 = vmatpush3.bf16.msra.mxu0 %v9085_v46  ;;  %v9102_v49 = vld [vmem:[%s15164_s28 + $0xa0] sm:$0xff]   ;;  %v9088_v1 = vld [vmem:[%s15164_s28 + $0x30] sm:$0xff]  }
 0x64e   : > { %v6380_v14 = vadd.f32 %v6379_v2, %v6378_v22  ;;  %v6405_v58 = vrot.slane %v6404_v31, 4  ;;  %11094 = vmatprep.subr.bf16.mxu0 %v9094_v11  ;;  %v9103_v22 = vld [vmem:[%s15164_s28 + $0xa8] sm:$0xff]  }
 0x64f   : > { %v6368_v62 = vrot.slane %v6367_v60, 2  ;;  %v6395_v4 = vadd.f32 %v6394_v13, %v6393_v38  ;;  %v9097_v38 = vld [vmem:[%s15164_s28 + $0x78] sm:$0xff]  }
 0x650   : > { %v6381_v25 = vrot.slane %v6380_v14, 2  ;;  %v6406_v33 = vadd.f32 %v6405_v58, %v6404_v31 }
 0x651   : > { %v6369_v19 = vadd.f32 %v6368_v62, %v6367_v60  ;;  %v6396_v54 = vrot.slane %v6395_v4, 2  ;;  %11096 = vmatpush3.bf16.msra.mxu0 %v9086_v43 }
 0x652   : > { %v6382_v28 = vadd.f32 %v6381_v25, %v6380_v14  ;;  %v6407_v9 = vrot.slane %v6406_v33, 2  ;;  %11098 = vmatprep.subr.bf16.mxu0 %v9095_v15 }
 0x653   : > { %v6370_v18 = vrot.slane %v6369_v19, 1  ;;  %v6397_v41 = vadd.f32 %v6396_v54, %v6395_v4 }
 0x654   : > { %v6383_v44 = vrot.slane %v6382_v28, 1  ;;  %v6408_v20 = vadd.f32 %v6407_v9, %v6406_v33 }
 0x655   : > { %v6398_v3 = vrot.slane %v6397_v41, 1  ;;  %v6371_v23 = vadd.f32 %v6370_v18, %v6369_v19  ;;  %11100 = vmatpush3.bf16.msra.mxu0 %v9087_v57 }
 0x656   : > { %v6409_v26 = vrot.slane %v6408_v20, 1  ;;  %v6384_v6 = vadd.f32 %v6383_v44, %v6382_v28  ;;  %11102 = vmatprep.subr.bf16.mxu0 %v9096_v5 }
 0x657   : > { %v6399_v53 = vadd.f32 %v6398_v3, %v6397_v41 }
 0x658   : > { %v6410_v61 = vadd.f32 %v6409_v26, %v6408_v20 }
 0x659   : > { %v6411_v50 = vsel %vm3751_vm7, %v6371_v23, %v6399_v53  ;;  %11104 = vmatpush3.bf16.msra.mxu0 %v9088_v1 }
 0x65a   : > { %v6412_v51 = vsel %vm3751_vm7, %v6384_v6, %v6410_v61  ;;  %11106 = vmatprep.subr.bf16.mxu0 %v9097_v38 }
 0x65b   : > { %8623 = vmatprep.mubr.msk.f32.mxu1 %vm6372_vm2, %v6412_v51 }
 0x65c   : > { %6551 = vmatmul.mubr.f32.vlgmr.msra.gmra.mrb[60].mxu1 %v6411_v50 }
 0x65d   : > { %11112 = vmatpush3.bf16.msra.mxu1 %v9098_v56  ;;  %11108 = vmatpush3.bf16.msra.mxu0 %v9089_v30 }
 0x65e   : > { %11114 = vmatprep.subr.bf16.mxu1 %v9107_v39  ;;  %11141 = vmatprep.subr.bf16.mxu0 %v12920_v0 }
 0x661   : > { %11116 = vmatpush3.bf16.msra.mxu1 %v9099_v27 }
 0x662   : > { %11118 = vmatprep.subr.bf16.mxu1 %v9108_v40 }
 0x665   : > { %11120 = vmatpush3.bf16.msra.mxu1 %v9100_v16 }
 0x666   : > { %11122 = vmatprep.subr.bf16.mxu1 %v9109_v35 }
 0x669   : > { %11124 = vmatpush3.bf16.msra.mxu1 %v9101_v48 }
 0x66a   : > { %11126 = vmatprep.subr.bf16.mxu1 %v9110_v10 }
 0x66d   : > { %11128 = vmatpush3.bf16.msra.mxu1 %v9102_v49 }
 0x66e   : > { %11130 = vmatprep.subr.bf16.mxu1 %v9111_v34 }
 0x671   : > { %11132 = vmatpush3.bf16.msra.mxu1 %v9103_v22 }
 0x72f   : > { %v6552_v2 = vpop.f32.mrb[60].mxu1 }
 0x730   : > { %v6557_v31 = vmul.f32 0.004132231, %v6552_v2  ;;  %v6554_v60 = vpop.f32.mrb[61].mxu1 }
 0x731   : > { %v6558_v13 = vmul.f32 0.004132231, %v6554_v60 }
 0x732   : > { %v6559_v14 = vmul.f32 %v6557_v31, %v6557_v31  ;;  %v6572_v58 = vrot.slane %v6557_v31, %v14861_v24 }
 0x733   : > { %v6560_v62 = vmul.f32 %v6558_v13, %v6558_v13  ;;  %v6576_v4 = vrot.slane %v6558_v13, %v14861_v24 }
 0x734   : > { %v6563_v25 = vrot.slane %v6559_v14, 7  ;;  %v6577_v33 = vsub.f32 %v15121_v29, %v6572_v58  ;;  %v6579_v19 = vsub.f32 %v15127_v47, %v6572_v58  ;;  %v6581_v54 = vsub.f32 %v15145_v32, %v6572_v58  ;;  %v6601_v29 = vld [vmem:[%s953_s25] sm:$0x3]  ;;  %s997_s25 = scalar_lea.vmem %s15581_s23, %s15622_s26 }
 0x735   : > { %v6564_v28 = vrot.slane %v6560_v62, 7  ;;  %v6578_v9 = vsub.f32 %v15123_v52, %v6576_v4  ;;  %v6580_v18 = vsub.f32 %v15135_v42, %v6576_v4  ;;  %v6582_v41 = vsub.f32 %v15151_v36, %v6576_v4  ;;  %v6619_v47 = vld [vmem:[%s957_s30] sm:$0x3]  ;;  %v9112_v62 = vld [vmem:[%s15164_s28 + $0xf0] sm:$0xff]   ;;  %s11929_s30 = smul.u32 240, %s15622_s26 }
 0x736   : > { %v6567_v44 = vsub.f32 %v6557_v31, %v6563_v25  ;;  %v6606_v36 = vrot.slane %v6601_v29, %v14861_v24  ;;  %v6610_v53 = vrot.slane %v6601_v29, %v14864_v7  ;;  %v6624_v51 = vrot.slane %v6619_v47, %v14861_v24  ;;  %11134 = vmatprep.subr.bf16.mxu1 %v9112_v62  ;;  %v9104_v4 = vld [vmem:[%s15164_s28 + $0xb0] sm:$0xff]   ;;  %v9113_v25 = vld [vmem:[%s15164_s28 + $0xf8] sm:$0xff]  }
 0x737   : > { %v6568_v20 = vsub.f32 %v6558_v13, %v6564_v28  ;;  %v6628_v63 = vrot.slane %v6619_v47, %v14864_v7  ;;  %11136 = vmatpush3.bf16.msra.mxu1 %v9104_v4 }
 0x738   : > { %v6583_v3 = vadd.f32 1e-05, %v6567_v44  ;;  %11138 = vmatprep.subr.bf16.mxu1 %v9113_v25 }
 0x739   : > { %v6584_v26 = vadd.f32 1e-05, %v6568_v20 }
 0x73a   : > { %12853 = vrsqrt.f32 %v6583_v3 }
 0x73b   : > { %12855 = vrsqrt.f32 %v6584_v26 }
 0x744   : > { %v12854_v52 = vpop.eup %12853 }
 0x745   : > { %v12856_v42 = vpop.eup %12855  ;;  %v6590_v32 = vrot.slane %v12854_v52, %v14864_v7 }
 0x746   : > { %v6594_v23 = vrot.slane %v12856_v42, %v14864_v7 }
 0x747   : > { %v6595_v6 = vmul.f32 %v6590_v32, %v6577_v33  ;;  %v6597_v61 = vmul.f32 %v6590_v32, %v6579_v19  ;;  %v6599_v50 = vmul.f32 %v6590_v32, %v6581_v54  ;;  %v9105_v33 = vld [vmem:[%s15164_s28 + $0xb8] sm:$0xff]  }
 0x748   : > { %v6596_v8 = vmul.f32 %v6594_v23, %v6578_v9  ;;  %v6598_v55 = vmul.f32 %v6594_v23, %v6580_v18  ;;  %v6600_v37 = vmul.f32 %v6594_v23, %v6582_v41  ;;  %11140 = vmatpush3.bf16.msra.mxu1 %v9105_v33 }
 0x749   : > { %v6613_v56 = vmul.f32 %v6606_v36, %v6595_v6  ;;  %v6615_v21 = vmul.f32 %v6606_v36, %v6597_v61  ;;  %v6617_v39 = vmul.f32 %v6606_v36, %v6599_v50  ;;  %11168 = vmatprep.subr.bf16.mxu1 %v12920_v0 }
 0x74a   : > { %v6614_v17 = vmul.f32 %v6610_v53, %v6596_v8  ;;  %v6616_v27 = vmul.f32 %v6610_v53, %v6598_v55  ;;  %v6618_v40 = vmul.f32 %v6610_v53, %v6600_v37 }
 0x74b   : > { %v6631_v12 = vadd.f32 %v6624_v51, %v6613_v56  ;;  %v6633_v59 = vadd.f32 %v6624_v51, %v6615_v21  ;;  %v6635_v16 = vadd.f32 %v6624_v51, %v6617_v39 }
 0x74c   : > { %v6632_v35 = vadd.f32 %v6628_v63, %v6614_v17  ;;  %v6634_v46 = vadd.f32 %v6628_v63, %v6616_v27  ;;  %v6636_v11 = vadd.f32 %v6628_v63, %v6618_v40 }
 0x74d   : > { %v8624_v48 = vmul.f32 -1.442695, %v6631_v12  ;;  %v8626_v10 = vmul.f32 -1.442695, %v6633_v59  ;;  %v8628_v43 = vmul.f32 -1.442695, %v6635_v16 }
 0x74e   : > { %v8625_v15 = vmul.f32 -1.442695, %v6632_v35  ;;  %v8627_v49 = vmul.f32 -1.442695, %v6634_v46  ;;  %v8629_v34 = vmul.f32 -1.442695, %v6636_v11 }
 0x74f   : > { %12857 = vpow2.f32 %v8624_v48 }
 0x750   : > { %12859 = vpow2.f32 %v8626_v10 }
 0x751   : > { %12861 = vpow2.f32 %v8628_v43 }
 0x752   : > { %12863 = vpow2.f32 %v8625_v15 }
 0x753   : > { %12865 = vpow2.f32 %v8627_v49 }
 0x754   : > { %12867 = vpow2.f32 %v8629_v34 }
 0x759   : > { %v12858_v57 = vpop.eup %12857 }
 0x75a   : > { %v12860_v5 = vpop.eup %12859  ;;  %v6655_v22 = vadd.f32 1.0, %v12858_v57 }
 0x75b   : > { %v12862_v1 = vpop.eup %12861  ;;  %v6657_v38 = vadd.f32 1.0, %v12860_v5 }
 0x75c   : > { %v12864_v30 = vpop.eup %12863  ;;  %v6659_v2 = vadd.f32 1.0, %v12862_v1  ;;  %12869 = vrcp.f32 %v6655_v22 }
 0x75d   : > { %v12866_v31 = vpop.eup %12865  ;;  %12871 = vrcp.f32 %v6657_v38  ;;  %v6656_v60 = vadd.f32 1.0, %v12864_v30 }
 0x75e   : > { %v12868_v13 = vpop.eup %12867  ;;  %12873 = vrcp.f32 %v6659_v2  ;;  %v6658_v14 = vadd.f32 1.0, %v12866_v31 }
 0x75f   : > { %v6660_v58 = vadd.f32 1.0, %v12868_v13  ;;  %12875 = vrcp.f32 %v6656_v60  ;;  %v9114_v60 = vld [vmem:[%s15164_s28 + $0x100] sm:$0xff]  }
 0x760   : > { %12877 = vrcp.f32 %v6658_v14 }
 0x761   : > { %12879 = vrcp.f32 %v6660_v58  ;;  %v9115_v58 = vld [vmem:[%s15164_s28 + $0x108] sm:$0xff]  }
 0x766   : > { %v15224_v19 = vpop.eup %12869 }
 0x767   : > { %v12872_v54 = vpop.eup %12871  ;;  %v6713_v28 = vrot.slane %v15224_v19, 3  ;;  %v6688_v9 = vrot.slane %v15224_v19, 1  ;;  %v6700_v18 = vrot.slane %v15224_v19, 2 }
 0x768   : > { %v12874_v41 = vpop.eup %12873  ;;  %v6677_v44 = vrot.slane %v12872_v54, 3  ;;  %v6689_v20 = vrot.slane %v12872_v54, 1  ;;  %v6701_v3 = vrot.slane %v12872_v54, 2  ;;  %v6694_v26 = vrot.slane %v12872_v54, 4 }
 0x769   : > { %v12876_v29 = vpop.eup %12875  ;;  %v6695_v52 = vrot.slane %v12874_v41, 4  ;;  %v6707_v47 = vrot.slane %v12872_v54, 5  ;;  %v6708_v42 = vrot.slane %v12874_v41, 5  ;;  %v6717_v40 = vrot.slane %v12872_v54, 6 }
 0x76a   : > { %v12878_v32 = vpop.eup %12877  ;;  %v6714_v36 = vsel %vm6479_vm15, %v6713_v28, %v6677_v44  ;;  %v6690_v23 = vsel %vm6687_vm5, %v6688_v9, %v6689_v20  ;;  %v6702_v53 = vsel %vm6363_vm3, %v6700_v18, %v6701_v3  ;;  %v6703_v6 = vrot.slane %v12876_v29, 2  ;;  %v9116_v20 = vld [vmem:[%s15164_s28 + $0x110] sm:$0xff]  }
 0x76b   : > { %v12880_v61 = vpop.eup %12879  ;;  %6751 = vrot.lane.b32.xlu1 %v6714_v36, %s12923_s8  ;;  %6723 = vrot.lane.b32.xlu0 %v6690_v23, %s12924_s2  ;;  %v6704_v50 = vrot.slane %v12878_v32, 2  ;;  %v6691_v51 = vrot.slane %v12876_v29, 1  ;;  %v6692_v8 = vrot.slane %v12878_v32, 1  ;;  %v6696_v55 = vsel %vm5453_vm9, %v6694_v26, %v6695_v52 }
 0x76c   : > { %v6697_v37 = vrot.slane %v12878_v32, 4  ;;  %v6698_v63 = vrot.slane %v12880_v61, 4  ;;  %v6709_v56 = vsel %vm6706_vm6, %v6707_v47, %v6708_v42  ;;  %v6710_v21 = vrot.slane %v12878_v32, 5 }
 0x76d   : > { %v6705_v39 = vsel %vm6363_vm3, %v6703_v6, %v6704_v50  ;;  %v6693_v17 = vsel %vm6687_vm5, %v6691_v51, %v6692_v8  ;;  %v6711_v27 = vrot.slane %v12880_v61, 5  ;;  %v6680_v35 = vrot.slane %v12878_v32, 3  ;;  %v9119_v6 = vld [vmem:[%s15164_s28 + $0x128] sm:$0xff]   ;;  %v9121_v50 = vld [vmem:[%s15164_s28 + $0x138] sm:$0xff]   ;;  %v9122_v51 = vld [vmem:[%s15164_s28 + $0x140] sm:$0xff]  }
 0x76e   : > { %v12098_v12 = vpack.i.bf16 %v6705_v39, %v6702_v53  ;;  %v12103_v59 = vpack.i.bf16 %v6696_v55, %v6693_v17  ;;  %v6699_v16 = vsel %vm5453_vm9, %v6697_v37, %v6698_v63  ;;  %v6718_v11 = vrot.slane %v12874_v41, 6  ;;  %v9118_v53 = vld [vmem:[%s15164_s28 + $0x120] sm:$0xff]   ;;  %v6854_v8 = vld [vmem:[%s15164_s28 + $0x148] sm:$0x3]  ;;  %v9124_v17 = vld [vmem:[%s15570_s12 + $0x10] sm:$0xff]  }
 0x76f   : > { %v6712_v46 = vsel %vm6706_vm6, %v6710_v21, %v6711_v27  ;;  %v6720_v48 = vrot.slane %v12878_v32, 6  ;;  %v6721_v10 = vrot.slane %v12880_v61, 6  ;;  %v6681_v15 = vrot.slane %v12880_v61, 3  ;;  %v9117_v32 = vld [vmem:[%s15164_s28 + $0x118] sm:$0xff]   ;;  %v9120_v61 = vld [vmem:[%s15164_s28 + $0x130] sm:$0xff]   ;;  %v8851_v21 = vld [vmem:[%s15570_s12] sm:$0xff]   ;;  %s965_s28 = scalar_lea.vmem %s15568_s10, %s15622_s26 }
 0x770   : > { %12099 = vrot.lane.b32.xlu1 %v12098_v12, %s15620_s0  ;;  %12104 = vrot.lane.b32.xlu0 %v12103_v59, %s12924_s2  ;;  %v12108_v43 = vpack.i.bf16 %v6712_v46, %v6709_v56  ;;  %v6678_v49 = vrot.slane %v12874_v41, 3  ;;  %v6719_v34 = vsel %vm1105_vm0, %v6717_v40, %v6718_v11  ;;  %v6715_v1 = vrot.slane %v12876_v29, 3  ;;  %v9123_v39 = vld [vmem:[%s15570_s12 + $0x8] sm:$0xff]   ;;  %v9125_v27 = vld [vmem:[%s15570_s12 + $0x18] sm:$0xff]  }
 0x771   : > { %v6722_v57 = vsel %vm1105_vm0, %v6720_v48, %v6721_v10  ;;  %v6682_v5 = vsel %vm6479_vm15, %v6680_v35, %v6681_v15  ;;  %vm6759_vm0 = vcmask 908288   ;;  %v6937_v55 = vunpack.c.l.bf16 %v6854_v8  ;;  %v9126_v40 = vld [vmem:[%s15570_s12 + $0x20] sm:$0xff]   ;;  %v9127_v12 = vld [vmem:[%s15570_s12 + $0x28] sm:$0xff]   ;;  %v9128_v59 = vld [vmem:[%s15570_s12 + $0x30] sm:$0xff]  }
 0x772   : > { %v6679_v22 = vsel %vm6479_vm15, %v6677_v44, %v6678_v49  ;;  %v6716_v38 = vsel %vm6479_vm15, %v6715_v1, %v6680_v35  ;;  %vm7864_vm5 = vcmask 179200  }
 0x774   : > { %6729 = vrot.lane.b32.xlu1 %v6699_v16, %s12924_s2  ;;  %12109 = vrot.lane.b32.xlu0 %v12108_v43, %s15620_s0  ;;  %v7206_v16 = vld [vmem:[%s15570_s12 + $0x38] sm:$0xf]  ;;  %s15346_s0 = scalar_lea.vmem %s15571_s13, %s11929_s30  ;;  %s12925_s30 = smov 112  }
 0x775   : > { %v7221_v35 = vunpack.c.l.bf16 %v7206_v16  ;;  %v9129_v8 = vld [vmem:[%s15346_s0 + $0x8] sm:$0xff]   ;;  %s12927_s2 = smov 104  }
 0x776   : > { %v9133_v16 = vld [vmem:[%s15346_s0 + $0x28] sm:$0xff]  }
 0x778   : > { %6753 = vrot.lane.b32.xlu1 %v6716_v38, %s12923_s8  ;;  %6755 = vrot.lane.b32.xlu0 %v6719_v34, %s12923_s8 }
 0x77c   : > { %6757 = vrot.lane.b32.xlu0 %v6722_v57, %s12923_s8  ;;  %s12926_s8 = smov 120  }
 0x7dd   : > { %v15253_v30 = vpop.permute.xlu1 %6751  ;;  %v6724_v2 = vpop.permute.xlu0 %6723 }
 0x7de   : > { %v6766_v31 = vsel %vm6372_vm2, %v12876_v29, %v6724_v2 }
 0x7df   : > { %7009 = vmatprep.mubr.f32.mxu0 %v6766_v31 }
 0x7e0   : > { %7010 = vmatmul.mubr.f32.vlgmr.msra.gmra.mrb[186].mxu0 %v15224_v19 }
 0x7e1   : > { %11143 = vmatpush1.bf16.msra.mxu0 %v9114_v60 }
 0x7e2   : > { %v12100_v13 = vpop.permute.xlu1 %12099  ;;  %v12105_v14 = vpop.permute.xlu0 %12104  ;;  %11144 = vmatprep.subr.bf16.mxu0 %v12920_v0 }
 0x7e3   : > { %v12102_v62 = vunpack.i.h.bf16 %v12100_v13  ;;  %v12101_v4 = vunpack.i.l.bf16 %v12100_v13  ;;  %v12107_v25 = vunpack.i.h.bf16 %v12105_v14  ;;  %v12106_v33 = vunpack.i.l.bf16 %v12105_v14 }
 0x7e5   : > { %11146 = vmatpush1.bf16.msra.mxu0 %v9115_v58  ;;  %v6767_v54 = vsel %vm6372_vm2, %v6682_v5, %v12107_v25  ;;  %v6745_v28 = vsel %vm5832_vm13, %v12101_v4, %v12102_v62  ;;  %v6731_v9 = vsel %vm6372_vm2, %v6724_v2, %v12106_v33 }
 0x7e6   : > { %v6730_v19 = vpop.permute.xlu1 %6729  ;;  %v12110_v18 = vpop.permute.xlu0 %12109  ;;  %7014 = vmatprep.mubr.f32.mxu0 %v6767_v54  ;;  %v6770_v41 = vsel %vm6759_vm0, %v6745_v28, %v15253_v30  ;;  %v6768_v44 = vsel %vm5832_vm13, %v6731_v9, %v12101_v4  ;;  %11147 = vmatprep.subr.bf16.mxu0 %v12920_v0 }
 0x7e7   : > { %v12112_v3 = vunpack.i.h.bf16 %v12110_v18  ;;  %v12111_v26 = vunpack.i.l.bf16 %v12110_v18  ;;  %7015 = vmatmul.mubr.f32.gmra.mrb[188].mxu0 %v6679_v22  ;;  %7084 = vmatprep.mubr.f32.mxu1 %v6770_v41  ;;  %v6732_v29 = vsel %vm6372_vm2, %v12107_v25, %v6730_v19  ;;  %vm7669_vm2 = vcmask 613376  }
 0x7e8   : > { %7085 = vmatmul.mubr.f32.vlgmr.msra.gmra.mrb[62].mxu1 %v6768_v44 }
 0x7e9   : > { %11149 = vmatpush1.bf16.msra.mxu0 %v9116_v20  ;;  %v6746_v52 = vsel %vm5832_vm13, %v12111_v26, %v12112_v3  ;;  %v6769_v23 = vsel %vm5832_vm13, %v6732_v29, %v12111_v26  ;;  %11170 = vmatpush3.bf16.msra.mxu1 %v8851_v21  ;;  %v9139_v21 = vld [vmem:[%s15346_s0 + $0x58] sm:$0xff]   ;;  %vm7388_vm13 = vcmask 916480  }
 0x7ea   : > { %v6754_v47 = vpop.permute.xlu1 %6753  ;;  %v6756_v42 = vpop.permute.xlu0 %6755  ;;  %11150 = vmatprep.subr.bf16.mxu0 %v12920_v0  ;;  %11171 = vmatprep.subr.bf16.mxu1 %v12920_v0 }
 0x7eb   : > { %8631 = vmatprep.mubr.msk.f32.mxu0 %vm6100_vm14, %v6754_v47  ;;  %v6771_v36 = vsel %vm6759_vm0, %v6746_v52, %v6756_v42  ;;  %v6760_v37 = vsel %vm6759_vm0, %v15253_v30, %v6754_v47 }
 0x7ec   : > { %7089 = vmatprep.mubr.f32.mxu1 %v6771_v36 }
 0x7ed   : > { %7090 = vmatmul.mubr.f32.gmra.mrb[64].mxu1 %v6769_v23  ;;  %11152 = vmatpush1.bf16.msra.mxu0 %v9117_v32 }
 0x7ee   : > { %11153 = vmatprep.subr.bf16.mxu0 %v12920_v0  ;;  %9765 = vmatprep.mubr.msk.f32.mxu1 %vm12921_vm12, %v15612_v45  ;;  %v6758_v63 = vpop.permute.xlu0 %6757 }
 0x7ef   : > { %v6761_v56 = vsel %vm6759_vm0, %v6756_v42, %v6758_v63  ;;  %11173 = vmatpush3.bf16.msra.mxu1 %v9123_v39  ;;  %v9131_v39 = vld [vmem:[%s15346_s0 + $0x18] sm:$0xff]   ;;  %vm7924_vm0 = vcmask 793600  }
 0x7f0   : > { %11174 = vmatprep.subr.bf16.mxu1 %v12920_v0 }
 0x7f1   : > { %11155 = vmatpush1.bf16.msra.mxu0 %v9118_v53  ;;  %v9144_v53 = vld [vmem:[%s15346_s0 + $0x80] sm:$0xff]  }
 0x7f2   : > { %11156 = vmatprep.subr.bf16.mxu0 %v12920_v0 }
 0x7f3   : > { %11176 = vmatpush3.bf16.msra.mxu1 %v9124_v17  ;;  %v9148_v17 = vld [vmem:[%s15346_s0 + $0xa0] sm:$0xff]  }
 0x7f4   : > { %11177 = vmatprep.subr.bf16.mxu1 %v12920_v0 }
 0x7f5   : > { %11158 = vmatpush1.bf16.msra.mxu0 %v9119_v6  ;;  %v9145_v6 = vld [vmem:[%s15346_s0 + $0x88] sm:$0xff]  }
 0x7f6   : > { %11159 = vmatprep.subr.bf16.mxu0 %v12920_v0 }
 0x7f7   : > { %11179 = vmatpush3.bf16.msra.mxu1 %v9125_v27  ;;  %v9140_v27 = vld [vmem:[%s15346_s0 + $0x60] sm:$0xff]  }
 0x7f8   : > { %11180 = vmatprep.subr.bf16.mxu1 %v12920_v0 }
 0x7f9   : > { %11161 = vmatpush1.bf16.msra.mxu0 %v9120_v61  ;;  %v9136_v61 = vld [vmem:[%s15346_s0 + $0x40] sm:$0xff]  }
 0x7fa   : > { %11162 = vmatprep.subr.bf16.mxu0 %v12920_v0 }
 0x7fb   : > { %11182 = vmatpush3.bf16.msra.mxu1 %v9126_v40  ;;  %v9132_v40 = vld [vmem:[%s15346_s0 + $0x20] sm:$0xff]  }
 0x7fc   : > { %11183 = vmatprep.subr.bf16.mxu1 %v12920_v0 }
 0x7fd   : > { %11164 = vmatpush1.bf16.msra.mxu0 %v9121_v50  ;;  %v8879_v50 = vld [vmem:[%s15346_s0] sm:$0xff]  }
 0x7fe   : > { %11165 = vmatprep.subr.bf16.mxu0 %v12920_v0 }
 0x7ff   : > { %11185 = vmatpush3.bf16.msra.mxu1 %v9127_v12  ;;  %v9149_v12 = vld [vmem:[%s15346_s0 + $0xa8] sm:$0xff]  }
 0x800   : > { %11186 = vmatprep.subr.bf16.mxu1 %v12920_v0 }
 0x801   : > { %11167 = vmatpush1.bf16.msra.mxu0 %v9122_v51  ;;  %v9137_v51 = vld [vmem:[%s15346_s0 + $0x48] sm:$0xff]  }
 0x802   : > { %7131 = vmatprep.subr.mxu0 %v15612_v45 }
 0x803   : > { %11188 = vmatpush3.bf16.msra.mxu1 %v9128_v59  ;;  %v9141_v59 = vld [vmem:[%s15346_s0 + $0x68] sm:$0xff]  }
 0x804   : > { %9763 = vmatprep.subr.mxu1 %v15612_v45 }
 0x805   : > { %8630 = vmatpush1.msk.msra.mxu0 %vm5453_vm9, %v6937_v55  ;;  %v9146_v55 = vld [vmem:[%s15346_s0 + $0x90] sm:$0xff]  }
 0x806   : > { %7160 = vmatmul.mubr.f32.vlgmr.msra.gmra.mrb[190].mxu0 %v6760_v37  ;;  %11190 = vmatprep.subr.bf16.mxu0 %v9136_v61  ;;  %v9138_v37 = vld [vmem:[%s15346_s0 + $0x50] sm:$0xff]  }
 0x807   : > { %8632 = vmatprep.mubr.msk.f32.mxu0 %vm6100_vm14, %v6758_v63  ;;  %9764 = vmatpush3.msra.mxu1 %v7221_v35  ;;  %v9130_v63 = vld [vmem:[%s15346_s0 + $0x10] sm:$0xff]   ;;  %vm11277_vm14 = vmpackc.low %vm6706_vm6, %vm12917_vm1 }
 0x808   : > { %11221 = vmatprep.subr.bf16.mxu1 %v12920_v0  ;;  %11192 = vmatpush3.bf16.msra.mxu0 %v8879_v50  ;;  %v9150_v35 = vld [vmem:[%s15346_s0 + $0xb0] sm:$0xff]  }
 0x809   : > { %11194 = vmatprep.subr.bf16.mxu0 %v9137_v51 }
 0x80a   : > { %7165 = vmatmul.mubr.f32.gmra.mrb[192].mxu0 %v6761_v56  ;;  %v9147_v56 = vld [vmem:[%s15346_s0 + $0x98] sm:$0xff]  }
 0x80c   : > { %11196 = vmatpush3.bf16.msra.mxu0 %v9129_v8 }
 0x80d   : > { %11198 = vmatprep.subr.bf16.mxu0 %v9138_v37 }
 0x810   : > { %11200 = vmatpush3.bf16.msra.mxu0 %v9130_v63 }
 0x811   : > { %11202 = vmatprep.subr.bf16.mxu0 %v9139_v21 }
 0x814   : > { %11204 = vmatpush3.bf16.msra.mxu0 %v9131_v39 }
 0x815   : > { %11206 = vmatprep.subr.bf16.mxu0 %v9140_v27 }
 0x818   : > { %11208 = vmatpush3.bf16.msra.mxu0 %v9132_v40 }
 0x819   : > { %11210 = vmatprep.subr.bf16.mxu0 %v9141_v59 }
 0x81c   : > { %11212 = vmatpush3.bf16.msra.mxu0 %v9133_v16 }
 0x8b3   : > { %v9575_v46 = vpop.f32.mrb[186].mxu0 }
 0x8b4   : > { %v9576_v11 = vpop.f32.mrb[187].mxu0 }
 0x8b5   : > { %v9577_v48 = vadd.f32 %v9576_v11, %v9575_v46  ;;  %v9142_v46 = vld [vmem:[%s15346_s0 + $0x70] sm:$0xff]  }
 0x8b6   : > { %11214 = vmatprep.subr.bf16.mxu0 %v9142_v46  ;;  %v9134_v11 = vld [vmem:[%s15346_s0 + $0x30] sm:$0xff]  }
 0x8b7   : > { %11216 = vmatpush3.bf16.msra.mxu0 %v9134_v11 }
 0x8ba   : > { %v9578_v10 = vpop.f32.mrb[188].mxu0 }
 0x8bb   : > { %v9579_v43 = vpop.f32.mrb[189].mxu0  ;;  %v9613_v15 = vpop.f32.mrb[62].mxu1 }
 0x8bc   : > { %v9580_v49 = vadd.f32 %v9579_v43, %v9578_v10  ;;  %v9614_v34 = vpop.f32.mrb[63].mxu1  ;;  %v9152_v10 = vld [vmem:[%s15346_s0 + $0xc0] sm:$0xff]   ;;  %v9153_v43 = vld [vmem:[%s15346_s0 + $0xc8] sm:$0xff]  }
 0x8bd   : > { %v9615_v57 = vadd.f32 %v9614_v34, %v9613_v15  ;;  %v9154_v15 = vld [vmem:[%s15346_s0 + $0xd0] sm:$0xff]   ;;  %v9156_v34 = vld [vmem:[%s15346_s0 + $0xe0] sm:$0xff]  }
 0x8bf   : > { %v7087_v5 = vadd.f32 %v9615_v57, %v9577_v48  ;;  %v9151_v48 = vld [vmem:[%s15346_s0 + $0xb8] sm:$0xff]  }
 0x8c0   : > { %v9616_v22 = vpop.f32.mrb[64].mxu1 }
 0x8c1   : > { %v9617_v1 = vpop.f32.mrb[65].mxu1 }
 0x8c2   : > { %v9618_v38 = vadd.f32 %v9617_v1, %v9616_v22 }
 0x8c4   : > { %v7092_v30 = vadd.f32 %v9618_v38, %v9580_v49  ;;  %v9155_v49 = vld [vmem:[%s15346_s0 + $0xd8] sm:$0xff]  }
 0x8d9   : > { %v7161_v2 = vpop.f32.mrb[190].mxu0 }
 0x8da   : > { %v15326_v31 = vadd.f32 %v7161_v2, %v7087_v5  ;;  %v7163_v60 = vpop.f32.mrb[191].mxu0 }
 0x8dc   : > { %v7180_v14 = vmul.f32 %v15326_v31, %v15326_v31  ;;  %v7171_v4 = vsel %vm7170_vm8, %v15326_v31, 0.0 }
 0x8dd   : > { %v7166_v13 = vpop.f32.mrb[192].mxu0 }
 0x8de   : > { %v15330_v58 = vadd.f32 %v7166_v13, %v7092_v30  ;;  %v7168_v62 = vpop.f32.mrb[193].mxu0  ;;  %v7182_v28 = vsel %vm7170_vm8, %v7180_v14, 0.0 }
 0x8e0   : > { %v7172_v25 = vsel %vm7170_vm8, %v15330_v58, 0.0  ;;  %v7181_v33 = vmul.f32 %v15330_v58, %v15330_v58 }
 0x8e1   : > { %v7173_v54 = vadd.f32 %v7172_v25, %v7171_v4  ;;  %v8634_v25 = vld [vmem:[%s965_s28] ss:$0 sm:$0xff] }
 0x8e2   : > { %v7183_v9 = vsel %vm7170_vm8, %v7181_v33, 0.0 }
 0x8e3   : > { %v7174_v19 = vrot.slane %v7173_v54, 4  ;;  %v7184_v18 = vadd.f32 %v7183_v9, %v7182_v28  ;;  %v8635_v28 = vld [vmem:[%s968_s7] ss:$0 sm:$0xff]  ;;  %s976_s7 = scalar_lea.vmem %s15572_s14, %s15622_s26 }
 0x8e5   : > { %v7175_v41 = vadd.f32 %v7174_v19, %v7173_v54  ;;  %v7185_v44 = vrot.slane %v7184_v18, 4 }
 0x8e7   : > { %v7176_v20 = vrot.slane %v7175_v41, 2  ;;  %v7186_v3 = vadd.f32 %v7185_v44, %v7184_v18 }
 0x8e9   : > { %v7177_v26 = vadd.f32 %v7176_v20, %v7175_v41  ;;  %v7187_v29 = vrot.slane %v7186_v3, 2 }
 0x8eb   : > { %v7178_v52 = vrot.slane %v7177_v26, 1  ;;  %v7188_v47 = vadd.f32 %v7187_v29, %v7186_v3  ;;  %v9143_v29 = vld [vmem:[%s15346_s0 + $0x78] sm:$0xff]  }
 0x8ec   : > { %11218 = vmatprep.subr.bf16.mxu0 %v9143_v29 }
 0x8ed   : > { %v7189_v42 = vrot.slane %v7188_v47, 1  ;;  %v7179_v32 = vadd.f32 %v7178_v52, %v7177_v26  ;;  %v9157_v52 = vld [vmem:[%s15346_s0 + $0xe8] sm:$0xff]  }
 0x8ef   : > { %v7190_v36 = vadd.f32 %v7189_v42, %v7188_v47  ;;  %v9135_v47 = vld [vmem:[%s15346_s0 + $0x38] sm:$0xff]   ;;  %s11930_s0 = smul.u32 116, %s15622_s26 }
 0x8f0   : > { %11220 = vmatpush3.bf16.msra.mxu0 %v9135_v47 }
 0x8f1   : > { %v7191_v23 = vsel %vm3751_vm7, %v7179_v32, %v7190_v36  ;;  %11279 = vmatprep.subr.bf16.mxu0 %v12920_v0  ;;  %s15459_s28 = scalar_lea.vmem %s15575_s17, %s11930_s0  ;;  %s12928_s0 = smov 75  }
 0x8f2   : > { %9766 = vmatmul.mubr.msk.f32.vlgmr.msra.gmra.mrb[66].mxu1 %vm7170_vm8, %v7191_v23 }
 0x8f3   : > { %11223 = vmatpush1.bf16.msra.mxu1 %v9144_v53 }
 0x8f4   : > { %11224 = vmatprep.subr.bf16.mxu1 %v12920_v0 }
 0x8f7   : > { %11226 = vmatpush1.bf16.msra.mxu1 %v9145_v6 }
 0x8f8   : > { %11227 = vmatprep.subr.bf16.mxu1 %v12920_v0 }
 0x8fb   : > { %11229 = vmatpush1.bf16.msra.mxu1 %v9146_v55 }
 0x8fc   : > { %11230 = vmatprep.subr.bf16.mxu1 %v12920_v0 }
 0x8ff   : > { %11232 = vmatpush1.bf16.msra.mxu1 %v9147_v56 }
 0x900   : > { %11233 = vmatprep.subr.bf16.mxu1 %v12920_v0 }
 0x903   : > { %11235 = vmatpush1.bf16.msra.mxu1 %v9148_v17 }
 0x904   : > { %11236 = vmatprep.subr.bf16.mxu1 %v12920_v0 }
 0x907   : > { %11238 = vmatpush1.bf16.msra.mxu1 %v9149_v12 }
 0x908   : > { %11239 = vmatprep.subr.bf16.mxu1 %v12920_v0 }
 0x90b   : > { %11241 = vmatpush1.bf16.msra.mxu1 %v9150_v35 }
 0x90c   : > { %11242 = vmatprep.subr.bf16.mxu1 %v12920_v0 }
 0x90f   : > { %11244 = vmatpush1.bf16.msra.mxu1 %v9151_v48 }
 0x910   : > { %11245 = vmatprep.subr.bf16.mxu1 %v12920_v0 }
 0x913   : > { %11247 = vmatpush1.bf16.msra.mxu1 %v9152_v10 }
 0x914   : > { %11248 = vmatprep.subr.bf16.mxu1 %v12920_v0 }
 0x917   : > { %11250 = vmatpush1.bf16.msra.mxu1 %v9153_v43  ;;  %v8999_v43 = vld [vmem:[%s15574_s16] sm:$0xff]  }
 0x918   : > { %11251 = vmatprep.subr.bf16.mxu1 %v12920_v0 }
 0x91b   : > { %11253 = vmatpush1.bf16.msra.mxu1 %v9154_v15  ;;  %v9158_v15 = vld [vmem:[%s15574_s16 + $0x8] sm:$0xff]  }
 0x91c   : > { %11254 = vmatprep.subr.bf16.mxu1 %v12920_v0 }
 0x91f   : > { %11256 = vmatpush1.bf16.msra.mxu1 %v9155_v49  ;;  %v9159_v49 = vld [vmem:[%s15574_s16 + $0x10] sm:$0xff]  }
 0x920   : > { %11257 = vmatprep.subr.bf16.mxu1 %v12920_v0 }
 0x923   : > { %11259 = vmatpush1.bf16.msra.mxu1 %v9156_v34  ;;  %v9160_v34 = vld [vmem:[%s15574_s16 + $0x18] sm:$0xff]  }
 0x924   : > { %11260 = vmatprep.subr.bf16.mxu1 %v12920_v0 }
 0x927   : > { %11262 = vmatpush1.bf16.msra.mxu1 %v9157_v52 }
 0x928   : > { %11263 = vmatprep.subr.bf16.mxu1 %v12920_v0 }
 0x9c5   : > { %v7291_v57 = vpop.f32.mrb[66].mxu1 }
 0x9c6   : > { %v7295_v5 = vmul.f32 0.0078125, %v7291_v57  ;;  %v9767_v22 = vpop.f32.mrb[67].mxu1  ;;  %v12779_v57 = vld [vmem:[%s15574_s16 + $0x20] sm:$0x3f]  }
 0x9c8   : > { %v7296_v1 = vmul.f32 %v7295_v5, %v7295_v5  ;;  %v7304_v60 = vrot.slane %v7295_v5, %v14861_v24 }
 0x9ca   : > { %v7298_v38 = vrot.slane %v7296_v1, 7  ;;  %v7305_v14 = vsub.f32 %v15326_v31, %v7304_v60  ;;  %v7306_v62 = vsub.f32 %v15330_v58, %v7304_v60 }
 0x9cc   : > { %v7300_v30 = vsub.f32 %v7295_v5, %v7298_v38 }
 0x9ce   : > { %v7307_v2 = vadd.f32 1e-05, %v7300_v30 }
 0x9d0   : > { %12881 = vrsqrt.f32 %v7307_v2 }
 0x9da   : > { %v12882_v13 = vpop.eup %12881 }
 0x9db   : > { %v7312_v4 = vrot.slane %v12882_v13, %v14864_v7 }
 0x9dd   : > { %v7313_v33 = vmul.f32 %v7312_v4, %v7305_v14  ;;  %v7314_v54 = vmul.f32 %v7312_v4, %v7306_v62 }
 0x9df   : > { %v7322_v9 = vmul.f32 %v8634_v25, %v7313_v33  ;;  %v7323_v19 = vmul.f32 %v8634_v25, %v7314_v54 }
 0x9e1   : > { %v7331_v18 = vadd.f32 %v8635_v28, %v7322_v9  ;;  %v7332_v41 = vadd.f32 %v8635_v28, %v7323_v19 }
 0x9e3   : > { %v8636_v44 = vmul.f32 -1.442695, %v7331_v18  ;;  %v8637_v20 = vmul.f32 -1.442695, %v7332_v41 }
 0x9e5   : > { %12883 = vpow2.f32 %v8636_v44 }
 0x9e6   : > { %12885 = vpow2.f32 %v8637_v20 }
 0x9ef   : > { %v12884_v31 = vpop.eup %12883 }
 0x9f0   : > { %v12886_v3 = vpop.eup %12885  ;;  %v7339_v58 = vadd.f32 1.0, %v12884_v31 }
 0x9f1   : > { %v7340_v26 = vadd.f32 1.0, %v12886_v3 }
 0x9f2   : > { %12887 = vrcp.f32 %v7339_v58 }
 0x9f3   : > { %12889 = vrcp.f32 %v7340_v26 }
 0x9fc   : > { %v12888_v42 = vpop.eup %12887 }
 0x9fd   : > { %v12890_v32 = vpop.eup %12889  ;;  %v7355_v36 = vrot.slane %v12888_v42, 2  ;;  %v7350_v23 = vrot.slane %v12888_v42, 1  ;;  %v7360_v50 = vrot.slane %v12888_v42, 3 }
 0x9fe   : > { %v7357_v53 = vrot.slane %v12890_v32, 5  ;;  %v7352_v6 = vrot.slane %v12890_v32, 4  ;;  %v7346_v61 = vrot.slane %v12890_v32, 3  ;;  %v7362_v55 = vrot.slane %v12890_v32, 6 }
 0xa00   : > { %v7359_v51 = vsel %vm6479_vm15, %v7355_v36, %v7357_v53  ;;  %v7354_v8 = vsel %vm6479_vm15, %v7350_v23, %v7352_v6  ;;  %v7348_v37 = vsel %vm6479_vm15, %v12888_v42, %v7346_v61  ;;  %v7364_v56 = vsel %vm6479_vm15, %v7360_v50, %v7362_v55  ;;  %v9162_v50 = vld [vmem:[%s15459_s28 + $0x10] sm:$0xff]  }
 0xa01   : > { %7373 = vrot.lane.b32.xlu0 %v7359_v51, %s12925_s30  ;;  %v12113_v63 = vpack.i.bf16 %v7352_v6, %v7354_v8  ;;  %v9015_v6 = vld [vmem:[%s15459_s28] sm:$0xff]   ;;  %v9163_v51 = vld [vmem:[%s15459_s28 + $0x18] sm:$0xff]  }
 0xa02   : > { %v9164_v8 = vld [vmem:[%s15459_s28 + $0x20] sm:$0xff]  }
 0xa03   : > { %12114 = vrot.lane.b32.xlu1 %v12113_v63, %s12926_s8  ;;  %v9167_v63 = vld [vmem:[%s15459_s28 + $0x38] sm:$0xff]  }
 0xa05   : > { %7380 = vrot.lane.b32.xlu0 %v7364_v56, %s12927_s2  ;;  %v9168_v56 = vld [vmem:[%s15459_s28 + $0x40] sm:$0xff]  }
 0xa07   : > { %7375 = vrot.lane.b32.xlu1 %v7357_v53, %s12925_s30  ;;  %s994_s30 = scalar_lea.vmem %s15579_s21, %s8476_s29 }
 0xa0b   : > { %7382 = vrot.lane.b32.xlu1 %v7362_v55, %s12927_s2  ;;  %v9165_v55 = vld [vmem:[%s15459_s28 + $0x28] sm:$0xff]   ;;  %s979_s2 = scalar_lea.vmem %s15573_s15, %s15622_s26 }
 0xa73   : > { %v7374_v21 = vpop.permute.xlu0 %7373 }
 0xa75   : > { %v12115_v39 = vpop.permute.xlu1 %12114 }
 0xa76   : > { %v12116_v17 = vunpack.i.l.bf16 %v12115_v39  ;;  %v12117_v40 = vunpack.i.h.bf16 %v12115_v39  ;;  %v9170_v39 = vld [vmem:[%s15459_s28 + $0x50] sm:$0xff]  }
 0xa77   : > { %v7381_v27 = vpop.permute.xlu0 %7380 }
 0xa78   : > { %v7392_v12 = vsel %vm7391_vm10, %v7374_v21, %v7381_v27  ;;  %8638 = vmatprep.mubr.msk.f32.mxu1 %vm7514_vm11, %v7381_v27  ;;  %v7389_v59 = vsel %vm7388_vm13, %v12116_v17, %v7374_v21  ;;  %v7386_v16 = vsel %vm7170_vm8, %v7348_v37, %v12116_v17  ;;  %v7387_v48 = vsel %vm7170_vm8, %v7346_v61, %v12117_v40  ;;  %v9161_v61 = vld [vmem:[%s15459_s28 + $0x8] sm:$0xff]   ;;  %v9166_v37 = vld [vmem:[%s15459_s28 + $0x30] sm:$0xff]   ;;  %v9171_v17 = vld [vmem:[%s15459_s28 + $0x58] sm:$0xff]  }
 0xa79   : > { %7659 = vmatmul.mubr.f32.vlgmr.msra.gmra.mrb[68].mxu1 %v7392_v12  ;;  %v7376_v35 = vpop.permute.xlu1 %7375  ;;  %7583 = vmatprep.mubr.f32.mxu0 %v7389_v59  ;;  %v9169_v21 = vld [vmem:[%s15459_s28 + $0x48] sm:$0xff]   ;;  %v9172_v27 = vld [vmem:[%s15459_s28 + $0x60] sm:$0xff]  }
 0xa7a   : > { %7584 = vmatmul.mubr.f32.vlgmr.msra.gmra.mrb[194].mxu0 %v7386_v16  ;;  %v7390_v46 = vsel %vm7388_vm13, %v12117_v40, %v7376_v35  ;;  %11265 = vmatpush3.bf16.msra.mxu1 %v8999_v43  ;;  %v9173_v40 = vld [vmem:[%s15459_s28 + $0x68] sm:$0xff]  }
 0xa7b   : > { %7588 = vmatprep.mubr.f32.mxu0 %v7390_v46  ;;  %11266 = vmatprep.subr.bf16.mxu1 %v12920_v0 }
 0xa7c   : > { %11281 = vmatpush1.bf16.msra.mxu0 %v9015_v6  ;;  %v9174_v6 = vld [vmem:[%s15578_s20 + $0x8] sm:$0xff]  }
 0xa7d   : > { %v7383_v11 = vpop.permute.xlu1 %7382  ;;  %11282 = vmatprep.subr.bf16.mxu0 %v12920_v0 }
 0xa7e   : > { %7589 = vmatmul.mubr.f32.gmra.mrb[196].mxu0 %v7387_v48  ;;  %8639 = vmatprep.mubr.msk.f32.mxu1 %vm7514_vm11, %v7383_v11  ;;  %v7393_v10 = vsel %vm7391_vm10, %v7376_v35, %v7383_v11 }
 0xa7f   : > { %7664 = vmatmul.mubr.f32.gmra.mrb[70].mxu1 %v7393_v10 }
 0xa80   : > { %9788 = vmatprep.mubr.msk.f32.mxu1 %vm12921_vm12, %v15612_v45  ;;  %11268 = vmatpush3.bf16.msra.mxu1 %v9158_v15 }
 0xa81   : > { %11269 = vmatprep.subr.bf16.mxu1 %v12920_v0  ;;  %11284 = vmatpush1.bf16.msra.mxu0 %v9161_v61  ;;  %v12780_v61 = vld [vmem:[%s15578_s20 + $0x10] sm:$0x7f]  }
 0xa82   : > { %11285 = vmatprep.subr.bf16.mxu0 %v12920_v0 }
 0xa84   : > { %11271 = vmatpush3.bf16.msra.mxu1 %v9159_v49 }
 0xa85   : > { %11272 = vmatprep.subr.bf16.mxu1 %v12920_v0  ;;  %11287 = vmatpush1.bf16.msra.mxu0 %v9162_v50 }
 0xa86   : > { %11288 = vmatprep.subr.bf16.mxu0 %v12920_v0 }
 0xa88   : > { %11274 = vmatpush3.bf16.msra.mxu1 %v9160_v34 }
 0xa89   : > { %11275 = vmatprep.subr.bf16.mxu1 %v12920_v0  ;;  %11290 = vmatpush1.bf16.msra.mxu0 %v9163_v51 }
 0xa8a   : > { %11291 = vmatprep.subr.bf16.mxu0 %v12920_v0 }
 0xa8c   : > { %11278 = vmatpush3.bf16.msk.msra.mxu1 %vm11277_vm14, %v12779_v57  ;;  %v8642_v57 = vld [vmem:[%s976_s7] ss:$0 sm:$0xff] }
 0xa8d   : > { %11321 = vmatprep.subr.bf16.mxu1 %v12920_v0  ;;  %11293 = vmatpush1.bf16.msra.mxu0 %v9164_v8 }
 0xa8e   : > { %11294 = vmatprep.subr.bf16.mxu0 %v12920_v0 }
 0xa91   : > { %11296 = vmatpush1.bf16.msra.mxu0 %v9165_v55 }
 0xa92   : > { %11297 = vmatprep.subr.bf16.mxu0 %v12920_v0 }
 0xa95   : > { %11299 = vmatpush1.bf16.msra.mxu0 %v9166_v37 }
 0xa96   : > { %11300 = vmatprep.subr.bf16.mxu0 %v12920_v0 }
 0xa99   : > { %11302 = vmatpush1.bf16.msra.mxu0 %v9167_v63 }
 0xa9a   : > { %11303 = vmatprep.subr.bf16.mxu0 %v12920_v0 }
 0xa9d   : > { %11305 = vmatpush1.bf16.msra.mxu0 %v9168_v56 }
 0xa9e   : > { %11306 = vmatprep.subr.bf16.mxu0 %v12920_v0 }
 0xaa1   : > { %11308 = vmatpush1.bf16.msra.mxu0 %v9169_v21 }
 0xaa2   : > { %11309 = vmatprep.subr.bf16.mxu0 %v12920_v0 }
 0xaa5   : > { %11311 = vmatpush1.bf16.msra.mxu0 %v9170_v39 }
 0xaa6   : > { %11312 = vmatprep.subr.bf16.mxu0 %v12920_v0 }
 0xaa9   : > { %11314 = vmatpush1.bf16.msra.mxu0 %v9171_v17 }
 0xaaa   : > { %11315 = vmatprep.subr.bf16.mxu0 %v12920_v0 }
 0xaad   : > { %11317 = vmatpush1.bf16.msra.mxu0 %v9172_v27 }
 0xaae   : > { %11318 = vmatprep.subr.bf16.mxu0 %v12920_v0 }
 0xab1   : > { %11320 = vmatpush1.bf16.msra.mxu0 %v9173_v40 }
 0xab2   : > { %7987 = vmatprep.subr.mxu0 %v15612_v45 }
 0xb4c   : > { %v7660_v5 = vpop.f32.mrb[68].mxu1 }
 0xb4d   : > { %v9667_v22 = vpop.f32.mrb[194].mxu0  ;;  %v7662_v1 = vpop.f32.mrb[69].mxu1 }
 0xb4e   : > { %v9668_v38 = vpop.f32.mrb[195].mxu0  ;;  %v8643_v1 = vld [vmem:[%s979_s2] ss:$0 sm:$0xff] }
 0xb4f   : > { %v9669_v30 = vadd.f32 %v9668_v38, %v9667_v22 }
 0xb51   : > { %v15439_v2 = vadd.f32 %v9669_v30, %v7660_v5  ;;  %v9670_v60 = vpop.f32.mrb[196].mxu0 }
 0xb52   : > { %v9671_v13 = vpop.f32.mrb[197].mxu0  ;;  %v7665_v14 = vpop.f32.mrb[70].mxu1 }
 0xb53   : > { %v9672_v62 = vadd.f32 %v9671_v13, %v9670_v60  ;;  %v7667_v4 = vpop.f32.mrb[71].mxu1  ;;  %v7680_v25 = vmul.f32 %v15439_v2, %v15439_v2  ;;  %v7670_v54 = vsel %vm7669_vm2, %v15439_v2, 0.0 }
 0xb55   : > { %v15443_v33 = vadd.f32 %v9672_v62, %v7665_v14  ;;  %v7682_v18 = vsel %vm7669_vm2, %v7680_v25, 0.0 }
 0xb57   : > { %v7672_v28 = vsel %vm7671_vm4, %v15443_v33, 0.0  ;;  %v7681_v9 = vmul.f32 %v15443_v33, %v15443_v33 }
 0xb58   : > { %v7673_v19 = vadd.f32 %v7672_v28, %v7670_v54 }
 0xb59   : > { %v7683_v41 = vsel %vm7671_vm4, %v7681_v9, 0.0 }
 0xb5a   : > { %v7674_v44 = vrot.slane %v7673_v19, 4  ;;  %v7684_v20 = vadd.f32 %v7683_v41, %v7682_v18 }
 0xb5c   : > { %v7675_v31 = vadd.f32 %v7674_v44, %v7673_v19  ;;  %v7685_v3 = vrot.slane %v7684_v20, 4 }
 0xb5e   : > { %v7676_v58 = vrot.slane %v7675_v31, 2  ;;  %v7686_v26 = vadd.f32 %v7685_v3, %v7684_v20 }
 0xb60   : > { %v7677_v29 = vadd.f32 %v7676_v58, %v7675_v31  ;;  %v7687_v52 = vrot.slane %v7686_v26, 2 }
 0xb62   : > { %v7678_v47 = vrot.slane %v7677_v29, 1  ;;  %v7688_v42 = vadd.f32 %v7687_v52, %v7686_v26 }
 0xb64   : > { %v7689_v32 = vrot.slane %v7688_v42, 1  ;;  %v7679_v36 = vadd.f32 %v7678_v47, %v7677_v29 }
 0xb66   : > { %v7690_v23 = vadd.f32 %v7689_v32, %v7688_v42 }
 0xb68   : > { %v7691_v53 = vsel %vm3751_vm7, %v7679_v36, %v7690_v23 }
 0xb69   : > { %9789 = vmatmul.mubr.msk.f32.vlgmr.msra.gmra.mrb[72].mxu1 %vm7669_vm2, %v7691_v53  ;;  %v9071_v53 = vld [vmem:[%s15578_s20] sm:$0xff]  }
 0xb6a   : > { %9803 = vmatprep.mubr.msk.f32.mxu1 %vm12921_vm12, %v15612_v45  ;;  %11323 = vmatpush3.bf16.msra.mxu1 %v9071_v53 }
 0xb6b   : > { %11324 = vmatprep.subr.bf16.mxu1 %v12920_v0 }
 0xb6e   : > { %11326 = vmatpush3.bf16.msra.mxu1 %v9174_v6 }
 0xb6f   : > { %11327 = vmatprep.subr.bf16.mxu1 %v12920_v0 }
 0xc3c   : > { %v7784_v12 = vpop.f32.mrb[72].mxu1 }
 0xc3d   : > { %v7788_v59 = vmul.f32 0.02, %v7784_v12  ;;  %v9790_v16 = vpop.f32.mrb[73].mxu1 }
 0xc3f   : > { %v7789_v35 = vmul.f32 %v7788_v59, %v7788_v59  ;;  %v7797_v10 = vrot.slane %v7788_v59, %v14861_v24 }
 0xc41   : > { %v7791_v46 = vrot.slane %v7789_v35, 7  ;;  %v7798_v15 = vsub.f32 %v15439_v2, %v7797_v10  ;;  %v7799_v49 = vsub.f32 %v15443_v33, %v7797_v10  ;;  %v7894_v33 = vld [vmem:[%s15459_s28 + $0x70] sm:$0x1]  ;;  %s990_s28 = scalar_lea.vmem %s15577_s19, %s15622_s26 }
 0xc42   : > { %v7923_v28 = vunpack.c.l.bf16 %v7894_v33 }
 0xc43   : > { %v7793_v11 = vsub.f32 %v7788_v59, %v7791_v46 }
 0xc44   : > { %8646 = vmatpush1.msk.msra.mxu0 %vm3751_vm7, %v7923_v28  ;;  %v8653_v28 = vld [vmem:[%s997_s25] ss:$0 sm:$0xff] }
 0xc45   : > { %v7800_v48 = vadd.f32 1e-05, %v7793_v11  ;;  %9806 = vmatprep.subr.mxu0 %v15612_v45 }
 0xc47   : > { %12891 = vrsqrt.f32 %v7800_v48 }
 0xc51   : > { %v12892_v43 = vpop.eup %12891 }
 0xc52   : > { %v7805_v34 = vrot.slane %v12892_v43, %v14864_v7 }
 0xc54   : > { %v7806_v5 = vmul.f32 %v7805_v34, %v7798_v15  ;;  %v7807_v22 = vmul.f32 %v7805_v34, %v7799_v49 }
 0xc56   : > { %v7815_v38 = vmul.f32 %v8642_v57, %v7806_v5  ;;  %v7816_v30 = vmul.f32 %v8642_v57, %v7807_v22 }
 0xc58   : > { %v7824_v60 = vadd.f32 %v8643_v1, %v7815_v38  ;;  %v7825_v13 = vadd.f32 %v8643_v1, %v7816_v30 }
 0xc5a   : > { %v8644_v14 = vmul.f32 -1.442695, %v7824_v60  ;;  %v8645_v62 = vmul.f32 -1.442695, %v7825_v13 }
 0xc5c   : > { %12893 = vpow2.f32 %v8644_v14 }
 0xc5d   : > { %12895 = vpow2.f32 %v8645_v62 }
 0xc66   : > { %v12894_v4 = vpop.eup %12893 }
 0xc67   : > { %v12896_v25 = vpop.eup %12895  ;;  %v7832_v2 = vadd.f32 1.0, %v12894_v4  ;;  %v8147_v4 = vld [vmem:[%s994_s30] sm:$0x3f] }
 0xc68   : > { %v7833_v54 = vadd.f32 1.0, %v12896_v25 }
 0xc69   : > { %12897 = vrcp.f32 %v7832_v2 }
 0xc6a   : > { %12899 = vrcp.f32 %v7833_v54  ;;  %v8152_v54 = vld [vmem:[%s15580_s22] sm:$0x3] }
 0xc73   : > { %v12898_v9 = vpop.eup %12897 }
 0xc74   : > { %v12900_v19 = vpop.eup %12899  ;;  %v7842_v18 = vrot.slane %v12898_v9, 1  ;;  %v7845_v41 = vrot.slane %v12898_v9, 3  ;;  %v7839_v44 = vrot.slane %v12898_v9, 2  ;;  %v7850_v20 = vrot.slane %v12898_v9, 4 }
 0xc75   : > { %v7846_v31 = vrot.slane %v12900_v19, 3  ;;  %v7851_v3 = vrot.slane %v12900_v19, 4 }
 0xc76   : > { %v7841_v58 = vsel %vm6706_vm6, %v12898_v9, %v7839_v44 }
 0xc77   : > { %v7847_v26 = vsel %vm6479_vm15, %v7845_v41, %v7846_v31  ;;  %v7852_v29 = vsel %vm5453_vm9, %v7850_v20, %v7851_v3  ;;  %vm11329_vm9 = vmpackc.low %vm6479_vm15, %vm12917_vm1  ;;  %vm8030_vm1 = vcmask 367616   ;;  %vm8237_vm15 = vcmask 1024  }
 0xc78   : > { %v7849_v52 = vsel %vm6706_vm6, %v7842_v18, %v7847_v26  ;;  %v7854_v47 = vsel %vm6706_vm6, %v7839_v44, %v7852_v29  ;;  %11330 = vmatpush3.bf16.msk.msra.mxu1 %vm11329_vm9, %v12780_v61 }
 0xc79   : > { %7856 = vrot.lane.b32.xlu0 %v7849_v52, %s12928_s0  ;;  %7860 = vrot.lane.b32.xlu1 %v7854_v47, %s12929_s3  ;;  %s987_s0 = scalar_lea.vmem %s15576_s18, %s15622_s26 }
 0xc7a   : > { %v8650_v1 = vld [vmem:[%s987_s0] ss:$0 sm:$0xff] }
 0xceb   : > { %v7857_v42 = vpop.permute.xlu0 %7856  ;;  %v7861_v32 = vpop.permute.xlu1 %7860 }
 0xcec   : > { %v7863_v36 = vsel %vm7669_vm2, %v7841_v58, %v7857_v42  ;;  %v7865_v23 = vsel %vm7864_vm5, %v7857_v42, %v7861_v32 }
 0xced   : > { %8647 = vmatprep.mubr.msk.f32.mxu0 %vm7924_vm0, %v7865_v23 }
 0xcee   : > { %7996 = vmatmul.mubr.f32.vlgmr.msra.gmra.mrb[198].mxu0 %v7863_v36 }
 0xcef   : > { %9808 = vmatprep.mubr.msk.f32.mxu0 %vm12921_vm12, %v15612_v45  ;;  %vm8001_vm12 = vcmask 365568  }
 0xdc1   : > { %v7997_v45 = vpop.f32.mrb[198].mxu0 }
 0xdc2   : > { %v8002_v50 = vsel %vm8001_vm12, %v7997_v45, 0.0  ;;  %v8009_v51 = vmul.f32 %v7997_v45, %v7997_v45  ;;  %v7999_v8 = vpop.f32.mrb[199].mxu0 }
 0xdc3   : > { %v8003_v55 = vrot.slane %v8002_v50, 4 }
 0xdc4   : > { %v8010_v37 = vsel %vm8001_vm12, %v8009_v51, 0.0 }
 0xdc5   : > { %v8004_v63 = vadd.f32 %v8003_v55, %v8002_v50  ;;  %v8011_v56 = vrot.slane %v8010_v37, 4 }
 0xdc7   : > { %v8005_v21 = vrot.slane %v8004_v63, 2  ;;  %v8012_v39 = vadd.f32 %v8011_v56, %v8010_v37 }
 0xdc9   : > { %v8006_v17 = vadd.f32 %v8005_v21, %v8004_v63  ;;  %v8013_v27 = vrot.slane %v8012_v39, 2 }
 0xdcb   : > { %v8007_v0 = vrot.slane %v8006_v17, 1  ;;  %v8014_v40 = vadd.f32 %v8013_v27, %v8012_v39 }
 0xdcd   : > { %v8015_v12 = vrot.slane %v8014_v40, 1  ;;  %v8008_v59 = vadd.f32 %v8007_v0, %v8006_v17 }
 0xdcf   : > { %v8016_v16 = vadd.f32 %v8015_v12, %v8014_v40 }
 0xdd1   : > { %v8017_v35 = vsel %vm3751_vm7, %v8008_v59, %v8016_v16  ;;  %vm8160_vm7 = vcmask 48128  }
 0xdd2   : > { %9804 = vmatmul.mubr.msk.f32.vlgmr.msra.gmra.mrb[74].mxu1 %vm8030_vm1, %v8017_v35 }
 0xea5   : > { %v8103_v46 = vpop.f32.mrb[74].mxu1 }
 0xea6   : > { %v8107_v11 = vmul.f32 0.055555556, %v8103_v46  ;;  %v9805_v48 = vpop.f32.mrb[75].mxu1 }
 0xea8   : > { %v8108_v10 = vmul.f32 %v8107_v11, %v8107_v11  ;;  %v8116_v43 = vrot.slane %v8107_v11, %v14861_v24  ;;  %v8651_v24 = vld [vmem:[%s990_s28] ss:$0 sm:$0xff] }
 0xeaa   : > { %v8110_v15 = vrot.slane %v8108_v10, 7  ;;  %v8117_v49 = vsub.f32 %v7997_v45, %v8116_v43 }
 0xeac   : > { %v8112_v34 = vsub.f32 %v8107_v11, %v8110_v15 }
 0xeae   : > { %v8118_v57 = vadd.f32 1e-05, %v8112_v34 }
 0xeb0   : > { %12901 = vrsqrt.f32 %v8118_v57 }
 0xeba   : > { %v12902_v5 = vpop.eup %12901 }
 0xebb   : > { %v8123_v22 = vrot.slane %v12902_v5, %v14864_v7 }
 0xebd   : > { %v8124_v38 = vmul.f32 %v8123_v22, %v8117_v49 }
 0xebf   : > { %v8132_v30 = vmul.f32 %v8650_v1, %v8124_v38 }
 0xec1   : > { %v8140_v60 = vadd.f32 %v8651_v24, %v8132_v30 }
 0xec3   : > { %v8652_v13 = vmul.f32 -1.442695, %v8140_v60 }
 0xec5   : > { %12903 = vpow2.f32 %v8652_v13 }
 0xecf   : > { %v12904_v14 = vpop.eup %12903 }
 0xed0   : > { %v8144_v62 = vadd.f32 1.0, %v12904_v14 }
 0xed2   : > { %12905 = vrcp.f32 %v8144_v62 }
 0xedc   : > { %v12906_v25 = vpop.eup %12905 }
 0xedd   : > { %v8148_v7 = vmul.f32 %v12906_v25, %v8147_v4 }
 0xedf   : > { %v8149_v2 = vsel %vm8001_vm12, %v8148_v7, 0.0 }
 0xee0   : > { %8150 = vadd.xlane.f32.xlu0 %v8149_v2 }
 0xf6d   : > { %v8151_v33 = vpop.xlane.xlu0 %8150 }
 0xf6e   : > { %9807 = vmatpush3.msk.msra.mxu0 %vm6363_vm3, %v8151_v33 }
 0xf6f   : > { %9809 = vmatmul.mubr.msk.f32.vlgmr.msra.gmra.mrb[200].mxu0 %vm8160_vm7, %v8152_v54 }
0x1042   : > { %v8233_v9 = vpop.f32.mrb[200].mxu0 }
0x1043   : > { %v8234_v19 = vadd.f32 %v8653_v28, %v8233_v9  ;;  %v9810_v18 = vpop.f32.mrb[201].mxu0 }
0x1045   : > { %8238 = vst.msk [vmem:[%s1001_s1] sm:$0x3] %vm8237_vm15, %v8234_v19 }
0x1046 PF: > { %s34_s5 = sadd.s32 1, %s12914_s5  }
0x1047   : > { %p31_p4 = scmp.ge.s32.totalorder %s34_s5, 4  }
0x1049   :  { %33 = sbr.rel (!%p31_p4) target bundleno = 10 (0xa), region = 197 }

</bundles_post_ra>
